<compile_context>
chip_gen: v6e
topology: v6e:2x2x1
jax: 0.10.0
libtpu: 0.0.40
codegen_flags: <defaults>
</compile_context>

<pallas_src>
import functools

import jax
import jax.numpy as jnp
from jax.experimental import pallas as pl
from jax.experimental.pallas import tpu as pltpu


def point_sequential_kernel(
    x_ref, w1_ref, b1_ref, w2_ref, b2_ref, o_ref, *, n_rows, tile_n, mask_tail
):
    """Fused Linear -> GELU -> Linear on one tile of points (real channel widths)."""
    x = x_ref[...]                                   # (tile_n, C_in), native dtype
    if mask_tail:
        # Ragged N: zero the rows past the logical end of x so the partial
        # last tile never pushes garbage through the matmuls.  The masked
        # rows only land in output rows that Pallas discards anyway.
        row0 = pl.program_id(0) * tile_n
        rows = row0 + jax.lax.broadcasted_iota(jnp.int32, x.shape, 0)
        x = jnp.where(rows < n_rows, x, jnp.zeros_like(x))

    # MXU matmul in the operand dtype, f32 accumulation.
    h = jnp.dot(x, w1_ref[...], preferred_element_type=jnp.float32)
    h = h + b1_ref[...].astype(jnp.float32)          # (tile_n, H) f32
    # tanh-GELU: tanh runs on the EUP slot, cheap on the VALU.
    # TODO(synk): torch nn.GELU() default is the exact erf form; this is the
    # tanh approximation (matches nn.GELU(approximate='tanh'), ~1e-3 delta).
    h = jax.nn.gelu(h)
    h = h.astype(x.dtype)                            # operand dtype for 2nd MXU pass
    y = jnp.dot(h, w2_ref[...], preferred_element_type=jnp.float32)
    y = y + b2_ref[...].astype(jnp.float32)          # (tile_n, C_out) f32
    o_ref[...] = y.astype(o_ref.dtype)


def _round_up(v, m):
    return (v + m - 1) // m * m


@functools.partial(jax.jit, static_argnames=("tile_n",))
def point_sequential_forward(x, w1, b1, w2, b2, *, tile_n=2048):
    """PointSequential(Linear, GELU, Linear) forward on point features.

    x  : (N, C_in) point features (f32 or bf16; bf16 halves HBM traffic and is
         the recommended default on v6e/v7x -- this kernel is HBM-bound, the
         MXU is nowhere near binding so MXU shaping is not worth effort).
    tile_n : sweep 2048-8192 for large point clouds; on v7x keep at least ~2
         tiles total (ideally 8-16 per TensorCore) so both TCs stay busy.
         No channel padding is done, so only tile_n % 8 == 0 matters when the
         tile is smaller than N (handled below).
    """
    n, c_in = x.shape
    h_dim = w1.shape[1]
    c_out = w2.shape[1]

    # Pick the effective tile: full N for small clouds (block == full dim is
    # always legal), otherwise a multiple of 8 sublanes.
    tile = min(int(tile_n), n)
    if tile < n:
        tile = _round_up(tile, 8)
    if tile >= n:
        tile = n
    grid = (pl.cdiv(n, tile),)
    mask_tail = (n % tile) != 0

    kernel = functools.partial(
        point_sequential_kernel, n_rows=n, tile_n=tile, mask_tail=mask_tail
    )

    out = pl.pallas_call(
        kernel,
        out_shape=jax.ShapeDtypeStruct((n, c_out), x.dtype),
        grid_spec=pltpu.PrefetchScalarGridSpec(
            num_scalar_prefetch=0,
            grid=grid,
            in_specs=[
                # Streaming x tile: last dim equals the full (unpadded) C_in,
                # so the (tile, C_in) blocks are contiguous rows in HBM.
                pl.BlockSpec((tile, c_in), lambda i: (i, 0)),
                # Resident weights/biases (tiny; same block every grid step).
                # TODO(synk): for very wide hidden dims on v7x (64 MiB VMEM),
                # single-buffer these with pipeline_mode=pl.Buffered(1).
                pl.BlockSpec((c_in, h_dim), lambda i: (0, 0)),
                pl.BlockSpec((1, h_dim), lambda i: (0, 0)),
                pl.BlockSpec((h_dim, c_out), lambda i: (0, 0)),
                pl.BlockSpec((1, c_out), lambda i: (0, 0)),
            ],
            out_specs=pl.BlockSpec((tile, c_out), lambda i: (i, 0)),
        ),
        compiler_params=pltpu.CompilerParams(
            # Parallel over point tiles -> megacore sharding on v7x.
            dimension_semantics=("parallel",),
            # Explicit scoped-VMEM budget (v5e default is only 16 MiB); tiles
            # here are small even at tile_n=8192, C=128 (~16 MiB double-buffered).
            vmem_limit_bytes=32 * 1024 * 1024,
        ),
    )(x, w1, b1, w2, b2)

    return out


def reference_forward(x, w1, b1, w2, b2):
    """Pure-JAX reference of the same sequential module chain (same dtypes)."""
    h = jnp.dot(x, w1, preferred_element_type=jnp.float32) + b1.astype(jnp.float32)
    h = jax.nn.gelu(h).astype(x.dtype)
    y = jnp.dot(h, w2, preferred_element_type=jnp.float32) + b2.astype(jnp.float32)
    return y.astype(x.dtype)


if __name__ == "__main__":
    key = jax.random.PRNGKey(0)
    k_x, k_w1, k_b1, k_w2, k_b2 = jax.random.split(key, 5)

    # Small shapes; N deliberately NOT a multiple of 8 or of the small tile
    # size below, to exercise both the full-block path and the masked tail.
    N, C_IN, HID, C_OUT = 1000, 32, 64, 32

    x = jax.random.normal(k_x, (N, C_IN), dtype=jnp.float32)
    # Deterministic synthetic parameters (not a checkpoint load).
    # NOTE: biases are kept 2-D (1, H) / (1, C_out) for clean BlockSpecs;
    # numerically identical to PyTorch's 1-D bias.
    w1 = jax.random.normal(k_w1, (C_IN, HID), dtype=jnp.float32) * 0.05
    b1 = jax.random.normal(k_b1, (1, HID), dtype=jnp.float32) * 0.01
    w2 = jax.random.normal(k_w2, (HID, C_OUT), dtype=jnp.float32) * 0.05
    b2 = jax.random.normal(k_b2, (1, C_OUT), dtype=jnp.float32) * 0.01

    ref = reference_forward(x, w1, b1, w2, b2)

    # f32, single full-N tile (default tile_n > N).
    out = jax.block_until_ready(point_sequential_forward(x, w1, b1, w2, b2))
    assert out.shape == (N, C_OUT)
    assert jnp.allclose(out, ref, atol=1e-4, rtol=1e-4), "f32 mismatch (full tile)"

    # f32, small tiles with a masked ragged tail (1000 % 256 != 0).
    out_t = jax.block_until_ready(
        point_sequential_forward(x, w1, b1, w2, b2, tile_n=256)
    )
    assert jnp.allclose(out_t, ref, atol=1e-4, rtol=1e-4), "f32 mismatch (tiled/ragged)"

    # bf16 operand path (half HBM traffic, fast MXU path, f32 accumulation).
    xb, w1b, b1b, w2b, b2b = (a.astype(jnp.bfloat16) for a in (x, w1, b1, w2, b2))
    out_bf16 = jax.block_until_ready(
        point_sequential_forward(xb, w1b, b1b, w2b, b2b, tile_n=256)
    )
    assert out_bf16.shape == (N, C_OUT)
    assert jnp.allclose(out_bf16.astype(jnp.float32), ref, atol=5e-2, rtol=5e-2), (
        "bf16 mismatch vs f32 reference"
    )

    # TODO(synk): the spconv.SparseConvTensor branches of PointSequential.forward
    # (sparse-conv submodules) have no clean Pallas equivalent; only the dense
    # point-feature path (module(input.feat)) is implemented here.
    print("KERNEL_OK")
</pallas_src>

<mosaic_0001>
module attributes {stable_mosaic.version = 11 : i64} {
  func.func @point_sequential_kernel(%arg0: i32, %arg1: memref<1000x32xf32, #tpu.memory_space<vmem>>, %arg2: memref<32x64xf32, #tpu.memory_space<vmem>>, %arg3: memref<1x64xf32, #tpu.memory_space<vmem>>, %arg4: memref<64x32xf32, #tpu.memory_space<vmem>>, %arg5: memref<1x32xf32, #tpu.memory_space<vmem>>, %arg6: memref<1000x32xf32, #tpu.memory_space<vmem>>) attributes {dimension_semantics = [#tpu.dimension_semantics<parallel>], iteration_bounds = array<i64: 1>, scalar_prefetch = 0 : i64, scratch_operands = 0 : i64, tpu.core_type = #tpu.core_type<tc>, window_params = [{transform_indices = @transform_0, window_bounds = array<i64: 1000, 32>}, {pipeline_mode = #tpu.pipeline_mode<synchronous>, transform_indices = @transform_1, window_bounds = array<i64: 32, 64>}, {pipeline_mode = #tpu.pipeline_mode<synchronous>, transform_indices = @transform_2, window_bounds = array<i64: 1, 64>}, {pipeline_mode = #tpu.pipeline_mode<synchronous>, transform_indices = @transform_3, window_bounds = array<i64: 64, 32>}, {pipeline_mode = #tpu.pipeline_mode<synchronous>, transform_indices = @transform_4, window_bounds = array<i64: 1, 32>}, {transform_indices = @transform_5, window_bounds = array<i64: 1000, 32>}]} {
    %c0 = arith.constant 0 : index
    %c0_0 = arith.constant 0 : index
    %0 = vector.load %arg1[%c0, %c0_0] : memref<1000x32xf32, #tpu.memory_space<vmem>>, vector<1000x32xf32>
    %c0_1 = arith.constant 0 : index
    %c0_2 = arith.constant 0 : index
    %1 = vector.load %arg2[%c0_1, %c0_2] : memref<32x64xf32, #tpu.memory_space<vmem>>, vector<32x64xf32>
    %cst = arith.constant dense<0.000000e+00> : vector<1000x64xf32>
    %2 = tpu.matmul %0, %1, %cst {dimension_numbers = #tpu.dot_dimension_numbers<[1], [0], [0], [1], [0, 0, 1, 1], [], []>} : vector<1000x32xf32>, vector<32x64xf32>, vector<1000x64xf32> -> vector<1000x64xf32>
    %c0_3 = arith.constant 0 : index
    %c0_4 = arith.constant 0 : index
    %3 = vector.load %arg3[%c0_3, %c0_4] : memref<1x64xf32, #tpu.memory_space<vmem>>, vector<1x64xf32>
    %4 = vector.broadcast %3 : vector<1x64xf32> to vector<1000x64xf32>
    %5 = arith.addf %2, %4 : vector<1000x64xf32>
    %6 = arith.mulf %5, %5 : vector<1000x64xf32>
    %7 = arith.mulf %5, %6 : vector<1000x64xf32>
    %cst_5 = arith.constant 4.471500e-02 : f32
    %8 = vector.broadcast %cst_5 : f32 to vector<1000x64xf32>
    %9 = arith.mulf %8, %7 : vector<1000x64xf32>
    %10 = arith.addf %5, %9 : vector<1000x64xf32>
    %cst_6 = arith.constant 0.797884583 : f32
    %11 = vector.broadcast %cst_6 : f32 to vector<1000x64xf32>
    %12 = arith.mulf %11, %10 : vector<1000x64xf32>
    %13 = math.tanh %12 : vector<1000x64xf32>
    %cst_7 = arith.constant 1.000000e+00 : f32
    %14 = vector.broadcast %cst_7 : f32 to vector<1000x64xf32>
    %15 = arith.addf %14, %13 : vector<1000x64xf32>
    %cst_8 = arith.constant 5.000000e-01 : f32
    %16 = vector.broadcast %cst_8 : f32 to vector<1000x64xf32>
    %17 = arith.mulf %16, %15 : vector<1000x64xf32>
    %18 = arith.mulf %5, %17 : vector<1000x64xf32>
    %c0_9 = arith.constant 0 : index
    %c0_10 = arith.constant 0 : index
    %19 = vector.load %arg4[%c0_9, %c0_10] : memref<64x32xf32, #tpu.memory_space<vmem>>, vector<64x32xf32>
    %cst_11 = arith.constant dense<0.000000e+00> : vector<1000x32xf32>
    %20 = tpu.matmul %18, %19, %cst_11 {dimension_numbers = #tpu.dot_dimension_numbers<[1], [0], [0], [1], [0, 0, 1, 1], [], []>} : vector<1000x64xf32>, vector<64x32xf32>, vector<1000x32xf32> -> vector<1000x32xf32>
    %c0_12 = arith.constant 0 : index
    %c0_13 = arith.constant 0 : index
    %21 = vector.load %arg5[%c0_12, %c0_13] : memref<1x32xf32, #tpu.memory_space<vmem>>, vector<1x32xf32>
    %22 = vector.broadcast %21 : vector<1x32xf32> to vector<1000x32xf32>
    %23 = arith.addf %20, %22 : vector<1000x32xf32>
    %c0_14 = arith.constant 0 : index
    %c0_15 = arith.constant 0 : index
    %24 = vector.load %arg6[%c0_14, %c0_15] : memref<1000x32xf32, #tpu.memory_space<vmem>>, vector<1000x32xf32>
    tpu.vector_store %arg6[%c0_14, %c0_15], %23 {strides = array<i32>} : memref<1000x32xf32, #tpu.memory_space<vmem>>, vector<1000x32xf32>,
    return
  }
  func.func @transform_0(%arg0: i32) -> (i32, i32) {
    %c0_i32 = arith.constant 0 : i32
    %c0_i32_0 = arith.constant 0 : i32
    return %arg0, %c0_i32 : i32, i32
  }
  func.func @transform_1(%arg0: i32) -> (i32, i32) {
    %c0_i32 = arith.constant 0 : i32
    %c0_i32_0 = arith.constant 0 : i32
    %c0_i32_1 = arith.constant 0 : i32
    return %c0_i32, %c0_i32_0 : i32, i32
  }
  func.func @transform_2(%arg0: i32) -> (i32, i32) {
    %c0_i32 = arith.constant 0 : i32
    %c0_i32_0 = arith.constant 0 : i32
    %c0_i32_1 = arith.constant 0 : i32
    return %c0_i32, %c0_i32_0 : i32, i32
  }
  func.func @transform_3(%arg0: i32) -> (i32, i32) {
    %c0_i32 = arith.constant 0 : i32
    %c0_i32_0 = arith.constant 0 : i32
    %c0_i32_1 = arith.constant 0 : i32
    return %c0_i32, %c0_i32_0 : i32, i32
  }
  func.func @transform_4(%arg0: i32) -> (i32, i32) {
    %c0_i32 = arith.constant 0 : i32
    %c0_i32_0 = arith.constant 0 : i32
    %c0_i32_1 = arith.constant 0 : i32
    return %c0_i32, %c0_i32_0 : i32, i32
  }
  func.func @transform_5(%arg0: i32) -> (i32, i32) {
    %c0_i32 = arith.constant 0 : i32
    %c0_i32_0 = arith.constant 0 : i32
    return %arg0, %c0_i32 : i32, i32
  }
}

</mosaic_0001>

<bundles_post_ra>
// kernel: point_sequential_forward.1
= control target key start
LH: loop header
LB: loop body
LE: loop exit
PB: predicated region body
PF: predicated region fallthrough
CT: control target
= control target key end

     0   :  { %v5120_v0 = vmov 0.0   ;;  %vm5121_vm0 = vmmov 0   ;;  %vm156_vm1 = vcmask 261120   ;;  %vm2362_vm2 = vcmask 523264   ;;  %s8006_s1 = inlined_call_operand.vmem [shape: f32[32,64], index: 1, kind: input, shape index: {}]   ;;  %s8007_s0 = inlined_call_operand.vmem [shape: f32[1000,32], index: 0, kind: input, shape index: {}]   ;;  %s8008_s3 = inlined_call_operand.vmem [shape: f32[64,32], index: 3, kind: input, shape index: {}]   ;;  %s8009_s2 = inlined_call_operand.vmem [shape: f32[1,64], index: 2, kind: input, shape index: {}]   ;;  %s8010_s4 = inlined_call_operand.vmem [shape: f32[1,32], index: 4, kind: input, shape index: {}]   ;;  %s8011_s5 = inlined_call_operand.vmem [shape: f32[1000,32], index: 5, kind: output, shape index: {}]  }
   0x1   :  { %4071 = vmatprep.subr.mxu0 %v5120_v0  ;;  %v148_v1 = vld [vmem:[%s8006_s1 + $0x18] sm:$0xff]  ;;  %v147_v2 = vld [vmem:[%s8006_s1 + $0x10] sm:$0xff]  ;;  %4079 = vmatprep.mubr.msk.f32.mxu0 %vm5121_vm0, %v5120_v0  ;;  %v146_v3 = vld [vmem:[%s8006_s1 + $0x8] sm:$0xff] }
   0x2   :  { %4072 = vmatpush3.msra.mxu0 %v148_v1  ;;  %4845 = vmatprep.subr.mxu1 %v5120_v0  ;;  %v145_v4 = vld [vmem:[%s8006_s1] sm:$0xff]  ;;  %v21_v6 = vld [vmem:[%s8007_s0 + $0x8] sm:$0xff]  ;;  %v22_v7 = vld [vmem:[%s8007_s0 + $0x10] sm:$0xff] }
   0x3   :  { %4073 = vmatprep.subr.mxu0 %v5120_v0  ;;  %4473 = vmatprep.mubr.msk.f32.mxu1 %vm5121_vm0, %v5120_v0  ;;  %v20_v5 = vld [vmem:[%s8007_s0] sm:$0xff]  ;;  %v23_v8 = vld [vmem:[%s8007_s0 + $0x18] sm:$0xff]  ;;  %v25_v10 = vld [vmem:[%s8007_s0 + $0x28] sm:$0xff] }
   0x4   :  { %4074 = vmatpush3.msra.mxu0 %v147_v2  ;;  %v24_v9 = vld [vmem:[%s8007_s0 + $0x20] sm:$0xff]  ;;  %v26_v11 = vld [vmem:[%s8007_s0 + $0x30] sm:$0xff]  ;;  %v27_v12 = vld [vmem:[%s8007_s0 + $0x38] sm:$0xff] }
   0x5   :  { %4075 = vmatprep.subr.mxu0 %v5120_v0  ;;  %v28_v13 = vld [vmem:[%s8007_s0 + $0x40] sm:$0xff]  ;;  %v29_v14 = vld [vmem:[%s8007_s0 + $0x48] sm:$0xff]  ;;  %v30_v15 = vld [vmem:[%s8007_s0 + $0x50] sm:$0xff] }
   0x6   :  { %4076 = vmatpush3.msra.mxu0 %v146_v3  ;;  %v31_v16 = vld [vmem:[%s8007_s0 + $0x58] sm:$0xff]  ;;  %v32_v17 = vld [vmem:[%s8007_s0 + $0x60] sm:$0xff]  ;;  %v33_v18 = vld [vmem:[%s8007_s0 + $0x68] sm:$0xff] }
   0x7   :  { %4077 = vmatprep.subr.mxu0 %v5120_v0  ;;  %v34_v19 = vld [vmem:[%s8007_s0 + $0x70] sm:$0xff]  ;;  %v35_v20 = vld [vmem:[%s8007_s0 + $0x78] sm:$0xff]  ;;  %v36_v21 = vld [vmem:[%s8007_s0 + $0x80] sm:$0xff] }
   0x8   :  { %4078 = vmatpush3.msra.mxu0 %v145_v4  ;;  %v37_v22 = vld [vmem:[%s8007_s0 + $0x88] sm:$0xff]  ;;  %v38_v23 = vld [vmem:[%s8007_s0 + $0x90] sm:$0xff]  ;;  %v39_v24 = vld [vmem:[%s8007_s0 + $0x98] sm:$0xff] }
   0x9   :  { %4080 = vmatmul.mubr.msk.f32.vlgmr.msra.gmra.mxu0 %vm156_vm1, %v20_v5  ;;  %4454 = vmatprep.subr.mxu0 %v5120_v0  ;;  %v40_v25 = vld [vmem:[%s8007_s0 + $0xa0] sm:$0xff]  ;;  %v41_v26 = vld [vmem:[%s8007_s0 + $0xa8] sm:$0xff]  ;;  %v42_v27 = vld [vmem:[%s8007_s0 + $0xb0] sm:$0xff] }
   0xa   :  { %4082 = vmatprep.mubr.msk.f32.mxu0 %vm5121_vm0, %v5120_v0  ;;  %v2354_v28 = vld [vmem:[%s8008_s3 + $0x38] sm:$0xff]  ;;  %v2353_v29 = vld [vmem:[%s8008_s3 + $0x30] sm:$0xff]  ;;  %v2352_v31 = vld [vmem:[%s8008_s3 + $0x28] sm:$0xff] }
   0xb   :  { %4853 = vmatpush3.msra.mxu1 %v2354_v28  ;;  %4455 = vmatpush3.msra.mxu0 %v2354_v28  ;;  %v43_v30 = vld [vmem:[%s8007_s0 + $0xb8] sm:$0xff]  ;;  %v2351_v32 = vld [vmem:[%s8008_s3 + $0x20] sm:$0xff]  ;;  %v2349_v35 = vld [vmem:[%s8008_s3 + $0x10] sm:$0xff] }
   0xc   :  { %4846 = vmatprep.subr.mxu1 %v5120_v0  ;;  %4456 = vmatprep.subr.mxu0 %v5120_v0  ;;  %v44_v33 = vld [vmem:[%s8007_s0 + $0xc0] sm:$0xff]  ;;  %v2350_v34 = vld [vmem:[%s8008_s3 + $0x18] sm:$0xff]  ;;  %v45_v36 = vld [vmem:[%s8007_s0 + $0xc8] sm:$0xff] }
   0xd   :  { %4083 = vmatmul.mubr.msk.f32.gmra.mxu0 %vm156_vm1, %v21_v6  ;;  %4854 = vmatpush3.msra.mxu1 %v2353_v29  ;;  %v2348_v37 = vld [vmem:[%s8008_s3 + $0x8] sm:$0xff]  ;;  %v2347_v38 = vld [vmem:[%s8008_s3] sm:$0xff]  ;;  %v46_v39 = vld [vmem:[%s8007_s0 + $0xd0] sm:$0xff] }
   0xe   :  { %4085 = vmatprep.mubr.msk.f32.mxu0 %vm5121_vm0, %v5120_v0  ;;  %4847 = vmatprep.subr.mxu1 %v5120_v0  ;;  %v47_v40 = vld [vmem:[%s8007_s0 + $0xd8] sm:$0xff]  ;;  %v48_v41 = vld [vmem:[%s8007_s0 + $0xe0] sm:$0xff]  ;;  %v49_v42 = vld [vmem:[%s8007_s0 + $0xe8] sm:$0xff] }
   0xf   :  { %4855 = vmatpush3.msra.mxu1 %v2352_v31  ;;  %4457 = vmatpush3.msra.mxu0 %v2353_v29  ;;  %v50_v43 = vld [vmem:[%s8007_s0 + $0xf0] sm:$0xff]  ;;  %v51_v44 = vld [vmem:[%s8007_s0 + $0xf8] sm:$0xff]  ;;  %v52_v45 = vld [vmem:[%s8007_s0 + $0x100] sm:$0xff] }
  0x10   :  { %4848 = vmatprep.subr.mxu1 %v5120_v0  ;;  %4458 = vmatprep.subr.mxu0 %v5120_v0  ;;  %v53_v46 = vld [vmem:[%s8007_s0 + $0x108] sm:$0xff]  ;;  %v54_v47 = vld [vmem:[%s8007_s0 + $0x110] sm:$0xff]  ;;  %v55_v48 = vld [vmem:[%s8007_s0 + $0x118] sm:$0xff] }
  0x11   :  { %4086 = vmatmul.mubr.msk.f32.gmra.mxu0 %vm156_vm1, %v22_v7  ;;  %4856 = vmatpush3.msra.mxu1 %v2351_v32  ;;  %v56_v49 = vld [vmem:[%s8007_s0 + $0x120] sm:$0xff]  ;;  %v57_v50 = vld [vmem:[%s8007_s0 + $0x128] sm:$0xff]  ;;  %v58_v51 = vld [vmem:[%s8007_s0 + $0x130] sm:$0xff] }
  0x12   :  { %4088 = vmatprep.mubr.msk.f32.mxu0 %vm5121_vm0, %v5120_v0  ;;  %4849 = vmatprep.subr.mxu1 %v5120_v0  ;;  %v59_v52 = vld [vmem:[%s8007_s0 + $0x138] sm:$0xff]  ;;  %v60_v53 = vld [vmem:[%s8007_s0 + $0x140] sm:$0xff]  ;;  %v61_v54 = vld [vmem:[%s8007_s0 + $0x148] sm:$0xff] }
  0x13   :  { %4459 = vmatpush3.msra.mxu0 %v2352_v31  ;;  %4857 = vmatpush3.msra.mxu1 %v2350_v34  ;;  %v62_v55 = vld [vmem:[%s8007_s0 + $0x150] sm:$0xff]  ;;  %v63_v56 = vld [vmem:[%s8007_s0 + $0x158] sm:$0xff]  ;;  %v64_v57 = vld [vmem:[%s8007_s0 + $0x160] sm:$0xff] }
  0x14   :  { %4460 = vmatprep.subr.mxu0 %v5120_v0  ;;  %4850 = vmatprep.subr.mxu1 %v5120_v0  ;;  %v65_v58 = vld [vmem:[%s8007_s0 + $0x168] sm:$0xff]  ;;  %v66_v59 = vld [vmem:[%s8007_s0 + $0x170] sm:$0xff]  ;;  %v67_v60 = vld [vmem:[%s8007_s0 + $0x178] sm:$0xff] }
  0x15   :  { %4089 = vmatmul.mubr.msk.f32.gmra.mxu0 %vm156_vm1, %v23_v8  ;;  %4858 = vmatpush3.msra.mxu1 %v2349_v35  ;;  %v68_v61 = vld [vmem:[%s8007_s0 + $0x180] sm:$0xff]  ;;  %v69_v63 = vld [vmem:[%s8007_s0 + $0x188] sm:$0xff]  ;;  %v70_v5 = vld [vmem:[%s8007_s0 + $0x190] sm:$0xff] }
  0x16   :  { %4091 = vmatprep.mubr.msk.f32.mxu0 %vm5121_vm0, %v5120_v0  ;;  %4851 = vmatprep.subr.mxu1 %v5120_v0  ;;  %v5514_v2 = vld [vmem:[%s8009_s2] ss:$0 sm:$0xff]  ;;  %v73_v28 = vld [vmem:[%s8007_s0 + $0x1a8] sm:$0xff] }
  0x17   :  { %4461 = vmatpush3.msra.mxu0 %v2351_v32  ;;  %4859 = vmatpush3.msra.mxu1 %v2348_v37 }
  0x18   :  { %4462 = vmatprep.subr.mxu0 %v5120_v0  ;;  %4852 = vmatprep.subr.mxu1 %v5120_v0 }
  0x19   :  { %4092 = vmatmul.mubr.msk.f32.gmra.mxu0 %vm156_vm1, %v24_v9  ;;  %4860 = vmatpush3.msra.mxu1 %v2347_v38 }
  0x1a   :  { %4094 = vmatprep.mubr.msk.f32.mxu0 %vm5121_vm0, %v5120_v0  ;;  %4463 = vmatpush3.msra.mxu0 %v2350_v34 }
  0x1b   :  { %4464 = vmatprep.subr.mxu0 %v5120_v0 }
  0x1c   :  { %4465 = vmatpush3.msra.mxu0 %v2349_v35 }
  0x1d   :  { %4095 = vmatmul.mubr.msk.f32.gmra.mxu0 %vm156_vm1, %v25_v10  ;;  %4466 = vmatprep.subr.mxu0 %v5120_v0 }
  0x1e   :  { %4097 = vmatprep.mubr.msk.f32.mxu0 %vm5121_vm0, %v5120_v0  ;;  %4467 = vmatpush3.msra.mxu0 %v2348_v37  ;;  %v74_v37 = vld [vmem:[%s8007_s0 + $0x1b0] sm:$0xff] }
  0x1f   :  { %4468 = vmatprep.subr.mxu0 %v5120_v0 }
  0x20   :  { %4469 = vmatpush3.msra.mxu0 %v2347_v38 }
  0x21   :  { %4098 = vmatmul.mubr.msk.f32.gmra.mxu0 %vm156_vm1, %v26_v11  ;;  %v71_v11 = vld [vmem:[%s8007_s0 + $0x198] sm:$0xff] }
  0x22   :  { %4100 = vmatprep.mubr.msk.f32.mxu0 %vm5121_vm0, %v5120_v0 }
  0x25   :  { %4101 = vmatmul.mubr.msk.f32.gmra.mxu0 %vm156_vm1, %v27_v12 }
  0x26   :  { %4103 = vmatprep.mubr.msk.f32.mxu0 %vm5121_vm0, %v5120_v0 }
  0x29   :  { %4104 = vmatmul.mubr.msk.f32.gmra.mxu0 %vm156_vm1, %v28_v13 }
  0x2a   :  { %4106 = vmatprep.mubr.msk.f32.mxu0 %vm5121_vm0, %v5120_v0 }
  0x2d   :  { %4107 = vmatmul.mubr.msk.f32.gmra.mxu0 %vm156_vm1, %v29_v14 }
  0x2e   :  { %4109 = vmatprep.mubr.msk.f32.mxu0 %vm5121_vm0, %v5120_v0 }
  0x31   :  { %4110 = vmatmul.mubr.msk.f32.gmra.mxu0 %vm156_vm1, %v30_v15 }
  0x32   :  { %4112 = vmatprep.mubr.msk.f32.mxu0 %vm5121_vm0, %v5120_v0 }
  0x35   :  { %4113 = vmatmul.mubr.msk.f32.gmra.mxu0 %vm156_vm1, %v31_v16 }
  0x36   :  { %4115 = vmatprep.mubr.msk.f32.mxu0 %vm5121_vm0, %v5120_v0 }
  0x39   :  { %4116 = vmatmul.mubr.msk.f32.gmra.mxu0 %vm156_vm1, %v32_v17 }
  0x3a   :  { %4118 = vmatprep.mubr.msk.f32.mxu0 %vm5121_vm0, %v5120_v0 }
  0x3d   :  { %4119 = vmatmul.mubr.msk.f32.gmra.mxu0 %vm156_vm1, %v33_v18 }
  0x3e   :  { %4121 = vmatprep.mubr.msk.f32.mxu0 %vm5121_vm0, %v5120_v0 }
  0x41   :  { %4122 = vmatmul.mubr.msk.f32.gmra.mxu0 %vm156_vm1, %v34_v19  ;;  %v72_v19 = vld [vmem:[%s8007_s0 + $0x1a0] sm:$0xff] }
  0x42   :  { %4124 = vmatprep.mubr.msk.f32.mxu0 %vm5121_vm0, %v5120_v0 }
  0x45   :  { %4125 = vmatmul.mubr.msk.f32.gmra.mxu0 %vm156_vm1, %v35_v20 }
  0x46   :  { %4127 = vmatprep.mubr.msk.f32.mxu0 %vm5121_vm0, %v5120_v0 }
  0x49   :  { %4128 = vmatmul.mubr.msk.f32.gmra.mxu0 %vm156_vm1, %v36_v21 }
  0x4a   :  { %4130 = vmatprep.mubr.msk.f32.mxu0 %vm5121_vm0, %v5120_v0 }
  0x4d   :  { %4131 = vmatmul.mubr.msk.f32.gmra.mxu0 %vm156_vm1, %v37_v22 }
  0x4e   :  { %4133 = vmatprep.mubr.msk.f32.mxu0 %vm5121_vm0, %v5120_v0 }
  0x51   :  { %4134 = vmatmul.mubr.msk.f32.gmra.mxu0 %vm156_vm1, %v38_v23 }
  0x52   :  { %4136 = vmatprep.mubr.msk.f32.mxu0 %vm5121_vm0, %v5120_v0 }
  0x55   :  { %4137 = vmatmul.mubr.msk.f32.gmra.mxu0 %vm156_vm1, %v39_v24 }
  0x56   :  { %4139 = vmatprep.mubr.msk.f32.mxu0 %vm5121_vm0, %v5120_v0 }
  0x59   :  { %4140 = vmatmul.mubr.msk.f32.gmra.mxu0 %vm156_vm1, %v40_v25 }
  0x5a   :  { %4142 = vmatprep.mubr.msk.f32.mxu0 %vm5121_vm0, %v5120_v0 }
  0x5d   :  { %4143 = vmatmul.mubr.msk.f32.gmra.mxu0 %vm156_vm1, %v41_v26 }
  0x5e   :  { %4145 = vmatprep.mubr.msk.f32.mxu0 %vm5121_vm0, %v5120_v0 }
  0x61   :  { %4146 = vmatmul.mubr.msk.f32.gmra.mxu0 %vm156_vm1, %v42_v27 }
  0x62   :  { %4148 = vmatprep.mubr.msk.f32.mxu0 %vm5121_vm0, %v5120_v0 }
  0x65   :  { %4149 = vmatmul.mubr.msk.f32.gmra.mxu0 %vm156_vm1, %v43_v30 }
  0x66   :  { %4151 = vmatprep.mubr.msk.f32.mxu0 %vm5121_vm0, %v5120_v0 }
  0x69   :  { %4152 = vmatmul.mubr.msk.f32.gmra.mxu0 %vm156_vm1, %v44_v33 }
  0x6a   :  { %4154 = vmatprep.mubr.msk.f32.mxu0 %vm5121_vm0, %v5120_v0 }
  0x6d   :  { %4155 = vmatmul.mubr.msk.f32.gmra.mxu0 %vm156_vm1, %v45_v36 }
  0x6e   :  { %4157 = vmatprep.mubr.msk.f32.mxu0 %vm5121_vm0, %v5120_v0 }
  0x71   :  { %4158 = vmatmul.mubr.msk.f32.gmra.mxu0 %vm156_vm1, %v46_v39 }
  0x72   :  { %4160 = vmatprep.mubr.msk.f32.mxu0 %vm5121_vm0, %v5120_v0 }
  0x75   :  { %4161 = vmatmul.mubr.msk.f32.gmra.mxu0 %vm156_vm1, %v47_v40 }
  0x76   :  { %4163 = vmatprep.mubr.msk.f32.mxu0 %vm5121_vm0, %v5120_v0 }
  0x79   :  { %4164 = vmatmul.mubr.msk.f32.gmra.mxu0 %vm156_vm1, %v48_v41 }
  0x7a   :  { %4166 = vmatprep.mubr.msk.f32.mxu0 %vm5121_vm0, %v5120_v0 }
  0x7d   :  { %4167 = vmatmul.mubr.msk.f32.gmra.mxu0 %vm156_vm1, %v49_v42 }
  0x7e   :  { %4169 = vmatprep.mubr.msk.f32.mxu0 %vm5121_vm0, %v5120_v0 }
  0x81   :  { %4170 = vmatmul.mubr.msk.f32.gmra.mxu0 %vm156_vm1, %v50_v43 }
  0x82   :  { %4172 = vmatprep.mubr.msk.f32.mxu0 %vm5121_vm0, %v5120_v0 }
  0x85   :  { %4173 = vmatmul.mubr.msk.f32.gmra.mxu0 %vm156_vm1, %v51_v44 }
  0x86   :  { %4175 = vmatprep.mubr.msk.f32.mxu0 %vm5121_vm0, %v5120_v0 }
  0x89   :  { %4176 = vmatmul.mubr.msk.f32.gmra.mxu0 %vm156_vm1, %v52_v45 }
  0x8a   :  { %4178 = vmatprep.mubr.msk.f32.mxu0 %vm5121_vm0, %v5120_v0 }
  0x8d   :  { %4179 = vmatmul.mubr.msk.f32.gmra.mxu0 %vm156_vm1, %v53_v46  ;;  %v75_v46 = vld [vmem:[%s8007_s0 + $0x1b8] sm:$0xff] }
  0x8e   :  { %4181 = vmatprep.mubr.msk.f32.mxu0 %vm5121_vm0, %v5120_v0 }
  0x91   :  { %4182 = vmatmul.mubr.msk.f32.gmra.mxu0 %vm156_vm1, %v54_v47 }
  0x92   :  { %4184 = vmatprep.mubr.msk.f32.mxu0 %vm5121_vm0, %v5120_v0 }
  0x95   :  { %4185 = vmatmul.mubr.msk.f32.gmra.mxu0 %vm156_vm1, %v55_v48 }
  0x96   :  { %4187 = vmatprep.mubr.msk.f32.mxu0 %vm5121_vm0, %v5120_v0 }
  0x99   :  { %4188 = vmatmul.mubr.msk.f32.gmra.mxu0 %vm156_vm1, %v56_v49 }
  0x9a   :  { %4190 = vmatprep.mubr.msk.f32.mxu0 %vm5121_vm0, %v5120_v0 }
  0x9d   :  { %4191 = vmatmul.mubr.msk.f32.gmra.mxu0 %vm156_vm1, %v57_v50 }
  0x9e   :  { %4193 = vmatprep.mubr.msk.f32.mxu0 %vm5121_vm0, %v5120_v0 }
  0xa1   :  { %4194 = vmatmul.mubr.msk.f32.gmra.mxu0 %vm156_vm1, %v58_v51 }
  0xa2   :  { %4196 = vmatprep.mubr.msk.f32.mxu0 %vm5121_vm0, %v5120_v0 }
  0xa5   :  { %4197 = vmatmul.mubr.msk.f32.gmra.mxu0 %vm156_vm1, %v59_v52 }
  0xa6   :  { %4199 = vmatprep.mubr.msk.f32.mxu0 %vm5121_vm0, %v5120_v0 }
  0xa9   :  { %4200 = vmatmul.mubr.msk.f32.gmra.mxu0 %vm156_vm1, %v60_v53 }
  0xaa   :  { %4202 = vmatprep.mubr.msk.f32.mxu0 %vm5121_vm0, %v5120_v0 }
  0xad   :  { %4203 = vmatmul.mubr.msk.f32.gmra.mxu0 %vm156_vm1, %v61_v54  ;;  %v76_v54 = vld [vmem:[%s8007_s0 + $0x1c0] sm:$0xff] }
  0xae   :  { %4205 = vmatprep.mubr.msk.f32.mxu0 %vm5121_vm0, %v5120_v0 }
  0xb1   :  { %4206 = vmatmul.mubr.msk.f32.gmra.mxu0 %vm156_vm1, %v62_v55 }
  0xb2   :  { %4208 = vmatprep.mubr.msk.f32.mxu0 %vm5121_vm0, %v5120_v0 }
  0xb5   :  { %4209 = vmatmul.mubr.msk.f32.gmra.mxu0 %vm156_vm1, %v63_v56 }
  0xb6   :  { %4211 = vmatprep.mubr.msk.f32.mxu0 %vm5121_vm0, %v5120_v0 }
  0xb9   :  { %4212 = vmatmul.mubr.msk.f32.gmra.mxu0 %vm156_vm1, %v64_v57 }
  0xba   :  { %4214 = vmatprep.mubr.msk.f32.mxu0 %vm5121_vm0, %v5120_v0 }
  0xbd   :  { %4215 = vmatmul.mubr.msk.f32.gmra.mxu0 %vm156_vm1, %v65_v58 }
  0xbe   :  { %4217 = vmatprep.mubr.msk.f32.mxu0 %vm5121_vm0, %v5120_v0 }
  0xc1   :  { %4218 = vmatmul.mubr.msk.f32.gmra.mxu0 %vm156_vm1, %v66_v59 }
  0xc2   :  { %4220 = vmatprep.mubr.msk.f32.mxu0 %vm5121_vm0, %v5120_v0 }
  0xc5   :  { %4221 = vmatmul.mubr.msk.f32.gmra.mxu0 %vm156_vm1, %v67_v60 }
  0xc6   :  { %4223 = vmatprep.mubr.msk.f32.mxu0 %vm5121_vm0, %v5120_v0 }
  0xc9   :  { %v5503_v62 = vpop.f32.mrf.mxu0  ;;  %4224 = vmatmul.mubr.msk.f32.gmra.mxu0 %vm156_vm1, %v68_v61 }
  0xca   :  { %4226 = vmatprep.mubr.msk.f32.mxu0 %vm5121_vm0, %v5120_v0 }
  0xcb   :  { %v4081_v1 = vpop.f32.mrf.mxu0 }
  0xcd   :  { %v603_v3 = vpop.f32.mrf.mxu0  ;;  %4227 = vmatmul.mubr.msk.f32.gmra.mxu0 %vm156_vm1, %v69_v63 }
  0xce   :  { %v5518_v4 = vadd.f32 %v5514_v2, %v603_v3  ;;  %4229 = vmatprep.mubr.msk.f32.mxu0 %vm5121_vm0, %v5120_v0 }
  0xcf   :  { %v4084_v6 = vpop.f32.mrf.mxu0 }
  0xd0   :  { %v1223_v7 = vmul.f32 %v5518_v4, %v5518_v4 }
  0xd1   :  { %v608_v8 = vpop.f32.mrf.mxu0  ;;  %4230 = vmatmul.mubr.msk.f32.gmra.mxu0 %vm156_vm1, %v70_v5  ;;  %v77_v5 = vld [vmem:[%s8007_s0 + $0x1c8] sm:$0xff] }
  0xd2   :  { %v1348_v9 = vmul.f32 %v1223_v7, %v5518_v4  ;;  %v5530_v10 = vadd.f32 %v5514_v2, %v608_v8  ;;  %4232 = vmatprep.mubr.msk.f32.mxu0 %vm5121_vm0, %v5120_v0 }
  0xd3   :  { %v4087_v12 = vpop.f32.mrf.mxu0 }
  0xd4   :  { %v1473_v13 = vmul.f32 0.044715, %v1348_v9  ;;  %v1224_v14 = vmul.f32 %v5530_v10, %v5530_v10 }
  0xd5   :  { %v613_v15 = vpop.f32.mrf.mxu0  ;;  %4233 = vmatmul.mubr.msk.f32.gmra.mxu0 %vm156_vm1, %v71_v11 }
  0xd6   :  { %v1598_v16 = vadd.f32 %v1473_v13, %v5518_v4  ;;  %v1349_v17 = vmul.f32 %v1224_v14, %v5530_v10  ;;  %v5543_v18 = vadd.f32 %v5514_v2, %v613_v15  ;;  %4235 = vmatprep.mubr.msk.f32.mxu0 %vm5121_vm0, %v5120_v0 }
  0xd7   :  { %v4090_v20 = vpop.f32.mrf.mxu0 }
  0xd8   :  { %v1723_v21 = vmul.f32 0.7978846, %v1598_v16  ;;  %v1474_v22 = vmul.f32 0.044715, %v1349_v17  ;;  %v1225_v23 = vmul.f32 %v5543_v18, %v5543_v18 }
  0xd9   :  { %v618_v24 = vpop.f32.mrf.mxu0  ;;  %4236 = vmatmul.mubr.msk.f32.gmra.mxu0 %vm156_vm1, %v72_v19 }
  0xda   :  { %4863 = vtanh.f32 %v1723_v21  ;;  %v1599_v25 = vadd.f32 %v1474_v22, %v5530_v10  ;;  %v1350_v26 = vmul.f32 %v1225_v23, %v5543_v18  ;;  %v5556_v27 = vadd.f32 %v5514_v2, %v618_v24  ;;  %4238 = vmatprep.mubr.msk.f32.mxu0 %vm5121_vm0, %v5120_v0 }
  0xdb   :  { %v4093_v29 = vpop.f32.mrf.mxu0 }
  0xdc   :  { %v1724_v30 = vmul.f32 0.7978846, %v1599_v25  ;;  %v1475_v31 = vmul.f32 0.044715, %v1350_v26  ;;  %v1226_v32 = vmul.f32 %v5556_v27, %v5556_v27 }
  0xdd   :  { %v623_v33 = vpop.f32.mrf.mxu0  ;;  %4239 = vmatmul.mubr.msk.f32.gmra.mxu0 %vm156_vm1, %v73_v28 }
  0xde   :  { %4865 = vtanh.f32 %v1724_v30  ;;  %v1600_v34 = vadd.f32 %v1475_v31, %v5543_v18  ;;  %v1351_v35 = vmul.f32 %v1226_v32, %v5556_v27  ;;  %v5569_v36 = vadd.f32 %v5514_v2, %v623_v33  ;;  %4241 = vmatprep.mubr.msk.f32.mxu0 %vm5121_vm0, %v5120_v0 }
  0xdf   :  { %v4096_v38 = vpop.f32.mrf.mxu0 }
  0xe0   :  { %v1725_v39 = vmul.f32 0.7978846, %v1600_v34  ;;  %v1476_v40 = vmul.f32 0.044715, %v1351_v35  ;;  %v1227_v41 = vmul.f32 %v5569_v36, %v5569_v36 }
  0xe1   :  { %v628_v42 = vpop.f32.mrf.mxu0  ;;  %4242 = vmatmul.mubr.msk.f32.gmra.mxu0 %vm156_vm1, %v74_v37 }
  0xe2   :  { %4867 = vtanh.f32 %v1725_v39  ;;  %v1601_v43 = vadd.f32 %v1476_v40, %v5556_v27  ;;  %v1352_v44 = vmul.f32 %v1227_v41, %v5569_v36  ;;  %v5582_v45 = vadd.f32 %v5514_v2, %v628_v42  ;;  %4244 = vmatprep.mubr.msk.f32.mxu0 %vm5121_vm0, %v5120_v0 }
  0xe3   :  { %v4099_v47 = vpop.f32.mrf.mxu0 }
  0xe4   :  { %v1726_v48 = vmul.f32 0.7978846, %v1601_v43  ;;  %v1477_v49 = vmul.f32 0.044715, %v1352_v44  ;;  %v1228_v50 = vmul.f32 %v5582_v45, %v5582_v45 }
  0xe5   :  { %v633_v51 = vpop.f32.mrf.mxu0  ;;  %4245 = vmatmul.mubr.msk.f32.gmra.mxu0 %vm156_vm1, %v75_v46 }
  0xe6   :  { %4869 = vtanh.f32 %v1726_v48  ;;  %v1602_v52 = vadd.f32 %v1477_v49, %v5569_v36  ;;  %v1353_v53 = vmul.f32 %v1228_v50, %v5582_v45  ;;  %4247 = vmatprep.mubr.msk.f32.mxu0 %vm5121_vm0, %v5120_v0  ;;  %v5600_v56 = vadd.f32 %v5514_v2, %v633_v51 }
  0xe7   :  { %v4864_v55 = vpop.eup %4863  ;;  %v4102_v57 = vpop.f32.mrf.mxu0 }
  0xe8   :  { %v1727_v58 = vmul.f32 0.7978846, %v1602_v52  ;;  %v1478_v59 = vmul.f32 0.044715, %v1353_v53  ;;  %v1973_v60 = vadd.f32 1.0, %v4864_v55  ;;  %v1229_v61 = vmul.f32 %v5600_v56, %v5600_v56 }
  0xe9   :  { %v638_v63 = vpop.f32.mrf.mxu0  ;;  %4248 = vmatmul.mubr.msk.f32.gmra.mxu0 %vm156_vm1, %v76_v54 }
  0xea   :  { %4871 = vtanh.f32 %v1727_v58  ;;  %v1603_v1 = vadd.f32 %v1478_v59, %v5582_v45  ;;  %v5607_v3 = vadd.f32 %v5514_v2, %v638_v63  ;;  %4250 = vmatprep.mubr.msk.f32.mxu0 %vm5121_vm0, %v5120_v0  ;;  %v2098_v6 = vmul.f32 0.5, %v1973_v60 }
  0xeb   :  { %v4866_v7 = vpop.eup %4865  ;;  %v1354_v8 = vmul.f32 %v1229_v61, %v5600_v56  ;;  %v4105_v9 = vpop.f32.mrf.mxu0  ;;  %v81_v61 = vld [vmem:[%s8007_s0 + $0x1e8] sm:$0xff] }
  0xec   :  { %v1728_v11 = vmul.f32 0.7978846, %v1603_v1  ;;  %v1230_v12 = vmul.f32 %v5607_v3, %v5607_v3  ;;  %v2223_v13 = vmul.f32 %v2098_v6, %v5518_v4  ;;  %v1974_v14 = vadd.f32 1.0, %v4866_v7  ;;  %v78_v4 = vld [vmem:[%s8007_s0 + $0x1d0] sm:$0xff] }
  0xed   :  { %v1479_v15 = vmul.f32 0.044715, %v1354_v8  ;;  %v643_v16 = vpop.f32.mrf.mxu0  ;;  %4251 = vmatmul.mubr.msk.f32.gmra.mxu0 %vm156_vm1, %v77_v5 }
  0xee   :  { %4873 = vtanh.f32 %v1728_v11  ;;  %v1355_v17 = vmul.f32 %v1230_v12, %v5607_v3  ;;  %v5621_v19 = vadd.f32 %v5514_v2, %v643_v16  ;;  %4474 = vmatmul.mubr.msk.f32.vlgmr.msra.gmra.mxu1 %vm2362_vm2, %v2223_v13  ;;  %4253 = vmatprep.mubr.msk.f32.mxu0 %vm5121_vm0, %v5120_v0  ;;  %v2099_v20 = vmul.f32 0.5, %v1974_v14 }
  0xef   :  { %v4868_v21 = vpop.eup %4867  ;;  %v1604_v22 = vadd.f32 %v1479_v15, %v5600_v56  ;;  %v4108_v23 = vpop.f32.mrf.mxu0  ;;  %4476 = vmatprep.mubr.msk.f32.mxu1 %vm5121_vm0, %v5120_v0  ;;  %v82_v15 = vld [vmem:[%s8007_s0 + $0x1f0] sm:$0xff] }
  0xf0   :  { %v1480_v24 = vmul.f32 0.044715, %v1355_v17  ;;  %v1231_v25 = vmul.f32 %v5621_v19, %v5621_v19  ;;  %v2224_v26 = vmul.f32 %v2099_v20, %v5530_v10  ;;  %v1975_v28 = vadd.f32 1.0, %v4868_v21  ;;  %v79_v10 = vld [vmem:[%s8007_s0 + $0x1d8] sm:$0xff] }
  0xf1   :  { %v1729_v29 = vmul.f32 0.7978846, %v1604_v22  ;;  %v648_v30 = vpop.f32.mrf.mxu0  ;;  %4254 = vmatmul.mubr.msk.f32.gmra.mxu0 %vm156_vm1, %v78_v4 }
  0xf2   :  { %v1605_v31 = vadd.f32 %v1480_v24, %v5607_v3  ;;  %v1356_v32 = vmul.f32 %v1231_v25, %v5621_v19  ;;  %v5639_v33 = vadd.f32 %v5514_v2, %v648_v30  ;;  %4477 = vmatmul.mubr.msk.f32.gmra.mxu1 %vm2362_vm2, %v2224_v26  ;;  %4256 = vmatprep.mubr.msk.f32.mxu0 %vm5121_vm0, %v5120_v0  ;;  %v2100_v34 = vmul.f32 0.5, %v1975_v28 }
  0xf3   :  { %v4870_v35 = vpop.eup %4869  ;;  %4875 = vtanh.f32 %v1729_v29  ;;  %v4111_v37 = vpop.f32.mrf.mxu0  ;;  %4479 = vmatprep.mubr.msk.f32.mxu1 %vm5121_vm0, %v5120_v0  ;;  %v83_v29 = vld [vmem:[%s8007_s0 + $0x1f8] sm:$0xff] }
  0xf4   :  { %v1730_v38 = vmul.f32 0.7978846, %v1605_v31  ;;  %v1481_v39 = vmul.f32 0.044715, %v1356_v32  ;;  %v1232_v40 = vmul.f32 %v5639_v33, %v5639_v33  ;;  %v2225_v41 = vmul.f32 %v2100_v34, %v5543_v18  ;;  %v80_v18 = vld [vmem:[%s8007_s0 + $0x1e0] sm:$0xff] }
  0xf5   :  { %v653_v42 = vpop.f32.mrf.mxu0  ;;  %4257 = vmatmul.mubr.msk.f32.gmra.mxu0 %vm156_vm1, %v79_v10  ;;  %v1976_v43 = vadd.f32 1.0, %v4870_v35 }
  0xf6   :  { %4877 = vtanh.f32 %v1730_v38  ;;  %v1606_v44 = vadd.f32 %v1481_v39, %v5621_v19  ;;  %v1357_v46 = vmul.f32 %v1232_v40, %v5639_v33  ;;  %v5656_v47 = vadd.f32 %v5514_v2, %v653_v42  ;;  %4480 = vmatmul.mubr.msk.f32.gmra.mxu1 %vm2362_vm2, %v2225_v41  ;;  %4259 = vmatprep.mubr.msk.f32.mxu0 %vm5121_vm0, %v5120_v0  ;;  %v84_v42 = vld [vmem:[%s8007_s0 + $0x200] sm:$0xff] }
  0xf7   :  { %v4872_v48 = vpop.eup %4871  ;;  %v4114_v49 = vpop.f32.mrf.mxu0  ;;  %4482 = vmatprep.mubr.msk.f32.mxu1 %vm5121_vm0, %v5120_v0  ;;  %v2101_v50 = vmul.f32 0.5, %v1976_v43 }
  0xf8   :  { %v1731_v51 = vmul.f32 0.7978846, %v1606_v44  ;;  %v1482_v52 = vmul.f32 0.044715, %v1357_v46  ;;  %v1233_v53 = vmul.f32 %v5656_v47, %v5656_v47  ;;  %v1977_v54 = vadd.f32 1.0, %v4872_v48 }
  0xf9   :  { %v658_v55 = vpop.f32.mrf.mxu0  ;;  %4260 = vmatmul.mubr.msk.f32.gmra.mxu0 %vm156_vm1, %v80_v18  ;;  %v2226_v57 = vmul.f32 %v2101_v50, %v5556_v27 }
  0xfa   :  { %4879 = vtanh.f32 %v1731_v51  ;;  %v1607_v58 = vadd.f32 %v1482_v52, %v5639_v33  ;;  %v1358_v59 = vmul.f32 %v1233_v53, %v5656_v47  ;;  %v5673_v60 = vadd.f32 %v5514_v2, %v658_v55  ;;  %4262 = vmatprep.mubr.msk.f32.mxu0 %vm5121_vm0, %v5120_v0  ;;  %v85_v55 = vld [vmem:[%s8007_s0 + $0x208] sm:$0xff] }
  0xfb   :  { %v4874_v63 = vpop.eup %4873  ;;  %4483 = vmatmul.mubr.msk.f32.gmra.mxu1 %vm2362_vm2, %v2226_v57  ;;  %v4117_v1 = vpop.f32.mrf.mxu0  ;;  %v2102_v27 = vmul.f32 0.5, %v1977_v54 }
  0xfc   :  { %v1732_v5 = vmul.f32 0.7978846, %v1607_v58  ;;  %v1483_v6 = vmul.f32 0.044715, %v1358_v59  ;;  %v1234_v7 = vmul.f32 %v5673_v60, %v5673_v60  ;;  %4485 = vmatprep.mubr.msk.f32.mxu1 %vm5121_vm0, %v5120_v0  ;;  %v1978_v8 = vadd.f32 1.0, %v4874_v63 }
  0xfd   :  { %v663_v9 = vpop.f32.mrf.mxu0  ;;  %4263 = vmatmul.mubr.msk.f32.gmra.mxu0 %vm156_vm1, %v81_v61  ;;  %v2227_v11 = vmul.f32 %v2102_v27, %v5569_v36 }
  0xfe   :  { %4881 = vtanh.f32 %v1732_v5  ;;  %v1608_v12 = vadd.f32 %v1483_v6, %v5656_v47  ;;  %v1359_v13 = vmul.f32 %v1234_v7, %v5673_v60  ;;  %v5690_v14 = vadd.f32 %v5514_v2, %v663_v9  ;;  %4265 = vmatprep.mubr.msk.f32.mxu0 %vm5121_vm0, %v5120_v0  ;;  %v86_v9 = vld [vmem:[%s8007_s0 + $0x210] sm:$0xff] }
  0xff   :  { %4486 = vmatmul.mubr.msk.f32.gmra.mxu1 %vm2362_vm2, %v2227_v11  ;;  %v4120_v16 = vpop.f32.mrf.mxu0  ;;  %v2103_v17 = vmul.f32 0.5, %v1978_v8 }
 0x100   :  { %v4876_v36 = vpop.eup %4875  ;;  %v1733_v4 = vmul.f32 0.7978846, %v1608_v12  ;;  %v1484_v20 = vmul.f32 0.044715, %v1359_v13  ;;  %v1235_v21 = vmul.f32 %v5690_v14, %v5690_v14  ;;  %4488 = vmatprep.mubr.msk.f32.mxu1 %vm5121_vm0, %v5120_v0 }
 0x101   :  { %v668_v22 = vpop.f32.mrf.mxu0  ;;  %4266 = vmatmul.mubr.msk.f32.gmra.mxu0 %vm156_vm1, %v82_v15  ;;  %v2228_v23 = vmul.f32 %v2103_v17, %v5582_v45  ;;  %v1979_v24 = vadd.f32 1.0, %v4876_v36 }
 0x102   :  { %4883 = vtanh.f32 %v1733_v4  ;;  %v1609_v25 = vadd.f32 %v1484_v20, %v5673_v60  ;;  %v1360_v26 = vmul.f32 %v1235_v21, %v5690_v14  ;;  %v5707_v28 = vadd.f32 %v5514_v2, %v668_v22  ;;  %4268 = vmatprep.mubr.msk.f32.mxu0 %vm5121_vm0, %v5120_v0 }
 0x103   :  { %v4878_v30 = vpop.eup %4877  ;;  %4489 = vmatmul.mubr.msk.f32.gmra.mxu1 %vm2362_vm2, %v2228_v23  ;;  %v4123_v45 = vpop.f32.mrf.mxu0  ;;  %v2104_v31 = vmul.f32 0.5, %v1979_v24  ;;  %v87_v23 = vld [vmem:[%s8007_s0 + $0x218] sm:$0xff] }
 0x104   :  { %v1734_v32 = vmul.f32 0.7978846, %v1609_v25  ;;  %v1485_v10 = vmul.f32 0.044715, %v1360_v26  ;;  %v1236_v34 = vmul.f32 %v5707_v28, %v5707_v28  ;;  %4491 = vmatprep.mubr.msk.f32.mxu1 %vm5121_vm0, %v5120_v0  ;;  %v1980_v35 = vadd.f32 1.0, %v4878_v30 }
 0x105   :  { %v673_v37 = vpop.f32.mrf.mxu0  ;;  %4269 = vmatmul.mubr.msk.f32.gmra.mxu0 %vm156_vm1, %v83_v29  ;;  %v2229_v38 = vmul.f32 %v2104_v31, %v5600_v56 }
 0x106   :  { %4885 = vtanh.f32 %v1734_v32  ;;  %v1610_v39 = vadd.f32 %v1485_v10, %v5690_v14  ;;  %v1361_v40 = vmul.f32 %v1236_v34, %v5707_v28  ;;  %v5724_v41 = vadd.f32 %v5514_v2, %v673_v37  ;;  %4271 = vmatprep.mubr.msk.f32.mxu0 %vm5121_vm0, %v5120_v0  ;;  %v88_v37 = vld [vmem:[%s8007_s0 + $0x220] sm:$0xff] }
 0x107   :  { %v4880_v43 = vpop.eup %4879  ;;  %4492 = vmatmul.mubr.msk.f32.gmra.mxu1 %vm2362_vm2, %v2229_v38  ;;  %v4126_v44 = vpop.f32.mrf.mxu0  ;;  %v2105_v56 = vmul.f32 0.5, %v1980_v35 }
 0x108   :  { %v1735_v46 = vmul.f32 0.7978846, %v1610_v39  ;;  %v1486_v18 = vmul.f32 0.044715, %v1361_v40  ;;  %v1237_v48 = vmul.f32 %v5724_v41, %v5724_v41  ;;  %4494 = vmatprep.mubr.msk.f32.mxu1 %vm5121_vm0, %v5120_v0  ;;  %v1981_v49 = vadd.f32 1.0, %v4880_v43 }
 0x109   :  { %v678_v50 = vpop.f32.mrf.mxu0  ;;  %4272 = vmatmul.mubr.msk.f32.gmra.mxu0 %vm156_vm1, %v84_v42  ;;  %v2230_v51 = vmul.f32 %v2105_v56, %v5607_v3 }
 0x10a   :  { %4887 = vtanh.f32 %v1735_v46  ;;  %v1611_v52 = vadd.f32 %v1486_v18, %v5707_v28  ;;  %v1362_v53 = vmul.f32 %v1237_v48, %v5724_v41  ;;  %v5741_v54 = vadd.f32 %v5514_v2, %v678_v50  ;;  %4274 = vmatprep.mubr.msk.f32.mxu0 %vm5121_vm0, %v5120_v0  ;;  %v89_v50 = vld [vmem:[%s8007_s0 + $0x228] sm:$0xff] }
 0x10b   :  { %v4882_v57 = vpop.eup %4881  ;;  %4495 = vmatmul.mubr.msk.f32.gmra.mxu1 %vm2362_vm2, %v2230_v51  ;;  %v4129_v58 = vpop.f32.mrf.mxu0  ;;  %v2106_v3 = vmul.f32 0.5, %v1981_v49 }
 0x10c   :  { %v1736_v59 = vmul.f32 0.7978846, %v1611_v52  ;;  %v1487_v61 = vmul.f32 0.044715, %v1362_v53  ;;  %v1238_v63 = vmul.f32 %v5741_v54, %v5741_v54  ;;  %4497 = vmatprep.mubr.msk.f32.mxu1 %vm5121_vm0, %v5120_v0  ;;  %v1982_v1 = vadd.f32 1.0, %v4882_v57 }
 0x10d   :  { %v683_v27 = vpop.f32.mrf.mxu0  ;;  %4275 = vmatmul.mubr.msk.f32.gmra.mxu0 %vm156_vm1, %v85_v55  ;;  %v2231_v5 = vmul.f32 %v2106_v3, %v5621_v19 }
 0x10e   :  { %4889 = vtanh.f32 %v1736_v59  ;;  %v1612_v6 = vadd.f32 %v1487_v61, %v5724_v41  ;;  %v1363_v7 = vmul.f32 %v1238_v63, %v5741_v54  ;;  %v5758_v8 = vadd.f32 %v5514_v2, %v683_v27  ;;  %4277 = vmatprep.mubr.msk.f32.mxu0 %vm5121_vm0, %v5120_v0  ;;  %v90_v27 = vld [vmem:[%s8007_s0 + $0x230] sm:$0xff] }
 0x10f   :  { %v4884_v11 = vpop.eup %4883  ;;  %4498 = vmatmul.mubr.msk.f32.gmra.mxu1 %vm2362_vm2, %v2231_v5  ;;  %v4132_v12 = vpop.f32.mrf.mxu0  ;;  %v2107_v19 = vmul.f32 0.5, %v1982_v1 }
 0x110   :  { %v1737_v13 = vmul.f32 0.7978846, %v1612_v6  ;;  %v1488_v15 = vmul.f32 0.044715, %v1363_v7  ;;  %v1239_v16 = vmul.f32 %v5758_v8, %v5758_v8  ;;  %4500 = vmatprep.mubr.msk.f32.mxu1 %vm5121_vm0, %v5120_v0  ;;  %v1983_v17 = vadd.f32 1.0, %v4884_v11 }
 0x111   :  { %v688_v36 = vpop.f32.mrf.mxu0  ;;  %4278 = vmatmul.mubr.msk.f32.gmra.mxu0 %vm156_vm1, %v86_v9  ;;  %v2232_v4 = vmul.f32 %v2107_v19, %v5639_v33 }
 0x112   :  { %4891 = vtanh.f32 %v1737_v13  ;;  %v1613_v20 = vadd.f32 %v1488_v15, %v5741_v54  ;;  %v1364_v21 = vmul.f32 %v1239_v16, %v5758_v8  ;;  %v5775_v22 = vadd.f32 %v5514_v2, %v688_v36  ;;  %4280 = vmatprep.mubr.msk.f32.mxu0 %vm5121_vm0, %v5120_v0  ;;  %v91_v36 = vld [vmem:[%s8007_s0 + $0x238] sm:$0xff] }
 0x113   :  { %v4886_v24 = vpop.eup %4885  ;;  %4501 = vmatmul.mubr.msk.f32.gmra.mxu1 %vm2362_vm2, %v2232_v4  ;;  %v4135_v25 = vpop.f32.mrf.mxu0  ;;  %v2108_v33 = vmul.f32 0.5, %v1983_v17 }
 0x114   :  { %v1738_v26 = vmul.f32 0.7978846, %v1613_v20  ;;  %v1489_v29 = vmul.f32 0.044715, %v1364_v21  ;;  %v1240_v30 = vmul.f32 %v5775_v22, %v5775_v22  ;;  %4503 = vmatprep.mubr.msk.f32.mxu1 %vm5121_vm0, %v5120_v0  ;;  %v1984_v45 = vadd.f32 1.0, %v4886_v24 }
 0x115   :  { %v693_v31 = vpop.f32.mrf.mxu0  ;;  %4281 = vmatmul.mubr.msk.f32.gmra.mxu0 %vm156_vm1, %v87_v23  ;;  %v2233_v32 = vmul.f32 %v2108_v33, %v5656_v47 }
 0x116   :  { %4893 = vtanh.f32 %v1738_v26  ;;  %v1614_v10 = vadd.f32 %v1489_v29, %v5758_v8  ;;  %v1365_v34 = vmul.f32 %v1240_v30, %v5775_v22  ;;  %v5792_v35 = vadd.f32 %v5514_v2, %v693_v31  ;;  %4283 = vmatprep.mubr.msk.f32.mxu0 %vm5121_vm0, %v5120_v0  ;;  %v92_v31 = vld [vmem:[%s8007_s0 + $0x240] sm:$0xff] }
 0x117   :  { %v4888_v38 = vpop.eup %4887  ;;  %4504 = vmatmul.mubr.msk.f32.gmra.mxu1 %vm2362_vm2, %v2233_v32  ;;  %v4138_v39 = vpop.f32.mrf.mxu0  ;;  %v2109_v47 = vmul.f32 0.5, %v1984_v45 }
 0x118   :  { %v1739_v40 = vmul.f32 0.7978846, %v1614_v10  ;;  %v1490_v42 = vmul.f32 0.044715, %v1365_v34  ;;  %v1241_v43 = vmul.f32 %v5792_v35, %v5792_v35  ;;  %4506 = vmatprep.mubr.msk.f32.mxu1 %vm5121_vm0, %v5120_v0  ;;  %v1985_v44 = vadd.f32 1.0, %v4888_v38 }
 0x119   :  { %v698_v56 = vpop.f32.mrf.mxu0  ;;  %4284 = vmatmul.mubr.msk.f32.gmra.mxu0 %vm156_vm1, %v88_v37  ;;  %v2234_v46 = vmul.f32 %v2109_v47, %v5673_v60 }
 0x11a   :  { %4895 = vtanh.f32 %v1739_v40  ;;  %v1615_v18 = vadd.f32 %v1490_v42, %v5775_v22  ;;  %v1366_v48 = vmul.f32 %v1241_v43, %v5792_v35  ;;  %v5809_v49 = vadd.f32 %v5514_v2, %v698_v56  ;;  %4286 = vmatprep.mubr.msk.f32.mxu0 %vm5121_vm0, %v5120_v0  ;;  %v93_v56 = vld [vmem:[%s8007_s0 + $0x248] sm:$0xff] }
 0x11b   :  { %v4890_v51 = vpop.eup %4889  ;;  %4507 = vmatmul.mubr.msk.f32.gmra.mxu1 %vm2362_vm2, %v2234_v46  ;;  %v4141_v52 = vpop.f32.mrf.mxu0  ;;  %v2110_v60 = vmul.f32 0.5, %v1985_v44 }
 0x11c   :  { %v1740_v53 = vmul.f32 0.7978846, %v1615_v18  ;;  %v1491_v55 = vmul.f32 0.044715, %v1366_v48  ;;  %v1242_v57 = vmul.f32 %v5809_v49, %v5809_v49  ;;  %4509 = vmatprep.mubr.msk.f32.mxu1 %vm5121_vm0, %v5120_v0  ;;  %v1986_v58 = vadd.f32 1.0, %v4890_v51 }
 0x11d   :  { %v703_v3 = vpop.f32.mrf.mxu0  ;;  %4287 = vmatmul.mubr.msk.f32.gmra.mxu0 %vm156_vm1, %v89_v50  ;;  %v2235_v59 = vmul.f32 %v2110_v60, %v5690_v14 }
 0x11e   :  { %4897 = vtanh.f32 %v1740_v53  ;;  %v1616_v61 = vadd.f32 %v1491_v55, %v5792_v35  ;;  %v1367_v63 = vmul.f32 %v1242_v57, %v5809_v49  ;;  %v5826_v1 = vadd.f32 %v5514_v2, %v703_v3  ;;  %4289 = vmatprep.mubr.msk.f32.mxu0 %vm5121_vm0, %v5120_v0  ;;  %v94_v3 = vld [vmem:[%s8007_s0 + $0x250] sm:$0xff] }
 0x11f   :  { %v4892_v5 = vpop.eup %4891  ;;  %4510 = vmatmul.mubr.msk.f32.gmra.mxu1 %vm2362_vm2, %v2235_v59  ;;  %v4144_v6 = vpop.f32.mrf.mxu0  ;;  %v2111_v14 = vmul.f32 0.5, %v1986_v58 }
 0x120   :  { %v1741_v7 = vmul.f32 0.7978846, %v1616_v61  ;;  %v1492_v9 = vmul.f32 0.044715, %v1367_v63  ;;  %v1243_v11 = vmul.f32 %v5826_v1, %v5826_v1  ;;  %4512 = vmatprep.mubr.msk.f32.mxu1 %vm5121_vm0, %v5120_v0  ;;  %v1987_v12 = vadd.f32 1.0, %v4892_v5 }
 0x121   :  { %v708_v19 = vpop.f32.mrf.mxu0  ;;  %4290 = vmatmul.mubr.msk.f32.gmra.mxu0 %vm156_vm1, %v90_v27  ;;  %v2236_v13 = vmul.f32 %v2111_v14, %v5707_v28 }
 0x122   :  { %4899 = vtanh.f32 %v1741_v7  ;;  %v1617_v15 = vadd.f32 %v1492_v9, %v5809_v49  ;;  %v1368_v16 = vmul.f32 %v1243_v11, %v5826_v1  ;;  %v5843_v17 = vadd.f32 %v5514_v2, %v708_v19  ;;  %4292 = vmatprep.mubr.msk.f32.mxu0 %vm5121_vm0, %v5120_v0  ;;  %v95_v19 = vld [vmem:[%s8007_s0 + $0x258] sm:$0xff] }
 0x123   :  { %v4894_v4 = vpop.eup %4893  ;;  %4513 = vmatmul.mubr.msk.f32.gmra.mxu1 %vm2362_vm2, %v2236_v13  ;;  %v4147_v20 = vpop.f32.mrf.mxu0  ;;  %v2112_v28 = vmul.f32 0.5, %v1987_v12 }
 0x124   :  { %v1742_v21 = vmul.f32 0.7978846, %v1617_v15  ;;  %v1493_v23 = vmul.f32 0.044715, %v1368_v16  ;;  %v1244_v24 = vmul.f32 %v5843_v17, %v5843_v17  ;;  %4515 = vmatprep.mubr.msk.f32.mxu1 %vm5121_vm0, %v5120_v0  ;;  %v1988_v25 = vadd.f32 1.0, %v4894_v4 }
 0x125   :  { %v713_v33 = vpop.f32.mrf.mxu0  ;;  %4293 = vmatmul.mubr.msk.f32.gmra.mxu0 %vm156_vm1, %v91_v36  ;;  %v2237_v26 = vmul.f32 %v2112_v28, %v5724_v41 }
 0x126   :  { %4901 = vtanh.f32 %v1742_v21  ;;  %v1618_v29 = vadd.f32 %v1493_v23, %v5826_v1  ;;  %v1369_v30 = vmul.f32 %v1244_v24, %v5843_v17  ;;  %v5860_v45 = vadd.f32 %v5514_v2, %v713_v33  ;;  %4295 = vmatprep.mubr.msk.f32.mxu0 %vm5121_vm0, %v5120_v0  ;;  %v96_v33 = vld [vmem:[%s8007_s0 + $0x260] sm:$0xff] }
 0x127   :  { %v4896_v32 = vpop.eup %4895  ;;  %4516 = vmatmul.mubr.msk.f32.gmra.mxu1 %vm2362_vm2, %v2237_v26  ;;  %v4150_v10 = vpop.f32.mrf.mxu0  ;;  %v2113_v41 = vmul.f32 0.5, %v1988_v25 }
 0x128   :  { %v1743_v34 = vmul.f32 0.7978846, %v1618_v29  ;;  %v1494_v37 = vmul.f32 0.044715, %v1369_v30  ;;  %v1245_v38 = vmul.f32 %v5860_v45, %v5860_v45  ;;  %4518 = vmatprep.mubr.msk.f32.mxu1 %vm5121_vm0, %v5120_v0  ;;  %v1989_v39 = vadd.f32 1.0, %v4896_v32 }
 0x129   :  { %v718_v47 = vpop.f32.mrf.mxu0  ;;  %4296 = vmatmul.mubr.msk.f32.gmra.mxu0 %vm156_vm1, %v92_v31  ;;  %v2238_v40 = vmul.f32 %v2113_v41, %v5741_v54 }
 0x12a   :  { %4903 = vtanh.f32 %v1743_v34  ;;  %v1619_v42 = vadd.f32 %v1494_v37, %v5843_v17  ;;  %v1370_v43 = vmul.f32 %v1245_v38, %v5860_v45  ;;  %v5877_v44 = vadd.f32 %v5514_v2, %v718_v47  ;;  %4298 = vmatprep.mubr.msk.f32.mxu0 %vm5121_vm0, %v5120_v0  ;;  %v97_v47 = vld [vmem:[%s8007_s0 + $0x268] sm:$0xff] }
 0x12b   :  { %v4898_v46 = vpop.eup %4897  ;;  %4519 = vmatmul.mubr.msk.f32.gmra.mxu1 %vm2362_vm2, %v2238_v40  ;;  %v4153_v18 = vpop.f32.mrf.mxu0  ;;  %v2114_v54 = vmul.f32 0.5, %v1989_v39 }
 0x12c   :  { %v1744_v48 = vmul.f32 0.7978846, %v1619_v42  ;;  %v1495_v50 = vmul.f32 0.044715, %v1370_v43  ;;  %v1246_v51 = vmul.f32 %v5877_v44, %v5877_v44  ;;  %4521 = vmatprep.mubr.msk.f32.mxu1 %vm5121_vm0, %v5120_v0  ;;  %v1990_v52 = vadd.f32 1.0, %v4898_v46 }
 0x12d   :  { %v723_v60 = vpop.f32.mrf.mxu0  ;;  %4299 = vmatmul.mubr.msk.f32.gmra.mxu0 %vm156_vm1, %v93_v56  ;;  %v2239_v53 = vmul.f32 %v2114_v54, %v5758_v8 }
 0x12e   :  { %4905 = vtanh.f32 %v1744_v48  ;;  %v1620_v55 = vadd.f32 %v1495_v50, %v5860_v45  ;;  %v1371_v57 = vmul.f32 %v1246_v51, %v5877_v44  ;;  %v5894_v58 = vadd.f32 %v5514_v2, %v723_v60  ;;  %4301 = vmatprep.mubr.msk.f32.mxu0 %vm5121_vm0, %v5120_v0  ;;  %v98_v60 = vld [vmem:[%s8007_s0 + $0x270] sm:$0xff] }
 0x12f   :  { %v4900_v59 = vpop.eup %4899  ;;  %4522 = vmatmul.mubr.msk.f32.gmra.mxu1 %vm2362_vm2, %v2239_v53  ;;  %v4156_v61 = vpop.f32.mrf.mxu0  ;;  %v2115_v8 = vmul.f32 0.5, %v1990_v52 }
 0x130   :  { %v1745_v63 = vmul.f32 0.7978846, %v1620_v55  ;;  %v1496_v27 = vmul.f32 0.044715, %v1371_v57  ;;  %v1247_v5 = vmul.f32 %v5894_v58, %v5894_v58  ;;  %4524 = vmatprep.mubr.msk.f32.mxu1 %vm5121_vm0, %v5120_v0  ;;  %v1991_v6 = vadd.f32 1.0, %v4900_v59 }
 0x131   :  { %v728_v14 = vpop.f32.mrf.mxu0  ;;  %4302 = vmatmul.mubr.msk.f32.gmra.mxu0 %vm156_vm1, %v94_v3  ;;  %v2240_v7 = vmul.f32 %v2115_v8, %v5775_v22 }
 0x132   :  { %4907 = vtanh.f32 %v1745_v63  ;;  %v1621_v9 = vadd.f32 %v1496_v27, %v5877_v44  ;;  %v1372_v11 = vmul.f32 %v1247_v5, %v5894_v58  ;;  %v5911_v12 = vadd.f32 %v5514_v2, %v728_v14  ;;  %4304 = vmatprep.mubr.msk.f32.mxu0 %vm5121_vm0, %v5120_v0  ;;  %v99_v14 = vld [vmem:[%s8007_s0 + $0x278] sm:$0xff] }
 0x133   :  { %v4902_v13 = vpop.eup %4901  ;;  %4525 = vmatmul.mubr.msk.f32.gmra.mxu1 %vm2362_vm2, %v2240_v7  ;;  %v4159_v15 = vpop.f32.mrf.mxu0  ;;  %v2116_v22 = vmul.f32 0.5, %v1991_v6 }
 0x134   :  { %v1746_v16 = vmul.f32 0.7978846, %v1621_v9  ;;  %v1497_v36 = vmul.f32 0.044715, %v1372_v11  ;;  %v1248_v4 = vmul.f32 %v5911_v12, %v5911_v12  ;;  %4527 = vmatprep.mubr.msk.f32.mxu1 %vm5121_vm0, %v5120_v0  ;;  %v1992_v20 = vadd.f32 1.0, %v4902_v13 }
 0x135   :  { %v733_v28 = vpop.f32.mrf.mxu0  ;;  %4305 = vmatmul.mubr.msk.f32.gmra.mxu0 %vm156_vm1, %v95_v19  ;;  %v2241_v21 = vmul.f32 %v2116_v22, %v5792_v35 }
 0x136   :  { %4909 = vtanh.f32 %v1746_v16  ;;  %v1622_v23 = vadd.f32 %v1497_v36, %v5894_v58  ;;  %v1373_v24 = vmul.f32 %v1248_v4, %v5911_v12  ;;  %v5928_v25 = vadd.f32 %v5514_v2, %v733_v28  ;;  %4307 = vmatprep.mubr.msk.f32.mxu0 %vm5121_vm0, %v5120_v0  ;;  %v100_v28 = vld [vmem:[%s8007_s0 + $0x280] sm:$0xff] }
 0x137   :  { %v4904_v26 = vpop.eup %4903  ;;  %4528 = vmatmul.mubr.msk.f32.gmra.mxu1 %vm2362_vm2, %v2241_v21  ;;  %v4162_v29 = vpop.f32.mrf.mxu0  ;;  %v2117_v35 = vmul.f32 0.5, %v1992_v20 }
 0x138   :  { %v1747_v30 = vmul.f32 0.7978846, %v1622_v23  ;;  %v1498_v31 = vmul.f32 0.044715, %v1373_v24  ;;  %v1249_v32 = vmul.f32 %v5928_v25, %v5928_v25  ;;  %4530 = vmatprep.mubr.msk.f32.mxu1 %vm5121_vm0, %v5120_v0  ;;  %v1993_v10 = vadd.f32 1.0, %v4904_v26 }
 0x139   :  { %v738_v41 = vpop.f32.mrf.mxu0  ;;  %4308 = vmatmul.mubr.msk.f32.gmra.mxu0 %vm156_vm1, %v96_v33  ;;  %v2242_v34 = vmul.f32 %v2117_v35, %v5809_v49 }
 0x13a   :  { %4911 = vtanh.f32 %v1747_v30  ;;  %v1623_v37 = vadd.f32 %v1498_v31, %v5911_v12  ;;  %v1374_v38 = vmul.f32 %v1249_v32, %v5928_v25  ;;  %v5945_v39 = vadd.f32 %v5514_v2, %v738_v41  ;;  %4310 = vmatprep.mubr.msk.f32.mxu0 %vm5121_vm0, %v5120_v0  ;;  %v6015_v32 = vld [vmem:[%s8009_s2] ss:$0 sm:$0xff] }
 0x13b   :  { %v4906_v40 = vpop.eup %4905  ;;  %4531 = vmatmul.mubr.msk.f32.gmra.mxu1 %vm2362_vm2, %v2242_v34  ;;  %v4165_v42 = vpop.f32.mrf.mxu0  ;;  %v2118_v49 = vmul.f32 0.5, %v1993_v10 }
 0x13c   :  { %v1748_v43 = vmul.f32 0.7978846, %v1623_v37  ;;  %v1499_v56 = vmul.f32 0.044715, %v1374_v38  ;;  %v1250_v46 = vmul.f32 %v5945_v39, %v5945_v39  ;;  %4533 = vmatprep.mubr.msk.f32.mxu1 %vm5121_vm0, %v5120_v0  ;;  %v1994_v18 = vadd.f32 1.0, %v4906_v40 }
 0x13d   :  { %v743_v54 = vpop.f32.mrf.mxu0  ;;  %4311 = vmatmul.mubr.msk.f32.gmra.mxu0 %vm156_vm1, %v97_v47  ;;  %v2243_v48 = vmul.f32 %v2118_v49, %v5826_v1 }
 0x13e   :  { %4913 = vtanh.f32 %v1748_v43  ;;  %v1624_v50 = vadd.f32 %v1499_v56, %v5928_v25  ;;  %v1375_v51 = vmul.f32 %v1250_v46, %v5945_v39  ;;  %v5962_v52 = vadd.f32 %v5514_v2, %v743_v54  ;;  %4313 = vmatprep.mubr.msk.f32.mxu0 %vm5121_vm0, %v5120_v0  ;;  %v102_v54 = vld [vmem:[%s8007_s0 + $0x290] sm:$0xff] }
 0x13f   :  { %v4908_v53 = vpop.eup %4907  ;;  %4534 = vmatmul.mubr.msk.f32.gmra.mxu1 %vm2362_vm2, %v2243_v48  ;;  %v4168_v55 = vpop.f32.mrf.mxu0  ;;  %v2119_v1 = vmul.f32 0.5, %v1994_v18 }
 0x140   :  { %v1749_v57 = vmul.f32 0.7978846, %v1624_v50  ;;  %v1500_v3 = vmul.f32 0.044715, %v1375_v51  ;;  %v1251_v59 = vmul.f32 %v5962_v52, %v5962_v52  ;;  %4536 = vmatprep.mubr.msk.f32.mxu1 %vm5121_vm0, %v5120_v0  ;;  %v1995_v61 = vadd.f32 1.0, %v4908_v53 }
 0x141   :  { %v748_v8 = vpop.f32.mrf.mxu0  ;;  %4314 = vmatmul.mubr.msk.f32.gmra.mxu0 %vm156_vm1, %v98_v60  ;;  %v2244_v63 = vmul.f32 %v2119_v1, %v5843_v17 }
 0x142   :  { %4915 = vtanh.f32 %v1749_v57  ;;  %v1625_v27 = vadd.f32 %v1500_v3, %v5945_v39  ;;  %v1376_v5 = vmul.f32 %v1251_v59, %v5962_v52  ;;  %v5979_v6 = vadd.f32 %v5514_v2, %v748_v8  ;;  %4316 = vmatprep.mubr.msk.f32.mxu0 %vm5121_vm0, %v5120_v0  ;;  %v103_v8 = vld [vmem:[%s8007_s0 + $0x298] sm:$0xff] }
 0x143   :  { %v4910_v7 = vpop.eup %4909  ;;  %4537 = vmatmul.mubr.msk.f32.gmra.mxu1 %vm2362_vm2, %v2244_v63  ;;  %v4171_v9 = vpop.f32.mrf.mxu0  ;;  %v2120_v17 = vmul.f32 0.5, %v1995_v61 }
 0x144   :  { %v1750_v11 = vmul.f32 0.7978846, %v1625_v27  ;;  %v1501_v19 = vmul.f32 0.044715, %v1376_v5  ;;  %v1252_v13 = vmul.f32 %v5979_v6, %v5979_v6  ;;  %4539 = vmatprep.mubr.msk.f32.mxu1 %vm5121_vm0, %v5120_v0  ;;  %v1996_v15 = vadd.f32 1.0, %v4910_v7 }
 0x145   :  { %v753_v22 = vpop.f32.mrf.mxu0  ;;  %4317 = vmatmul.mubr.msk.f32.gmra.mxu0 %vm156_vm1, %v99_v14  ;;  %v2245_v16 = vmul.f32 %v2120_v17, %v5860_v45 }
 0x146   :  { %4917 = vtanh.f32 %v1750_v11  ;;  %v1626_v36 = vadd.f32 %v1501_v19, %v5962_v52  ;;  %v1377_v4 = vmul.f32 %v1252_v13, %v5979_v6  ;;  %v5996_v20 = vadd.f32 %v5514_v2, %v753_v22  ;;  %4319 = vmatprep.mubr.msk.f32.mxu0 %vm5121_vm0, %v5120_v0  ;;  %v104_v22 = vld [vmem:[%s8007_s0 + $0x2a0] sm:$0xff] }
 0x147   :  { %v4912_v21 = vpop.eup %4911  ;;  %4540 = vmatmul.mubr.msk.f32.gmra.mxu1 %vm2362_vm2, %v2245_v16  ;;  %v4174_v23 = vpop.f32.mrf.mxu0  ;;  %v2121_v45 = vmul.f32 0.5, %v1996_v15 }
 0x148   :  { %v1751_v24 = vmul.f32 0.7978846, %v1626_v36  ;;  %v1502_v33 = vmul.f32 0.044715, %v1377_v4  ;;  %v1253_v26 = vmul.f32 %v5996_v20, %v5996_v20  ;;  %4542 = vmatprep.mubr.msk.f32.mxu1 %vm5121_vm0, %v5120_v0  ;;  %v1997_v2 = vadd.f32 1.0, %v4912_v21 }
 0x149   :  { %v758_v29 = vpop.f32.mrf.mxu0  ;;  %4320 = vmatmul.mubr.msk.f32.gmra.mxu0 %vm156_vm1, %v100_v28  ;;  %v2246_v35 = vmul.f32 %v2121_v45, %v5877_v44  ;;  %v101_v44 = vld [vmem:[%s8007_s0 + $0x288] sm:$0xff] }
 0x14a   :  { %4919 = vtanh.f32 %v1751_v24  ;;  %v1627_v30 = vadd.f32 %v1502_v33, %v5979_v6  ;;  %v1378_v31 = vmul.f32 %v1253_v26, %v5996_v20  ;;  %v6018_v10 = vadd.f32 %v6015_v32, %v758_v29  ;;  %4322 = vmatprep.mubr.msk.f32.mxu0 %vm5121_vm0, %v5120_v0  ;;  %v105_v29 = vld [vmem:[%s8007_s0 + $0x2a8] sm:$0xff] }
 0x14b   :  { %v4914_v41 = vpop.eup %4913  ;;  %4543 = vmatmul.mubr.msk.f32.gmra.mxu1 %vm2362_vm2, %v2246_v35  ;;  %v4177_v34 = vpop.f32.mrf.mxu0  ;;  %v2122_v37 = vmul.f32 0.5, %v1997_v2 }
 0x14c   :  { %v1752_v38 = vmul.f32 0.7978846, %v1627_v30  ;;  %v1503_v47 = vmul.f32 0.044715, %v1378_v31  ;;  %v1254_v40 = vmul.f32 %v6018_v10, %v6018_v10  ;;  %4545 = vmatprep.mubr.msk.f32.mxu1 %vm5121_vm0, %v5120_v0  ;;  %v1998_v42 = vadd.f32 1.0, %v4914_v41 }
 0x14d   :  { %v763_v49 = vpop.f32.mrf.mxu0  ;;  %4323 = vmatmul.mubr.msk.f32.gmra.mxu0 %vm156_vm1, %v101_v44  ;;  %v2247_v43 = vmul.f32 %v2122_v37, %v5894_v58 }
 0x14e   :  { %4921 = vtanh.f32 %v1752_v38  ;;  %v1628_v56 = vadd.f32 %v1503_v47, %v5996_v20  ;;  %v1379_v46 = vmul.f32 %v1254_v40, %v6018_v10  ;;  %v6035_v18 = vadd.f32 %v6015_v32, %v763_v49  ;;  %4325 = vmatprep.mubr.msk.f32.mxu0 %vm5121_vm0, %v5120_v0  ;;  %v106_v49 = vld [vmem:[%s8007_s0 + $0x2b0] sm:$0xff] }
 0x14f   :  { %v4916_v48 = vpop.eup %4915  ;;  %4546 = vmatmul.mubr.msk.f32.gmra.mxu1 %vm2362_vm2, %v2247_v43  ;;  %v4180_v50 = vpop.f32.mrf.mxu0  ;;  %v2123_v58 = vmul.f32 0.5, %v1998_v42 }
 0x150   :  { %v1753_v51 = vmul.f32 0.7978846, %v1628_v56  ;;  %v1504_v60 = vmul.f32 0.044715, %v1379_v46  ;;  %v1255_v53 = vmul.f32 %v6035_v18, %v6035_v18  ;;  %4548 = vmatprep.mubr.msk.f32.mxu1 %vm5121_vm0, %v5120_v0  ;;  %v1999_v55 = vadd.f32 1.0, %v4916_v48 }
 0x151   :  { %v768_v1 = vpop.f32.mrf.mxu0  ;;  %4326 = vmatmul.mubr.msk.f32.gmra.mxu0 %vm156_vm1, %v102_v54  ;;  %v2248_v57 = vmul.f32 %v2123_v58, %v5911_v12 }
 0x152   :  { %4923 = vtanh.f32 %v1753_v51  ;;  %v1629_v3 = vadd.f32 %v1504_v60, %v6018_v10  ;;  %v1380_v59 = vmul.f32 %v1255_v53, %v6035_v18  ;;  %v6052_v61 = vadd.f32 %v6015_v32, %v768_v1  ;;  %4328 = vmatprep.mubr.msk.f32.mxu0 %vm5121_vm0, %v5120_v0  ;;  %v107_v1 = vld [vmem:[%s8007_s0 + $0x2b8] sm:$0xff] }
 0x153   :  { %v4918_v63 = vpop.eup %4917  ;;  %4549 = vmatmul.mubr.msk.f32.gmra.mxu1 %vm2362_vm2, %v2248_v57  ;;  %v4183_v27 = vpop.f32.mrf.mxu0  ;;  %v2124_v12 = vmul.f32 0.5, %v1999_v55 }
 0x154   :  { %v1754_v5 = vmul.f32 0.7978846, %v1629_v3  ;;  %v1505_v14 = vmul.f32 0.044715, %v1380_v59  ;;  %v1256_v7 = vmul.f32 %v6052_v61, %v6052_v61  ;;  %4551 = vmatprep.mubr.msk.f32.mxu1 %vm5121_vm0, %v5120_v0  ;;  %v2000_v9 = vadd.f32 1.0, %v4918_v63 }
 0x155   :  { %v773_v17 = vpop.f32.mrf.mxu0  ;;  %4329 = vmatmul.mubr.msk.f32.gmra.mxu0 %vm156_vm1, %v103_v8  ;;  %v2249_v11 = vmul.f32 %v2124_v12, %v5928_v25 }
 0x156   :  { %4925 = vtanh.f32 %v1754_v5  ;;  %v1630_v19 = vadd.f32 %v1505_v14, %v6035_v18  ;;  %v1381_v13 = vmul.f32 %v1256_v7, %v6052_v61  ;;  %v6069_v15 = vadd.f32 %v6015_v32, %v773_v17  ;;  %4331 = vmatprep.mubr.msk.f32.mxu0 %vm5121_vm0, %v5120_v0  ;;  %v108_v17 = vld [vmem:[%s8007_s0 + $0x2c0] sm:$0xff] }
 0x157   :  { %v4920_v16 = vpop.eup %4919  ;;  %4552 = vmatmul.mubr.msk.f32.gmra.mxu1 %vm2362_vm2, %v2249_v11  ;;  %v4186_v36 = vpop.f32.mrf.mxu0  ;;  %v2125_v25 = vmul.f32 0.5, %v2000_v9 }
 0x158   :  { %v1755_v4 = vmul.f32 0.7978846, %v1630_v19  ;;  %v1506_v28 = vmul.f32 0.044715, %v1381_v13  ;;  %v1257_v21 = vmul.f32 %v6069_v15, %v6069_v15  ;;  %4554 = vmatprep.mubr.msk.f32.mxu1 %vm5121_vm0, %v5120_v0  ;;  %v2001_v23 = vadd.f32 1.0, %v4920_v16 }
 0x159   :  { %v778_v45 = vpop.f32.mrf.mxu0  ;;  %4332 = vmatmul.mubr.msk.f32.gmra.mxu0 %vm156_vm1, %v104_v22  ;;  %v2250_v24 = vmul.f32 %v2125_v25, %v5945_v39 }
 0x15a   :  { %4927 = vtanh.f32 %v1755_v4  ;;  %v1631_v33 = vadd.f32 %v1506_v28, %v6052_v61  ;;  %v1382_v26 = vmul.f32 %v1257_v21, %v6069_v15  ;;  %v6086_v2 = vadd.f32 %v6015_v32, %v778_v45  ;;  %4334 = vmatprep.mubr.msk.f32.mxu0 %vm5121_vm0, %v5120_v0  ;;  %v109_v45 = vld [vmem:[%s8007_s0 + $0x2c8] sm:$0xff] }
 0x15b   :  { %v4922_v35 = vpop.eup %4921  ;;  %4555 = vmatmul.mubr.msk.f32.gmra.mxu1 %vm2362_vm2, %v2250_v24  ;;  %v4189_v30 = vpop.f32.mrf.mxu0  ;;  %v2126_v39 = vmul.f32 0.5, %v2001_v23 }
 0x15c   :  { %v1756_v31 = vmul.f32 0.7978846, %v1631_v33  ;;  %v1507_v44 = vmul.f32 0.044715, %v1382_v26  ;;  %v1258_v41 = vmul.f32 %v6086_v2, %v6086_v2  ;;  %4557 = vmatprep.mubr.msk.f32.mxu1 %vm5121_vm0, %v5120_v0  ;;  %v2002_v34 = vadd.f32 1.0, %v4922_v35 }
 0x15d   :  { %v783_v37 = vpop.f32.mrf.mxu0  ;;  %4335 = vmatmul.mubr.msk.f32.gmra.mxu0 %vm156_vm1, %v105_v29  ;;  %v2251_v38 = vmul.f32 %v2126_v39, %v5962_v52 }
 0x15e   :  { %4929 = vtanh.f32 %v1756_v31  ;;  %v1632_v47 = vadd.f32 %v1507_v44, %v6069_v15  ;;  %v1383_v40 = vmul.f32 %v1258_v41, %v6086_v2  ;;  %v6103_v42 = vadd.f32 %v6015_v32, %v783_v37  ;;  %4337 = vmatprep.mubr.msk.f32.mxu0 %vm5121_vm0, %v5120_v0  ;;  %v110_v37 = vld [vmem:[%s8007_s0 + $0x2d0] sm:$0xff] }
 0x15f   :  { %v4924_v43 = vpop.eup %4923  ;;  %4558 = vmatmul.mubr.msk.f32.gmra.mxu1 %vm2362_vm2, %v2251_v38  ;;  %v4192_v56 = vpop.f32.mrf.mxu0  ;;  %v2127_v52 = vmul.f32 0.5, %v2002_v34 }
 0x160   :  { %v1757_v46 = vmul.f32 0.7978846, %v1632_v47  ;;  %v1508_v54 = vmul.f32 0.044715, %v1383_v40  ;;  %v1259_v48 = vmul.f32 %v6103_v42, %v6103_v42  ;;  %4560 = vmatprep.mubr.msk.f32.mxu1 %vm5121_vm0, %v5120_v0  ;;  %v2003_v50 = vadd.f32 1.0, %v4924_v43 }
 0x161   :  { %v788_v58 = vpop.f32.mrf.mxu0  ;;  %4338 = vmatmul.mubr.msk.f32.gmra.mxu0 %vm156_vm1, %v106_v49  ;;  %v2252_v51 = vmul.f32 %v2127_v52, %v5979_v6 }
 0x162   :  { %4931 = vtanh.f32 %v1757_v46  ;;  %v1633_v60 = vadd.f32 %v1508_v54, %v6086_v2  ;;  %v1384_v53 = vmul.f32 %v1259_v48, %v6103_v42  ;;  %v6120_v55 = vadd.f32 %v6015_v32, %v788_v58  ;;  %4340 = vmatprep.mubr.msk.f32.mxu0 %vm5121_vm0, %v5120_v0  ;;  %v111_v58 = vld [vmem:[%s8007_s0 + $0x2d8] sm:$0xff] }
 0x163   :  { %v4926_v57 = vpop.eup %4925  ;;  %4561 = vmatmul.mubr.msk.f32.gmra.mxu1 %vm2362_vm2, %v2252_v51  ;;  %v4195_v3 = vpop.f32.mrf.mxu0  ;;  %v2128_v6 = vmul.f32 0.5, %v2003_v50 }
 0x164   :  { %v1758_v59 = vmul.f32 0.7978846, %v1633_v60  ;;  %v1509_v8 = vmul.f32 0.044715, %v1384_v53  ;;  %v1260_v63 = vmul.f32 %v6120_v55, %v6120_v55  ;;  %4563 = vmatprep.mubr.msk.f32.mxu1 %vm5121_vm0, %v5120_v0  ;;  %v2004_v27 = vadd.f32 1.0, %v4926_v57 }
 0x165   :  { %v793_v12 = vpop.f32.mrf.mxu0  ;;  %4341 = vmatmul.mubr.msk.f32.gmra.mxu0 %vm156_vm1, %v107_v1  ;;  %v2253_v5 = vmul.f32 %v2128_v6, %v5996_v20 }
 0x166   :  { %4933 = vtanh.f32 %v1758_v59  ;;  %v1634_v14 = vadd.f32 %v1509_v8, %v6103_v42  ;;  %v1385_v7 = vmul.f32 %v1260_v63, %v6120_v55  ;;  %v6137_v9 = vadd.f32 %v6015_v32, %v793_v12  ;;  %4343 = vmatprep.mubr.msk.f32.mxu0 %vm5121_vm0, %v5120_v0  ;;  %v112_v12 = vld [vmem:[%s8007_s0 + $0x2e0] sm:$0xff] }
 0x167   :  { %v4928_v11 = vpop.eup %4927  ;;  %4564 = vmatmul.mubr.msk.f32.gmra.mxu1 %vm2362_vm2, %v2253_v5  ;;  %v4198_v19 = vpop.f32.mrf.mxu0  ;;  %v2129_v20 = vmul.f32 0.5, %v2004_v27 }
 0x168   :  { %v1759_v13 = vmul.f32 0.7978846, %v1634_v14  ;;  %v1510_v22 = vmul.f32 0.044715, %v1385_v7  ;;  %v1261_v16 = vmul.f32 %v6137_v9, %v6137_v9  ;;  %4566 = vmatprep.mubr.msk.f32.mxu1 %vm5121_vm0, %v5120_v0  ;;  %v2005_v36 = vadd.f32 1.0, %v4928_v11 }
 0x169   :  { %v798_v25 = vpop.f32.mrf.mxu0  ;;  %4344 = vmatmul.mubr.msk.f32.gmra.mxu0 %vm156_vm1, %v108_v17  ;;  %v2254_v4 = vmul.f32 %v2129_v20, %v6018_v10 }
 0x16a   :  { %4935 = vtanh.f32 %v1759_v13  ;;  %v1635_v28 = vadd.f32 %v1510_v22, %v6120_v55  ;;  %v1386_v21 = vmul.f32 %v1261_v16, %v6137_v9  ;;  %v6154_v23 = vadd.f32 %v6015_v32, %v798_v25  ;;  %4346 = vmatprep.mubr.msk.f32.mxu0 %vm5121_vm0, %v5120_v0  ;;  %v113_v25 = vld [vmem:[%s8007_s0 + $0x2e8] sm:$0xff] }
 0x16b   :  { %v4930_v24 = vpop.eup %4929  ;;  %4567 = vmatmul.mubr.msk.f32.gmra.mxu1 %vm2362_vm2, %v2254_v4  ;;  %v4201_v33 = vpop.f32.mrf.mxu0  ;;  %v2130_v10 = vmul.f32 0.5, %v2005_v36 }
 0x16c   :  { %v1760_v26 = vmul.f32 0.7978846, %v1635_v28  ;;  %v1511_v29 = vmul.f32 0.044715, %v1386_v21  ;;  %v1262_v35 = vmul.f32 %v6154_v23, %v6154_v23  ;;  %4569 = vmatprep.mubr.msk.f32.mxu1 %vm5121_vm0, %v5120_v0  ;;  %v2006_v30 = vadd.f32 1.0, %v4930_v24 }
 0x16d   :  { %v803_v39 = vpop.f32.mrf.mxu0  ;;  %4347 = vmatmul.mubr.msk.f32.gmra.mxu0 %vm156_vm1, %v109_v45  ;;  %v2255_v31 = vmul.f32 %v2130_v10, %v6035_v18 }
 0x16e   :  { %4937 = vtanh.f32 %v1760_v26  ;;  %v1636_v44 = vadd.f32 %v1511_v29, %v6137_v9  ;;  %v1387_v41 = vmul.f32 %v1262_v35, %v6154_v23  ;;  %v6171_v34 = vadd.f32 %v6015_v32, %v803_v39  ;;  %4349 = vmatprep.mubr.msk.f32.mxu0 %vm5121_vm0, %v5120_v0  ;;  %v114_v39 = vld [vmem:[%s8007_s0 + $0x2f0] sm:$0xff] }
 0x16f   :  { %v4932_v38 = vpop.eup %4931  ;;  %4570 = vmatmul.mubr.msk.f32.gmra.mxu1 %vm2362_vm2, %v2255_v31  ;;  %v4204_v47 = vpop.f32.mrf.mxu0  ;;  %v2131_v18 = vmul.f32 0.5, %v2006_v30 }
 0x170   :  { %v1761_v40 = vmul.f32 0.7978846, %v1636_v44  ;;  %v1512_v49 = vmul.f32 0.044715, %v1387_v41  ;;  %v1263_v43 = vmul.f32 %v6171_v34, %v6171_v34  ;;  %4572 = vmatprep.mubr.msk.f32.mxu1 %vm5121_vm0, %v5120_v0  ;;  %v2007_v56 = vadd.f32 1.0, %v4932_v38 }
 0x171   :  { %v808_v52 = vpop.f32.mrf.mxu0  ;;  %4350 = vmatmul.mubr.msk.f32.gmra.mxu0 %vm156_vm1, %v110_v37  ;;  %v2256_v46 = vmul.f32 %v2131_v18, %v6052_v61 }
 0x172   :  { %4939 = vtanh.f32 %v1761_v40  ;;  %v1637_v54 = vadd.f32 %v1512_v49, %v6154_v23  ;;  %v1388_v48 = vmul.f32 %v1263_v43, %v6171_v34  ;;  %v6188_v50 = vadd.f32 %v6015_v32, %v808_v52  ;;  %4352 = vmatprep.mubr.msk.f32.mxu0 %vm5121_vm0, %v5120_v0  ;;  %v115_v52 = vld [vmem:[%s8007_s0 + $0x2f8] sm:$0xff] }
 0x173   :  { %v4934_v51 = vpop.eup %4933  ;;  %4573 = vmatmul.mubr.msk.f32.gmra.mxu1 %vm2362_vm2, %v2256_v46  ;;  %v4207_v60 = vpop.f32.mrf.mxu0  ;;  %v2132_v61 = vmul.f32 0.5, %v2007_v56 }
 0x174   :  { %v1762_v53 = vmul.f32 0.7978846, %v1637_v54  ;;  %v1513_v1 = vmul.f32 0.044715, %v1388_v48  ;;  %v1264_v57 = vmul.f32 %v6188_v50, %v6188_v50  ;;  %4575 = vmatprep.mubr.msk.f32.mxu1 %vm5121_vm0, %v5120_v0  ;;  %v2008_v3 = vadd.f32 1.0, %v4934_v51 }
 0x175   :  { %v813_v6 = vpop.f32.mrf.mxu0  ;;  %4353 = vmatmul.mubr.msk.f32.gmra.mxu0 %vm156_vm1, %v111_v58  ;;  %v2257_v59 = vmul.f32 %v2132_v61, %v6069_v15 }
 0x176   :  { %4941 = vtanh.f32 %v1762_v53  ;;  %v1638_v8 = vadd.f32 %v1513_v1, %v6171_v34  ;;  %v1389_v63 = vmul.f32 %v1264_v57, %v6188_v50  ;;  %v6205_v27 = vadd.f32 %v6015_v32, %v813_v6  ;;  %4355 = vmatprep.mubr.msk.f32.mxu0 %vm5121_vm0, %v5120_v0  ;;  %v116_v6 = vld [vmem:[%s8007_s0 + $0x300] sm:$0xff] }
 0x177   :  { %v4936_v5 = vpop.eup %4935  ;;  %4576 = vmatmul.mubr.msk.f32.gmra.mxu1 %vm2362_vm2, %v2257_v59  ;;  %v4210_v14 = vpop.f32.mrf.mxu0  ;;  %v2133_v15 = vmul.f32 0.5, %v2008_v3 }
 0x178   :  { %v1763_v7 = vmul.f32 0.7978846, %v1638_v8  ;;  %v1514_v17 = vmul.f32 0.044715, %v1389_v63  ;;  %v1265_v11 = vmul.f32 %v6205_v27, %v6205_v27  ;;  %4578 = vmatprep.mubr.msk.f32.mxu1 %vm5121_vm0, %v5120_v0  ;;  %v2009_v19 = vadd.f32 1.0, %v4936_v5 }
 0x179   :  { %v818_v20 = vpop.f32.mrf.mxu0  ;;  %4356 = vmatmul.mubr.msk.f32.gmra.mxu0 %vm156_vm1, %v112_v12  ;;  %v2258_v13 = vmul.f32 %v2133_v15, %v6086_v2 }
 0x17a   :  { %4943 = vtanh.f32 %v1763_v7  ;;  %v1639_v22 = vadd.f32 %v1514_v17, %v6188_v50  ;;  %v1390_v16 = vmul.f32 %v1265_v11, %v6205_v27  ;;  %v6222_v36 = vadd.f32 %v6015_v32, %v818_v20  ;;  %4358 = vmatprep.mubr.msk.f32.mxu0 %vm5121_vm0, %v5120_v0  ;;  %v117_v20 = vld [vmem:[%s8007_s0 + $0x308] sm:$0xff] }
 0x17b   :  { %v4938_v4 = vpop.eup %4937  ;;  %4579 = vmatmul.mubr.msk.f32.gmra.mxu1 %vm2362_vm2, %v2258_v13  ;;  %v4213_v28 = vpop.f32.mrf.mxu0  ;;  %v2134_v2 = vmul.f32 0.5, %v2009_v19 }
 0x17c   :  { %v1764_v21 = vmul.f32 0.7978846, %v1639_v22  ;;  %v1515_v45 = vmul.f32 0.044715, %v1390_v16  ;;  %v1266_v24 = vmul.f32 %v6222_v36, %v6222_v36  ;;  %4581 = vmatprep.mubr.msk.f32.mxu1 %vm5121_vm0, %v5120_v0  ;;  %v2010_v33 = vadd.f32 1.0, %v4938_v4 }
 0x17d   :  { %v823_v10 = vpop.f32.mrf.mxu0  ;;  %4359 = vmatmul.mubr.msk.f32.gmra.mxu0 %vm156_vm1, %v113_v25  ;;  %v2259_v26 = vmul.f32 %v2134_v2, %v6103_v42 }
 0x17e   :  { %4945 = vtanh.f32 %v1764_v21  ;;  %v1640_v29 = vadd.f32 %v1515_v45, %v6205_v27  ;;  %v1391_v35 = vmul.f32 %v1266_v24, %v6222_v36  ;;  %v6239_v30 = vadd.f32 %v6015_v32, %v823_v10  ;;  %4361 = vmatprep.mubr.msk.f32.mxu0 %vm5121_vm0, %v5120_v0  ;;  %v118_v10 = vld [vmem:[%s8007_s0 + $0x310] sm:$0xff] }
 0x17f   :  { %v4940_v31 = vpop.eup %4939  ;;  %4582 = vmatmul.mubr.msk.f32.gmra.mxu1 %vm2362_vm2, %v2259_v26  ;;  %v4216_v44 = vpop.f32.mrf.mxu0  ;;  %v2135_v42 = vmul.f32 0.5, %v2010_v33 }
 0x180   :  { %v1765_v41 = vmul.f32 0.7978846, %v1640_v29  ;;  %v1516_v37 = vmul.f32 0.044715, %v1391_v35  ;;  %v1267_v38 = vmul.f32 %v6239_v30, %v6239_v30  ;;  %4584 = vmatprep.mubr.msk.f32.mxu1 %vm5121_vm0, %v5120_v0  ;;  %v2011_v47 = vadd.f32 1.0, %v4940_v31 }
 0x181   :  { %v828_v18 = vpop.f32.mrf.mxu0  ;;  %4362 = vmatmul.mubr.msk.f32.gmra.mxu0 %vm156_vm1, %v114_v39  ;;  %v2260_v40 = vmul.f32 %v2135_v42, %v6120_v55 }
 0x182   :  { %4947 = vtanh.f32 %v1765_v41  ;;  %v1641_v49 = vadd.f32 %v1516_v37, %v6222_v36  ;;  %v1392_v43 = vmul.f32 %v1267_v38, %v6239_v30  ;;  %v6256_v56 = vadd.f32 %v6015_v32, %v828_v18  ;;  %4364 = vmatprep.mubr.msk.f32.mxu0 %vm5121_vm0, %v5120_v0  ;;  %v119_v18 = vld [vmem:[%s8007_s0 + $0x318] sm:$0xff] }
 0x183   :  { %v4942_v46 = vpop.eup %4941  ;;  %4585 = vmatmul.mubr.msk.f32.gmra.mxu1 %vm2362_vm2, %v2260_v40  ;;  %v4219_v54 = vpop.f32.mrf.mxu0  ;;  %v2136_v55 = vmul.f32 0.5, %v2011_v47 }
 0x184   :  { %v1766_v48 = vmul.f32 0.7978846, %v1641_v49  ;;  %v1517_v58 = vmul.f32 0.044715, %v1392_v43  ;;  %v1268_v51 = vmul.f32 %v6256_v56, %v6256_v56  ;;  %4587 = vmatprep.mubr.msk.f32.mxu1 %vm5121_vm0, %v5120_v0  ;;  %v2012_v60 = vadd.f32 1.0, %v4942_v46 }
 0x185   :  { %v833_v61 = vpop.f32.mrf.mxu0  ;;  %4365 = vmatmul.mubr.msk.f32.gmra.mxu0 %vm156_vm1, %v115_v52  ;;  %v2261_v53 = vmul.f32 %v2136_v55, %v6137_v9 }
 0x186   :  { %4949 = vtanh.f32 %v1766_v48  ;;  %v1642_v1 = vadd.f32 %v1517_v58, %v6239_v30  ;;  %v1393_v57 = vmul.f32 %v1268_v51, %v6256_v56  ;;  %v6273_v3 = vadd.f32 %v6015_v32, %v833_v61  ;;  %4367 = vmatprep.mubr.msk.f32.mxu0 %vm5121_vm0, %v5120_v0  ;;  %v120_v61 = vld [vmem:[%s8007_s0 + $0x320] sm:$0xff] }
 0x187   :  { %v4944_v59 = vpop.eup %4943  ;;  %4588 = vmatmul.mubr.msk.f32.gmra.mxu1 %vm2362_vm2, %v2261_v53  ;;  %v4222_v8 = vpop.f32.mrf.mxu0  ;;  %v2137_v9 = vmul.f32 0.5, %v2012_v60 }
 0x188   :  { %v1767_v63 = vmul.f32 0.7978846, %v1642_v1  ;;  %v1518_v12 = vmul.f32 0.044715, %v1393_v57  ;;  %v1269_v5 = vmul.f32 %v6273_v3, %v6273_v3  ;;  %4590 = vmatprep.mubr.msk.f32.mxu1 %vm5121_vm0, %v5120_v0  ;;  %v2013_v14 = vadd.f32 1.0, %v4944_v59 }
 0x189   :  { %v838_v15 = vpop.f32.mrf.mxu0  ;;  %4368 = vmatmul.mubr.msk.f32.gmra.mxu0 %vm156_vm1, %v116_v6  ;;  %v2262_v7 = vmul.f32 %v2137_v9, %v6154_v23 }
 0x18a   :  { %4951 = vtanh.f32 %v1767_v63  ;;  %v1643_v17 = vadd.f32 %v1518_v12, %v6256_v56  ;;  %v1394_v11 = vmul.f32 %v1269_v5, %v6273_v3  ;;  %v6290_v19 = vadd.f32 %v6015_v32, %v838_v15  ;;  %4370 = vmatprep.mubr.msk.f32.mxu0 %vm5121_vm0, %v5120_v0  ;;  %v121_v15 = vld [vmem:[%s8007_s0 + $0x328] sm:$0xff] }
 0x18b   :  { %v4946_v13 = vpop.eup %4945  ;;  %4591 = vmatmul.mubr.msk.f32.gmra.mxu1 %vm2362_vm2, %v2262_v7  ;;  %v4225_v22 = vpop.f32.mrf.mxu0  ;;  %v2138_v23 = vmul.f32 0.5, %v2013_v14 }
 0x18c   :  { %v1768_v16 = vmul.f32 0.7978846, %v1643_v17  ;;  %v1519_v25 = vmul.f32 0.044715, %v1394_v11  ;;  %v1270_v4 = vmul.f32 %v6290_v19, %v6290_v19  ;;  %4593 = vmatprep.mubr.msk.f32.mxu1 %vm5121_vm0, %v5120_v0  ;;  %v2014_v28 = vadd.f32 1.0, %v4946_v13 }
 0x18d   :  { %v843_v2 = vpop.f32.mrf.mxu0  ;;  %4371 = vmatmul.mubr.msk.f32.gmra.mxu0 %vm156_vm1, %v117_v20  ;;  %v2263_v21 = vmul.f32 %v2138_v23, %v6171_v34 }
 0x18e   :  { %4953 = vtanh.f32 %v1768_v16  ;;  %v1644_v45 = vadd.f32 %v1519_v25, %v6273_v3  ;;  %v1395_v24 = vmul.f32 %v1270_v4, %v6290_v19  ;;  %v6307_v33 = vadd.f32 %v6015_v32, %v843_v2  ;;  %4373 = vmatprep.mubr.msk.f32.mxu0 %vm5121_vm0, %v5120_v0  ;;  %v122_v2 = vld [vmem:[%s8007_s0 + $0x330] sm:$0xff] }
 0x18f   :  { %v4948_v26 = vpop.eup %4947  ;;  %4594 = vmatmul.mubr.msk.f32.gmra.mxu1 %vm2362_vm2, %v2263_v21  ;;  %v4228_v29 = vpop.f32.mrf.mxu0  ;;  %v2139_v34 = vmul.f32 0.5, %v2014_v28 }
 0x190   :  { %v1769_v35 = vmul.f32 0.7978846, %v1644_v45  ;;  %v1520_v39 = vmul.f32 0.044715, %v1395_v24  ;;  %v1271_v31 = vmul.f32 %v6307_v33, %v6307_v33  ;;  %4596 = vmatprep.mubr.msk.f32.mxu1 %vm5121_vm0, %v5120_v0  ;;  %v2015_v44 = vadd.f32 1.0, %v4948_v26 }
 0x191   :  { %v848_v42 = vpop.f32.mrf.mxu0  ;;  %4374 = vmatmul.mubr.msk.f32.gmra.mxu0 %vm156_vm1, %v118_v10  ;;  %v2264_v41 = vmul.f32 %v2139_v34, %v6188_v50 }
 0x192   :  { %4955 = vtanh.f32 %v1769_v35  ;;  %v1645_v37 = vadd.f32 %v1520_v39, %v6290_v19  ;;  %v1396_v38 = vmul.f32 %v1271_v31, %v6307_v33  ;;  %v6324_v47 = vadd.f32 %v6015_v32, %v848_v42  ;;  %4376 = vmatprep.mubr.msk.f32.mxu0 %vm5121_vm0, %v5120_v0  ;;  %v123_v42 = vld [vmem:[%s8007_s0 + $0x338] sm:$0xff] }
 0x193   :  { %v4950_v40 = vpop.eup %4949  ;;  %4597 = vmatmul.mubr.msk.f32.gmra.mxu1 %vm2362_vm2, %v2264_v41  ;;  %v4231_v49 = vpop.f32.mrf.mxu0  ;;  %v2140_v50 = vmul.f32 0.5, %v2015_v44 }
 0x194   :  { %v1770_v43 = vmul.f32 0.7978846, %v1645_v37  ;;  %v1521_v52 = vmul.f32 0.044715, %v1396_v38  ;;  %v1272_v46 = vmul.f32 %v6324_v47, %v6324_v47  ;;  %4599 = vmatprep.mubr.msk.f32.mxu1 %vm5121_vm0, %v5120_v0  ;;  %v2016_v54 = vadd.f32 1.0, %v4950_v40 }
 0x195   :  { %v853_v55 = vpop.f32.mrf.mxu0  ;;  %4377 = vmatmul.mubr.msk.f32.gmra.mxu0 %vm156_vm1, %v119_v18  ;;  %v2265_v48 = vmul.f32 %v2140_v50, %v6205_v27 }
 0x196   :  { %4957 = vtanh.f32 %v1770_v43  ;;  %v1646_v58 = vadd.f32 %v1521_v52, %v6307_v33  ;;  %v1397_v51 = vmul.f32 %v1272_v46, %v6324_v47  ;;  %v6341_v60 = vadd.f32 %v6015_v32, %v853_v55  ;;  %4379 = vmatprep.mubr.msk.f32.mxu0 %vm5121_vm0, %v5120_v0  ;;  %v124_v55 = vld [vmem:[%s8007_s0 + $0x340] sm:$0xff] }
 0x197   :  { %v4952_v53 = vpop.eup %4951  ;;  %4600 = vmatmul.mubr.msk.f32.gmra.mxu1 %vm2362_vm2, %v2265_v48  ;;  %v4234_v1 = vpop.f32.mrf.mxu0  ;;  %v2141_v27 = vmul.f32 0.5, %v2016_v54 }
 0x198   :  { %v1771_v57 = vmul.f32 0.7978846, %v1646_v58  ;;  %v1522_v6 = vmul.f32 0.044715, %v1397_v51  ;;  %v1273_v59 = vmul.f32 %v6341_v60, %v6341_v60  ;;  %4602 = vmatprep.mubr.msk.f32.mxu1 %vm5121_vm0, %v5120_v0  ;;  %v2017_v8 = vadd.f32 1.0, %v4952_v53 }
 0x199   :  { %v858_v9 = vpop.f32.mrf.mxu0  ;;  %4380 = vmatmul.mubr.msk.f32.gmra.mxu0 %vm156_vm1, %v120_v61  ;;  %v2266_v63 = vmul.f32 %v2141_v27, %v6222_v36 }
 0x19a   :  { %4959 = vtanh.f32 %v1771_v57  ;;  %v1647_v12 = vadd.f32 %v1522_v6, %v6324_v47  ;;  %v1398_v5 = vmul.f32 %v1273_v59, %v6341_v60  ;;  %v6358_v14 = vadd.f32 %v6015_v32, %v858_v9  ;;  %4382 = vmatprep.mubr.msk.f32.mxu0 %vm5121_vm0, %v5120_v0  ;;  %v125_v9 = vld [vmem:[%s8007_s0 + $0x348] sm:$0xff] }
 0x19b   :  { %v4954_v7 = vpop.eup %4953  ;;  %4603 = vmatmul.mubr.msk.f32.gmra.mxu1 %vm2362_vm2, %v2266_v63  ;;  %v4237_v17 = vpop.f32.mrf.mxu0  ;;  %v2142_v36 = vmul.f32 0.5, %v2017_v8 }
 0x19c   :  { %v1772_v11 = vmul.f32 0.7978846, %v1647_v12  ;;  %v1523_v20 = vmul.f32 0.044715, %v1398_v5  ;;  %v1274_v13 = vmul.f32 %v6358_v14, %v6358_v14  ;;  %4605 = vmatprep.mubr.msk.f32.mxu1 %vm5121_vm0, %v5120_v0  ;;  %v2018_v22 = vadd.f32 1.0, %v4954_v7 }
 0x19d   :  { %v863_v23 = vpop.f32.mrf.mxu0  ;;  %4383 = vmatmul.mubr.msk.f32.gmra.mxu0 %vm156_vm1, %v121_v15  ;;  %v2267_v16 = vmul.f32 %v2142_v36, %v6239_v30 }
 0x19e   :  { %4961 = vtanh.f32 %v1772_v11  ;;  %v1648_v25 = vadd.f32 %v1523_v20, %v6341_v60  ;;  %v1399_v4 = vmul.f32 %v1274_v13, %v6358_v14  ;;  %v6375_v28 = vadd.f32 %v6015_v32, %v863_v23  ;;  %4385 = vmatprep.mubr.msk.f32.mxu0 %vm5121_vm0, %v5120_v0 }
 0x19f   :  { %v4956_v21 = vpop.eup %4955  ;;  %4606 = vmatmul.mubr.msk.f32.gmra.mxu1 %vm2362_vm2, %v2267_v16  ;;  %v4240_v45 = vpop.f32.mrf.mxu0  ;;  %v2143_v30 = vmul.f32 0.5, %v2018_v22 }
 0x1a0   :  { %v1773_v24 = vmul.f32 0.7978846, %v1648_v25  ;;  %v1524_v10 = vmul.f32 0.044715, %v1399_v4  ;;  %v1275_v26 = vmul.f32 %v6375_v28, %v6375_v28  ;;  %4608 = vmatprep.mubr.msk.f32.mxu1 %vm5121_vm0, %v5120_v0  ;;  %v2019_v29 = vadd.f32 1.0, %v4956_v21  ;;  %v126_v25 = vld [vmem:[%s8007_s0 + $0x350] sm:$0xff] }
 0x1a1   :  { %v868_v34 = vpop.f32.mrf.mxu0  ;;  %4386 = vmatmul.mubr.msk.f32.gmra.mxu0 %vm156_vm1, %v122_v2  ;;  %v2268_v35 = vmul.f32 %v2143_v30, %v6256_v56 }
 0x1a2   :  { %4963 = vtanh.f32 %v1773_v24  ;;  %v1649_v39 = vadd.f32 %v1524_v10, %v6358_v14  ;;  %v1400_v31 = vmul.f32 %v1275_v26, %v6375_v28  ;;  %v6392_v44 = vadd.f32 %v6015_v32, %v868_v34  ;;  %4388 = vmatprep.mubr.msk.f32.mxu0 %vm5121_vm0, %v5120_v0 }
 0x1a3   :  { %v4958_v41 = vpop.eup %4957  ;;  %4609 = vmatmul.mubr.msk.f32.gmra.mxu1 %vm2362_vm2, %v2268_v35  ;;  %v4243_v37 = vpop.f32.mrf.mxu0  ;;  %v2144_v56 = vmul.f32 0.5, %v2019_v29 }
 0x1a4   :  { %v1774_v38 = vmul.f32 0.7978846, %v1649_v39  ;;  %v1525_v18 = vmul.f32 0.044715, %v1400_v31  ;;  %v1276_v40 = vmul.f32 %v6392_v44, %v6392_v44  ;;  %4611 = vmatprep.mubr.msk.f32.mxu1 %vm5121_vm0, %v5120_v0  ;;  %v2020_v49 = vadd.f32 1.0, %v4958_v41  ;;  %v127_v41 = vld [vmem:[%s8007_s0 + $0x358] sm:$0xff] }
 0x1a5   :  { %v873_v50 = vpop.f32.mrf.mxu0  ;;  %4389 = vmatmul.mubr.msk.f32.gmra.mxu0 %vm156_vm1, %v123_v42  ;;  %v2269_v43 = vmul.f32 %v2144_v56, %v6273_v3 }
 0x1a6   :  { %4965 = vtanh.f32 %v1774_v38  ;;  %v1650_v52 = vadd.f32 %v1525_v18, %v6375_v28  ;;  %v1401_v46 = vmul.f32 %v1276_v40, %v6392_v44  ;;  %v6409_v54 = vadd.f32 %v6015_v32, %v873_v50  ;;  %4391 = vmatprep.mubr.msk.f32.mxu0 %vm5121_vm0, %v5120_v0 }
 0x1a7   :  { %v4960_v48 = vpop.eup %4959  ;;  %4612 = vmatmul.mubr.msk.f32.gmra.mxu1 %vm2362_vm2, %v2269_v43  ;;  %v4246_v58 = vpop.f32.mrf.mxu0  ;;  %v2145_v3 = vmul.f32 0.5, %v2020_v49 }
 0x1a8   :  { %v1775_v51 = vmul.f32 0.7978846, %v1650_v52  ;;  %v1526_v61 = vmul.f32 0.044715, %v1401_v46  ;;  %v1277_v53 = vmul.f32 %v6409_v54, %v6409_v54  ;;  %4614 = vmatprep.mubr.msk.f32.mxu1 %vm5121_vm0, %v5120_v0  ;;  %v2021_v1 = vadd.f32 1.0, %v4960_v48 }
 0x1a9   :  { %v878_v27 = vpop.f32.mrf.mxu0  ;;  %4392 = vmatmul.mubr.msk.f32.gmra.mxu0 %vm156_vm1, %v124_v55  ;;  %v2270_v57 = vmul.f32 %v2145_v3, %v6290_v19  ;;  %v6437_v19 = vld [vmem:[%s8010_s4] ss:$0 sm:$0xff] }
 0x1aa   :  { %4967 = vtanh.f32 %v1775_v51  ;;  %v1651_v6 = vadd.f32 %v1526_v61, %v6392_v44  ;;  %v1402_v59 = vmul.f32 %v1277_v53, %v6409_v54  ;;  %v6426_v8 = vadd.f32 %v6015_v32, %v878_v27  ;;  %4394 = vmatprep.mubr.msk.f32.mxu0 %vm5121_vm0, %v5120_v0  ;;  %v128_v51 = vld [vmem:[%s8007_s0 + $0x360] sm:$0xff] }
 0x1ab   :  { %v4962_v63 = vpop.eup %4961  ;;  %4615 = vmatmul.mubr.msk.f32.gmra.mxu1 %vm2362_vm2, %v2270_v57  ;;  %v4249_v12 = vpop.f32.mrf.mxu0  ;;  %v2146_v5 = vmul.f32 0.5, %v2021_v1 }
 0x1ac   :  { %v1776_v15 = vmul.f32 0.7978846, %v1651_v6  ;;  %v1527_v7 = vmul.f32 0.044715, %v1402_v59  ;;  %v1278_v17 = vmul.f32 %v6426_v8, %v6426_v8  ;;  %4617 = vmatprep.mubr.msk.f32.mxu1 %vm5121_vm0, %v5120_v0  ;;  %v2022_v36 = vadd.f32 1.0, %v4962_v63 }
 0x1ad   :  { %v883_v11 = vpop.f32.mrf.mxu0  ;;  %4395 = vmatmul.mubr.msk.f32.gmra.mxu0 %vm156_vm1, %v125_v9  ;;  %v2271_v20 = vmul.f32 %v2146_v5, %v6307_v33 }
 0x1ae   :  { %4969 = vtanh.f32 %v1776_v15  ;;  %v1652_v13 = vadd.f32 %v1527_v7, %v6409_v54  ;;  %v1403_v22 = vmul.f32 %v1278_v17, %v6426_v8  ;;  %v6448_v23 = vadd.f32 %v6015_v32, %v883_v11  ;;  %v2809_v16 = vpop.f32.mrf.mxu1  ;;  %4397 = vmatprep.mubr.msk.f32.mxu0 %vm5121_vm0, %v5120_v0  ;;  %v6516_v15 = vld [vmem:[%s8009_s2] ss:$0 sm:$0xff] }
 0x1af   :  { %v4964_v4 = vpop.eup %4963  ;;  %v2810_v2 = vadd.f32 %v6437_v19, %v2809_v16  ;;  %4618 = vmatmul.mubr.msk.f32.gmra.mxu1 %vm2362_vm2, %v2271_v20  ;;  %v4252_v33 = vpop.f32.mrf.mxu0  ;;  %v2147_v21 = vmul.f32 0.5, %v2022_v36 }
 0x1b0   :  { %v1777_v45 = vmul.f32 0.7978846, %v1652_v13  ;;  %v1528_v30 = vmul.f32 0.044715, %v1403_v22  ;;  %v1279_v24 = vmul.f32 %v6448_v23, %v6448_v23  ;;  %v4475_v10 = vpop.f32.mrf.mxu1  ;;  %4620 = vmatprep.mubr.msk.f32.mxu1 %vm5121_vm0, %v5120_v0  ;;  %v2023_v26 = vadd.f32 1.0, %v4964_v4 }
 0x1b1   :  { %3429 = vst.msk [vmem:[%s8011_s5 + $0x8] sm:$0xff] %vm156_vm1, %v2810_v2  ;;  %v888_v29 = vpop.f32.mrf.mxu0  ;;  %4398 = vmatmul.mubr.msk.f32.gmra.mxu0 %vm156_vm1, %v126_v25  ;;  %v2272_v34 = vmul.f32 %v2147_v21, %v6324_v47 }
 0x1b2   :  { %4971 = vtanh.f32 %v1777_v45  ;;  %v1653_v35 = vadd.f32 %v1528_v30, %v6426_v8  ;;  %v1404_v39 = vmul.f32 %v1279_v24, %v6448_v23  ;;  %v6470_v31 = vadd.f32 %v6015_v32, %v888_v29  ;;  %v2814_v42 = vpop.f32.mrf.mxu1  ;;  %4400 = vmatprep.mubr.msk.f32.mxu0 %vm5121_vm0, %v5120_v0 }
 0x1b3   :  { %v4966_v37 = vpop.eup %4965  ;;  %v2815_v56 = vadd.f32 %v6437_v19, %v2814_v42  ;;  %4621 = vmatmul.mubr.msk.f32.gmra.mxu1 %vm2362_vm2, %v2272_v34  ;;  %v4255_v47 = vpop.f32.mrf.mxu0  ;;  %v2148_v38 = vmul.f32 0.5, %v2023_v26 }
 0x1b4   :  { %v1778_v18 = vmul.f32 0.7978846, %v1653_v35  ;;  %v1529_v40 = vmul.f32 0.044715, %v1404_v39  ;;  %v1280_v49 = vmul.f32 %v6470_v31, %v6470_v31  ;;  %v4478_v50 = vpop.f32.mrf.mxu1  ;;  %4623 = vmatprep.mubr.msk.f32.mxu1 %vm5121_vm0, %v5120_v0  ;;  %v2024_v43 = vadd.f32 1.0, %v4966_v37 }
 0x1b5   :  { %3430 = vst.msk [vmem:[%s8011_s5 + $0x10] sm:$0xff] %vm156_vm1, %v2815_v56  ;;  %v893_v52 = vpop.f32.mrf.mxu0  ;;  %4401 = vmatmul.mubr.msk.f32.gmra.mxu0 %vm156_vm1, %v127_v41  ;;  %v2273_v46 = vmul.f32 %v2148_v38, %v6341_v60 }
 0x1b6   :  { %4973 = vtanh.f32 %v1778_v18  ;;  %v1654_v55 = vadd.f32 %v1529_v40, %v6448_v23  ;;  %v1405_v48 = vmul.f32 %v1280_v49, %v6470_v31  ;;  %v6492_v58 = vadd.f32 %v6015_v32, %v893_v52  ;;  %v2819_v3 = vpop.f32.mrf.mxu1  ;;  %4403 = vmatprep.mubr.msk.f32.mxu0 %vm5121_vm0, %v5120_v0 }
 0x1b7   :  { %v4968_v61 = vpop.eup %4967  ;;  %v2820_v53 = vadd.f32 %v6437_v19, %v2819_v3  ;;  %4624 = vmatmul.mubr.msk.f32.gmra.mxu1 %vm2362_vm2, %v2273_v46  ;;  %v4258_v60 = vpop.f32.mrf.mxu0  ;;  %v2149_v1 = vmul.f32 0.5, %v2024_v43 }
 0x1b8   :  { %v1779_v27 = vmul.f32 0.7978846, %v1654_v55  ;;  %v1530_v57 = vmul.f32 0.044715, %v1405_v48  ;;  %v1281_v32 = vmul.f32 %v6492_v58, %v6492_v58  ;;  %v4481_v6 = vpop.f32.mrf.mxu1  ;;  %4626 = vmatprep.mubr.msk.f32.mxu1 %vm5121_vm0, %v5120_v0  ;;  %v2025_v59 = vadd.f32 1.0, %v4968_v61 }
 0x1b9   :  { %3431 = vst.msk [vmem:[%s8011_s5 + $0x18] sm:$0xff] %vm156_vm1, %v2820_v53  ;;  %v898_v9 = vpop.f32.mrf.mxu0  ;;  %4404 = vmatmul.mubr.msk.f32.gmra.mxu0 %vm156_vm1, %v128_v51  ;;  %v2274_v63 = vmul.f32 %v2149_v1, %v6358_v14  ;;  %v129_v14 = vld [vmem:[%s8007_s0 + $0x368] sm:$0xff] }
 0x1ba   :  { %4975 = vtanh.f32 %v1779_v27  ;;  %v1655_v12 = vadd.f32 %v1530_v57, %v6470_v31  ;;  %v1406_v5 = vmul.f32 %v1281_v32, %v6492_v58  ;;  %v6519_v7 = vadd.f32 %v6516_v15, %v898_v9  ;;  %4406 = vmatprep.mubr.msk.f32.mxu0 %vm5121_vm0, %v5120_v0 }
 0x1bb   :  { %v4970_v17 = vpop.eup %4969  ;;  %v2824_v36 = vpop.f32.mrf.mxu1  ;;  %4627 = vmatmul.mubr.msk.f32.gmra.mxu1 %vm2362_vm2, %v2274_v63  ;;  %v2150_v20 = vmul.f32 0.5, %v2025_v59 }
 0x1bc   :  { %v4261_v11 = vpop.f32.mrf.mxu0  ;;  %v1780_v13 = vmul.f32 0.7978846, %v1655_v12  ;;  %v1531_v22 = vmul.f32 0.044715, %v1406_v5  ;;  %v1282_v16 = vmul.f32 %v6519_v7, %v6519_v7  ;;  %v2825_v25 = vadd.f32 %v6437_v19, %v2824_v36  ;;  %4629 = vmatprep.mubr.msk.f32.mxu1 %vm5121_vm0, %v5120_v0 }
 0x1bd   :  { %v4484_v4 = vpop.f32.mrf.mxu1  ;;  %4407 = vmatmul.mubr.msk.f32.gmra.mxu0 %vm156_vm1, %v129_v14  ;;  %v2275_v33 = vmul.f32 %v2150_v20, %v6375_v28  ;;  %v2026_v21 = vadd.f32 1.0, %v4970_v17  ;;  %v130_v28 = vld [vmem:[%s8007_s0 + $0x370] sm:$0xff]  ;;  %v6599_v36 = vadd.f32 %v6516_v15, %v5503_v62  ;;  %v133_v62 = vld [vmem:[%s8007_s0 + $0x388] sm:$0xff] }
 0x1be   :  { %v903_v2 = vpop.f32.mrf.mxu0  ;;  %4977 = vtanh.f32 %v1780_v13  ;;  %v1656_v45 = vadd.f32 %v1531_v22, %v6492_v58  ;;  %v1407_v30 = vmul.f32 %v1282_v16, %v6519_v7  ;;  %3432 = vst.msk [vmem:[%s8011_s5 + $0x20] sm:$0xff] %vm156_vm1, %v2825_v25  ;;  %4409 = vmatprep.mubr.msk.f32.mxu0 %vm5121_vm0, %v5120_v0 }
 0x1bf   :  { %v6541_v24 = vadd.f32 %v6516_v15, %v903_v2  ;;  %v4972_v10 = vpop.eup %4971  ;;  %v2829_v26 = vpop.f32.mrf.mxu1  ;;  %4630 = vmatmul.mubr.msk.f32.gmra.mxu1 %vm2362_vm2, %v2275_v33  ;;  %v2151_v34 = vmul.f32 0.5, %v2026_v21 }
 0x1c0   :  { %v4264_v29 = vpop.f32.mrf.mxu0  ;;  %v1781_v35 = vmul.f32 0.7978846, %v1656_v45  ;;  %v1532_v39 = vmul.f32 0.044715, %v1407_v30  ;;  %v2830_v41 = vadd.f32 %v6437_v19, %v2829_v26  ;;  %4632 = vmatprep.mubr.msk.f32.mxu1 %vm5121_vm0, %v5120_v0  ;;  %v2027_v38 = vadd.f32 1.0, %v4972_v10 }
 0x1c1   :  { %v1283_v42 = vmul.f32 %v6541_v24, %v6541_v24  ;;  %v4487_v37 = vpop.f32.mrf.mxu1  ;;  %4410 = vmatmul.mubr.msk.f32.gmra.mxu0 %vm156_vm1, %v130_v28  ;;  %v2276_v47 = vmul.f32 %v2151_v34, %v6392_v44  ;;  %v131_v44 = vld [vmem:[%s8007_s0 + $0x378] sm:$0xff]  ;;  %v1222_v26 = vmul.f32 %v6599_v36, %v6599_v36 }
 0x1c2   :  { %v908_v56 = vpop.f32.mrf.mxu0  ;;  %4979 = vtanh.f32 %v1781_v35  ;;  %v1657_v18 = vadd.f32 %v1532_v39, %v6519_v7  ;;  %3433 = vst.msk [vmem:[%s8011_s5 + $0x28] sm:$0xff] %vm156_vm1, %v2830_v41  ;;  %4412 = vmatprep.mubr.msk.f32.mxu0 %vm5121_vm0, %v5120_v0  ;;  %v2152_v46 = vmul.f32 0.5, %v2027_v38  ;;  %v134_v37 = vld [vmem:[%s8007_s0 + $0x390] sm:$0xff] }
 0x1c3   :  { %v1408_v40 = vmul.f32 %v1283_v42, %v6541_v24  ;;  %v6563_v49 = vadd.f32 %v6516_v15, %v908_v56  ;;  %v4974_v50 = vpop.eup %4973  ;;  %v2834_v43 = vpop.f32.mrf.mxu1  ;;  %4633 = vmatmul.mubr.msk.f32.gmra.mxu1 %vm2362_vm2, %v2276_v47 }
 0x1c4   :  { %v4267_v52 = vpop.f32.mrf.mxu0  ;;  %v1782_v55 = vmul.f32 0.7978846, %v1657_v18  ;;  %v2835_v51 = vadd.f32 %v6437_v19, %v2834_v43  ;;  %4635 = vmatprep.mubr.msk.f32.mxu1 %vm5121_vm0, %v5120_v0  ;;  %v2277_v60 = vmul.f32 %v2152_v46, %v6409_v54  ;;  %v2028_v1 = vadd.f32 1.0, %v4974_v50  ;;  %v132_v54 = vld [vmem:[%s8007_s0 + $0x380] sm:$0xff] }
 0x1c5   :  { %v1533_v48 = vmul.f32 0.044715, %v1408_v40  ;;  %v1284_v3 = vmul.f32 %v6563_v49, %v6563_v49  ;;  %v4490_v61 = vpop.f32.mrf.mxu1  ;;  %4413 = vmatmul.mubr.msk.f32.gmra.mxu0 %vm156_vm1, %v131_v44  ;;  %v1347_v52 = vmul.f32 %v1222_v26, %v6599_v36 }
 0x1c6   :  { %v913_v53 = vpop.f32.mrf.mxu0  ;;  %4981 = vtanh.f32 %v1782_v55  ;;  %3434 = vst.msk [vmem:[%s8011_s5 + $0x30] sm:$0xff] %vm156_vm1, %v2835_v51  ;;  %4415 = vmatprep.mubr.msk.f32.mxu0 %vm5121_vm0, %v5120_v0  ;;  %v2153_v63 = vmul.f32 0.5, %v2028_v1 }
 0x1c7   :  { %v1658_v27 = vadd.f32 %v1533_v48, %v6541_v24  ;;  %v1409_v57 = vmul.f32 %v1284_v3, %v6563_v49  ;;  %v6585_v32 = vadd.f32 %v6516_v15, %v913_v53  ;;  %v4976_v6 = vpop.eup %4975  ;;  %v2839_v59 = vpop.f32.mrf.mxu1  ;;  %4636 = vmatmul.mubr.msk.f32.gmra.mxu1 %vm2362_vm2, %v2277_v60  ;;  %v135_v53 = vld [vmem:[%s8007_s0 + $0x398] sm:$0xff] }
 0x1c8   :  { %v4270_v9 = vpop.f32.mrf.mxu0  ;;  %v2029_v12 = vadd.f32 1.0, %v4976_v6  ;;  %4638 = vmatprep.mubr.msk.f32.mxu1 %vm5121_vm0, %v5120_v0  ;;  %v2840_v11 = vadd.f32 %v6437_v19, %v2839_v59  ;;  %v2278_v22 = vmul.f32 %v2153_v63, %v6426_v8  ;;  %v1472_v63 = vmul.f32 0.044715, %v1347_v52 }
 0x1c9   :  { %v1783_v5 = vmul.f32 0.7978846, %v1658_v27  ;;  %v1534_v14 = vmul.f32 0.044715, %v1409_v57  ;;  %v1285_v17 = vmul.f32 %v6585_v32, %v6585_v32  ;;  %v4493_v20 = vpop.f32.mrf.mxu1  ;;  %4416 = vmatmul.mubr.msk.f32.gmra.mxu0 %vm156_vm1, %v132_v54 }
 0x1ca   :  { %v918_v13 = vpop.f32.mrf.mxu0  ;;  %v2154_v16 = vmul.f32 0.5, %v2029_v12  ;;  %4418 = vmatprep.mubr.msk.f32.mxu0 %vm5121_vm0, %v5120_v0  ;;  %3435 = vst.msk [vmem:[%s8011_s5 + $0x38] sm:$0xff] %vm156_vm1, %v2840_v11 }
 0x1cb   :  { %4983 = vtanh.f32 %v1783_v5  ;;  %v1659_v25 = vadd.f32 %v1534_v14, %v6563_v49  ;;  %v1410_v4 = vmul.f32 %v1285_v17, %v6585_v32  ;;  %v4978_v2 = vpop.eup %4977  ;;  %v6616_v8 = vadd.f32 %v6516_v15, %v918_v13  ;;  %v2844_v33 = vpop.f32.mrf.mxu1  ;;  %4639 = vmatmul.mubr.msk.f32.gmra.mxu1 %vm2362_vm2, %v2278_v22  ;;  %v136_v22 = vld [vmem:[%s8007_s0 + $0x3a0] sm:$0xff] }
 0x1cc   :  { %v4273_v21 = vpop.f32.mrf.mxu0  ;;  %v2279_v45 = vmul.f32 %v2154_v16, %v6448_v23  ;;  %v2030_v30 = vadd.f32 1.0, %v4978_v2  ;;  %4641 = vmatprep.mubr.msk.f32.mxu1 %vm5121_vm0, %v5120_v0  ;;  %v2845_v34 = vadd.f32 %v6437_v19, %v2844_v33 }
 0x1cd   :  { %v1784_v28 = vmul.f32 0.7978846, %v1659_v25  ;;  %v1535_v10 = vmul.f32 0.044715, %v1410_v4  ;;  %v1286_v29 = vmul.f32 %v6616_v8, %v6616_v8  ;;  %v4496_v35 = vpop.f32.mrf.mxu1  ;;  %4419 = vmatmul.mubr.msk.f32.gmra.mxu0 %vm156_vm1, %v133_v62 }
 0x1ce   :  { %v923_v39 = vpop.f32.mrf.mxu0  ;;  %v2155_v42 = vmul.f32 0.5, %v2030_v30  ;;  %4421 = vmatprep.mubr.msk.f32.mxu0 %vm5121_vm0, %v5120_v0  ;;  %3436 = vst.msk [vmem:[%s8011_s5 + $0x40] sm:$0xff] %vm156_vm1, %v2845_v34  ;;  %v137_v35 = vld [vmem:[%s8007_s0 + $0x3a8] sm:$0xff] }
 0x1cf   :  { %4985 = vtanh.f32 %v1784_v28  ;;  %v1660_v23 = vadd.f32 %v1535_v10, %v6585_v32  ;;  %v6630_v41 = vadd.f32 %v6516_v15, %v923_v39  ;;  %v4980_v56 = vpop.eup %4979  ;;  %v1411_v47 = vmul.f32 %v1286_v29, %v6616_v8  ;;  %v2849_v38 = vpop.f32.mrf.mxu1  ;;  %4642 = vmatmul.mubr.msk.f32.gmra.mxu1 %vm2362_vm2, %v2279_v45 }
 0x1d0   :  { %v4276_v18 = vpop.f32.mrf.mxu0  ;;  %v2280_v40 = vmul.f32 %v2155_v42, %v6470_v31  ;;  %v2031_v44 = vadd.f32 1.0, %v4980_v56  ;;  %4644 = vmatprep.mubr.msk.f32.mxu1 %vm5121_vm0, %v5120_v0  ;;  %v2850_v55 = vadd.f32 %v6437_v19, %v2849_v38  ;;  %v1597_v45 = vadd.f32 %v1472_v63, %v6599_v36 }
 0x1d1   :  { %v1785_v50 = vmul.f32 0.7978846, %v1660_v23  ;;  %v1287_v43 = vmul.f32 %v6630_v41, %v6630_v41  ;;  %v1536_v46 = vmul.f32 0.044715, %v1411_v47  ;;  %v4499_v48 = vpop.f32.mrf.mxu1  ;;  %4422 = vmatmul.mubr.msk.f32.gmra.mxu0 %vm156_vm1, %v134_v37 }
 0x1d2   :  { %v928_v3 = vpop.f32.mrf.mxu0  ;;  %v2156_v51 = vmul.f32 0.5, %v2031_v44  ;;  %4424 = vmatprep.mubr.msk.f32.mxu0 %vm5121_vm0, %v5120_v0  ;;  %3437 = vst.msk [vmem:[%s8011_s5 + $0x48] sm:$0xff] %vm156_vm1, %v2850_v55  ;;  %v138_v48 = vld [vmem:[%s8007_s0 + $0x3b0] sm:$0xff] }
 0x1d3   :  { %4987 = vtanh.f32 %v1785_v50  ;;  %v1412_v31 = vmul.f32 %v1287_v43, %v6630_v41  ;;  %v6653_v61 = vadd.f32 %v6516_v15, %v928_v3  ;;  %v4982_v60 = vpop.eup %4981  ;;  %v1661_v1 = vadd.f32 %v1536_v46, %v6616_v8  ;;  %v2854_v27 = vpop.f32.mrf.mxu1  ;;  %4645 = vmatmul.mubr.msk.f32.gmra.mxu1 %vm2362_vm2, %v2280_v40 }
 0x1d4   :  { %v4279_v57 = vpop.f32.mrf.mxu0  ;;  %v2281_v54 = vmul.f32 %v2156_v51, %v6492_v58  ;;  %v2032_v6 = vadd.f32 1.0, %v4982_v60  ;;  %4647 = vmatprep.mubr.msk.f32.mxu1 %vm5121_vm0, %v5120_v0  ;;  %v2855_v5 = vadd.f32 %v6437_v19, %v2854_v27  ;;  %v1722_v40 = vmul.f32 0.7978846, %v1597_v45 }
 0x1d5   :  { %v1537_v59 = vmul.f32 0.044715, %v1412_v31  ;;  %v1288_v9 = vmul.f32 %v6653_v61, %v6653_v61  ;;  %v1786_v12 = vmul.f32 0.7978846, %v1661_v1  ;;  %v4502_v14 = vpop.f32.mrf.mxu1  ;;  %4425 = vmatmul.mubr.msk.f32.gmra.mxu0 %vm156_vm1, %v135_v53 }
 0x1d6   :  { %v933_v17 = vpop.f32.mrf.mxu0  ;;  %v2157_v11 = vmul.f32 0.5, %v2032_v6  ;;  %4427 = vmatprep.mubr.msk.f32.mxu0 %vm5121_vm0, %v5120_v0  ;;  %3438 = vst.msk [vmem:[%s8011_s5 + $0x50] sm:$0xff] %vm156_vm1, %v2855_v5  ;;  %v139_v14 = vld [vmem:[%s8007_s0 + $0x3b8] sm:$0xff] }
 0x1d7   :  { %v1662_v20 = vadd.f32 %v1537_v59, %v6630_v41  ;;  %v1413_v58 = vmul.f32 %v1288_v9, %v6653_v61  ;;  %v6676_v13 = vadd.f32 %v6516_v15, %v933_v17  ;;  %4989 = vtanh.f32 %v1786_v12  ;;  %v2859_v25 = vpop.f32.mrf.mxu1  ;;  %4648 = vmatmul.mubr.msk.f32.gmra.mxu1 %vm2362_vm2, %v2281_v54 }
 0x1d8   :  { %v4984_v16 = vpop.eup %4983  ;;  %v4282_v4 = vpop.f32.mrf.mxu0  ;;  %v2282_v62 = vmul.f32 %v2157_v11, %v6519_v7  ;;  %4650 = vmatprep.mubr.msk.f32.mxu1 %vm5121_vm0, %v5120_v0  ;;  %v2860_v28 = vadd.f32 %v6437_v19, %v2859_v25 }
 0x1d9   :  { %v2033_v2 = vadd.f32 1.0, %v4984_v16  ;;  %v1787_v33 = vmul.f32 0.7978846, %v1662_v20  ;;  %v1538_v21 = vmul.f32 0.044715, %v1413_v58  ;;  %v1289_v30 = vmul.f32 %v6676_v13, %v6676_v13  ;;  %v4505_v10 = vpop.f32.mrf.mxu1  ;;  %4428 = vmatmul.mubr.msk.f32.gmra.mxu0 %vm156_vm1, %v136_v22 }
 0x1da   :  { %v938_v26 = vpop.f32.mrf.mxu0  ;;  %4430 = vmatprep.mubr.msk.f32.mxu0 %vm5121_vm0, %v5120_v0  ;;  %3439 = vst.msk [vmem:[%s8011_s5 + $0x58] sm:$0xff] %vm156_vm1, %v2860_v28 }
 0x1db   :  { %v2158_v29 = vmul.f32 0.5, %v2033_v2  ;;  %4991 = vtanh.f32 %v1787_v33  ;;  %v1663_v7 = vadd.f32 %v1538_v21, %v6653_v61  ;;  %v6698_v34 = vadd.f32 %v6516_v15, %v938_v26  ;;  %v2864_v23 = vpop.f32.mrf.mxu1  ;;  %4651 = vmatmul.mubr.msk.f32.gmra.mxu1 %vm2362_vm2, %v2282_v62 }
 0x1dc   :  { %v4986_v39 = vpop.eup %4985  ;;  %v1414_v42 = vmul.f32 %v1289_v30, %v6676_v13  ;;  %v4285_v37 = vpop.f32.mrf.mxu0  ;;  %4653 = vmatprep.mubr.msk.f32.mxu1 %vm5121_vm0, %v5120_v0  ;;  %v2865_v50 = vadd.f32 %v6437_v19, %v2864_v23  ;;  %v140_v30 = vld [vmem:[%s8007_s0 + $0x3c0] sm:$0xff] }
 0x1dd   :  { %v2283_v56 = vmul.f32 %v2158_v29, %v6541_v24  ;;  %v2034_v47 = vadd.f32 1.0, %v4986_v39  ;;  %v1788_v38 = vmul.f32 0.7978846, %v1663_v7  ;;  %v1290_v18 = vmul.f32 %v6698_v34, %v6698_v34  ;;  %v4508_v43 = vpop.f32.mrf.mxu1  ;;  %4431 = vmatmul.mubr.msk.f32.gmra.mxu0 %vm156_vm1, %v137_v35 }
 0x1de   :  { %v1539_v44 = vmul.f32 0.044715, %v1414_v42  ;;  %v943_v52 = vpop.f32.mrf.mxu0  ;;  %4433 = vmatprep.mubr.msk.f32.mxu0 %vm5121_vm0, %v5120_v0  ;;  %3440 = vst.msk [vmem:[%s8011_s5 + $0x60] sm:$0xff] %vm156_vm1, %v2865_v50 }
 0x1df   :  { %v2159_v46 = vmul.f32 0.5, %v2034_v47  ;;  %4993 = vtanh.f32 %v1788_v38  ;;  %v1415_v24 = vmul.f32 %v1290_v18, %v6698_v34  ;;  %v6720_v55 = vadd.f32 %v6516_v15, %v943_v52  ;;  %v2869_v31 = vpop.f32.mrf.mxu1  ;;  %4654 = vmatmul.mubr.msk.f32.gmra.mxu1 %vm2362_vm2, %v2283_v56 }
 0x1e0   :  { %v4988_v3 = vpop.eup %4987  ;;  %v1664_v51 = vadd.f32 %v1539_v44, %v6676_v13  ;;  %v4288_v53 = vpop.f32.mrf.mxu0  ;;  %4656 = vmatprep.mubr.msk.f32.mxu1 %vm5121_vm0, %v5120_v0  ;;  %4995 = vtanh.f32 %v1722_v40  ;;  %v2870_v6 = vadd.f32 %v6437_v19, %v2869_v31  ;;  %v141_v44 = vld [vmem:[%s8007_s0 + $0x3c8] sm:$0xff] }
 0x1e1   :  { %v2284_v60 = vmul.f32 %v2159_v46, %v6563_v49  ;;  %v2035_v1 = vadd.f32 1.0, %v4988_v3  ;;  %v1540_v27 = vmul.f32 0.044715, %v1415_v24  ;;  %v1291_v57 = vmul.f32 %v6720_v55, %v6720_v55  ;;  %v4511_v59 = vpop.f32.mrf.mxu1  ;;  %4434 = vmatmul.mubr.msk.f32.gmra.mxu0 %vm156_vm1, %v138_v48 }
 0x1e2   :  { %v1789_v54 = vmul.f32 0.7978846, %v1664_v51  ;;  %v948_v9 = vpop.f32.mrf.mxu0  ;;  %4436 = vmatprep.mubr.msk.f32.mxu0 %vm5121_vm0, %v5120_v0  ;;  %3441 = vst.msk [vmem:[%s8011_s5 + $0x68] sm:$0xff] %vm156_vm1, %v2870_v6 }
 0x1e3   :  { %v2160_v63 = vmul.f32 0.5, %v2035_v1  ;;  %v1665_v12 = vadd.f32 %v1540_v27, %v6698_v34  ;;  %v1416_v49 = vmul.f32 %v1291_v57, %v6720_v55  ;;  %v6743_v5 = vadd.f32 %v6516_v15, %v948_v9  ;;  %v2874_v17 = vpop.f32.mrf.mxu1  ;;  %4657 = vmatmul.mubr.msk.f32.gmra.mxu1 %vm2362_vm2, %v2284_v60 }
 0x1e4   :  { %4997 = vtanh.f32 %v1789_v54  ;;  %v4291_v11 = vpop.f32.mrf.mxu0  ;;  %v4990_v20 = vpop.eup %4989  ;;  %4659 = vmatprep.mubr.msk.f32.mxu1 %vm5121_vm0, %v5120_v0  ;;  %v2875_v62 = vadd.f32 %v6437_v19, %v2874_v17  ;;  %v142_v54 = vld [vmem:[%s8007_s0 + $0x3d0] sm:$0xff] }
 0x1e5   :  { %v2285_v58 = vmul.f32 %v2160_v63, %v6585_v32  ;;  %v1790_v22 = vmul.f32 0.7978846, %v1665_v12  ;;  %v1541_v16 = vmul.f32 0.044715, %v1416_v49  ;;  %v1292_v25 = vmul.f32 %v6743_v5, %v6743_v5  ;;  %v4514_v2 = vpop.f32.mrf.mxu1  ;;  %4437 = vmatmul.mubr.msk.f32.gmra.mxu0 %vm156_vm1, %v139_v14 }
 0x1e6   :  { %v2036_v4 = vadd.f32 1.0, %v4990_v20  ;;  %v953_v33 = vpop.f32.mrf.mxu0  ;;  %4439 = vmatprep.mubr.msk.f32.mxu0 %vm5121_vm0, %v5120_v0  ;;  %3442 = vst.msk [vmem:[%s8011_s5 + $0x70] sm:$0xff] %vm156_vm1, %v2875_v62 }
 0x1e7   :  { %4999 = vtanh.f32 %v1790_v22  ;;  %v1666_v21 = vadd.f32 %v1541_v16, %v6720_v55  ;;  %v1417_v32 = vmul.f32 %v1292_v25, %v6743_v5  ;;  %v6765_v45 = vadd.f32 %v6516_v15, %v953_v33  ;;  %v2879_v26 = vpop.f32.mrf.mxu1  ;;  %4660 = vmatmul.mubr.msk.f32.gmra.mxu1 %vm2362_vm2, %v2285_v58  ;;  %v143_v25 = vld [vmem:[%s8007_s0 + $0x3d8] sm:$0xff] }
 0x1e8   :  { %v4992_v28 = vpop.eup %4991  ;;  %v2161_v10 = vmul.f32 0.5, %v2036_v4  ;;  %v4294_v29 = vpop.f32.mrf.mxu0  ;;  %4662 = vmatprep.mubr.msk.f32.mxu1 %vm5121_vm0, %v5120_v0  ;;  %v2880_v37 = vadd.f32 %v6437_v19, %v2879_v26 }
 0x1e9   :  { %v2037_v7 = vadd.f32 1.0, %v4992_v28  ;;  %v1791_v35 = vmul.f32 0.7978846, %v1666_v21  ;;  %v1542_v39 = vmul.f32 0.044715, %v1417_v32  ;;  %v1293_v42 = vmul.f32 %v6765_v45, %v6765_v45  ;;  %v4517_v56 = vpop.f32.mrf.mxu1  ;;  %4440 = vmatmul.mubr.msk.f32.gmra.mxu0 %vm156_vm1, %v140_v30 }
 0x1ea   :  { %v2286_v23 = vmul.f32 %v2161_v10, %v6616_v8  ;;  %v958_v47 = vpop.f32.mrf.mxu0  ;;  %4442 = vmatprep.mubr.msk.f32.mxu0 %vm5121_vm0, %v5120_v0  ;;  %3443 = vst.msk [vmem:[%s8011_s5 + $0x78] sm:$0xff] %vm156_vm1, %v2880_v37 }
 0x1eb   :  { %v2162_v38 = vmul.f32 0.5, %v2037_v7  ;;  %5001 = vtanh.f32 %v1791_v35  ;;  %v1667_v18 = vadd.f32 %v1542_v39, %v6743_v5  ;;  %v1418_v40 = vmul.f32 %v1293_v42, %v6765_v45  ;;  %v2884_v43 = vpop.f32.mrf.mxu1 }
 0x1ec   :  { %v4994_v8 = vpop.eup %4993  ;;  %v6796_v50 = vadd.f32 %v6516_v15, %v958_v47  ;;  %4663 = vmatmul.mubr.msk.f32.gmra.mxu1 %vm2362_vm2, %v2286_v23  ;;  %v4297_v52 = vpop.f32.mrf.mxu0  ;;  %v2885_v31 = vadd.f32 %v6437_v19, %v2884_v43 }
 0x1ed   :  { %v2287_v46 = vmul.f32 %v2162_v38, %v6630_v41  ;;  %v2038_v24 = vadd.f32 1.0, %v4994_v8  ;;  %v1792_v48 = vmul.f32 0.7978846, %v1667_v18  ;;  %v1543_v3 = vmul.f32 0.044715, %v1418_v40  ;;  %4665 = vmatprep.mubr.msk.f32.mxu1 %vm5121_vm0, %v5120_v0  ;;  %v4520_v53 = vpop.f32.mrf.mxu1  ;;  %4443 = vmatmul.mubr.msk.f32.gmra.mxu0 %vm156_vm1, %v141_v44  ;;  %v4996_v1 = vpop.eup %4995 }
 0x1ee   :  { %v1294_v51 = vmul.f32 %v6796_v50, %v6796_v50  ;;  %v963_v60 = vpop.f32.mrf.mxu0  ;;  %4445 = vmatprep.mubr.msk.f32.mxu0 %vm5121_vm0, %v5120_v0  ;;  %3444 = vst.msk [vmem:[%s8011_s5 + $0x80] sm:$0xff] %vm156_vm1, %v2885_v31  ;;  %v1972_v62 = vadd.f32 1.0, %v4996_v1 }
 0x1ef   :  { %v2163_v27 = vmul.f32 0.5, %v2038_v24  ;;  %5003 = vtanh.f32 %v1792_v48  ;;  %v1668_v41 = vadd.f32 %v1543_v3, %v6765_v45  ;;  %v6808_v57 = vadd.f32 %v6516_v15, %v963_v60  ;;  %v2889_v59 = vpop.f32.mrf.mxu1 }
 0x1f0   :  { %v1419_v6 = vmul.f32 %v1294_v51, %v6796_v50  ;;  %4666 = vmatmul.mubr.msk.f32.gmra.mxu1 %vm2362_vm2, %v2287_v46  ;;  %v4300_v9 = vpop.f32.mrf.mxu0  ;;  %v2890_v17 = vadd.f32 %v6437_v19, %v2889_v59  ;;  %v2097_v38 = vmul.f32 0.5, %v1972_v62 }
 0x1f1   :  { %v4998_v63 = vpop.eup %4997  ;;  %v2288_v12 = vmul.f32 %v2163_v27, %v6653_v61  ;;  %v1793_v49 = vmul.f32 0.7978846, %v1668_v41  ;;  %v1295_v14 = vmul.f32 %v6808_v57, %v6808_v57  ;;  %4668 = vmatprep.mubr.msk.f32.mxu1 %vm5121_vm0, %v5120_v0  ;;  %v4523_v58 = vpop.f32.mrf.mxu1  ;;  %4446 = vmatmul.mubr.msk.f32.gmra.mxu0 %vm156_vm1, %v142_v54 }
 0x1f2   :  { %v2039_v11 = vadd.f32 1.0, %v4998_v63  ;;  %v1544_v20 = vmul.f32 0.044715, %v1419_v6  ;;  %v968_v22 = vpop.f32.mrf.mxu0  ;;  %3445 = vst.msk [vmem:[%s8011_s5 + $0x88] sm:$0xff] %vm156_vm1, %v2890_v17  ;;  %4448 = vmatprep.mubr.msk.f32.mxu0 %vm5121_vm0, %v5120_v0  ;;  %v2222_v60 = vmul.f32 %v2097_v38, %v6599_v36 }
 0x1f3   :  { %5005 = vtanh.f32 %v1793_v49  ;;  %v1420_v16 = vmul.f32 %v1295_v14, %v6808_v57  ;;  %v6834_v61 = vadd.f32 %v6516_v15, %v968_v22  ;;  %v2894_v21 = vpop.f32.mrf.mxu1 }
 0x1f4   :  { %v5000_v4 = vpop.eup %4999  ;;  %v2164_v2 = vmul.f32 0.5, %v2039_v11  ;;  %v1669_v33 = vadd.f32 %v1544_v20, %v6796_v50  ;;  %4669 = vmatmul.mubr.msk.f32.gmra.mxu1 %vm2362_vm2, %v2288_v12  ;;  %v4303_v32 = vpop.f32.mrf.mxu0  ;;  %v2895_v26 = vadd.f32 %v6437_v19, %v2894_v21 }
 0x1f5   :  { %v2040_v30 = vadd.f32 1.0, %v5000_v4  ;;  %v1545_v28 = vmul.f32 0.044715, %v1420_v16  ;;  %v1296_v10 = vmul.f32 %v6834_v61, %v6834_v61  ;;  %4671 = vmatprep.mubr.msk.f32.mxu1 %vm5121_vm0, %v5120_v0  ;;  %v4526_v35 = vpop.f32.mrf.mxu1  ;;  %4449 = vmatmul.mubr.msk.f32.gmra.mxu0 %vm156_vm1, %v143_v25 }
 0x1f6   :  { %v2289_v29 = vmul.f32 %v2164_v2, %v6676_v13  ;;  %v1794_v7 = vmul.f32 0.7978846, %v1669_v33  ;;  %v973_v39 = vpop.f32.mrf.mxu0  ;;  %3446 = vst.msk [vmem:[%s8011_s5 + $0x90] sm:$0xff] %vm156_vm1, %v2895_v26  ;;  %4451 = vmatprep.mubr.msk.f32.mxu0 %vm5121_vm0, %v5120_v0  ;;  %v144_v13 = vld [vmem:[%s8007_s0 + $0x3e0] sm:$0xff] }
 0x1f7   :  { %v2165_v42 = vmul.f32 0.5, %v2040_v30  ;;  %v1670_v23 = vadd.f32 %v1545_v28, %v6808_v57  ;;  %v1421_v37 = vmul.f32 %v1296_v10, %v6834_v61  ;;  %v6857_v56 = vadd.f32 %v6516_v15, %v973_v39  ;;  %v2899_v18 = vpop.f32.mrf.mxu1 }
 0x1f8   :  { %v5002_v47 = vpop.eup %5001  ;;  %5007 = vtanh.f32 %v1794_v7  ;;  %4672 = vmatmul.mubr.msk.f32.gmra.mxu1 %vm2362_vm2, %v2289_v29  ;;  %v4306_v40 = vpop.f32.mrf.mxu0  ;;  %v2900_v24 = vadd.f32 %v6437_v19, %v2899_v18 }
 0x1f9   :  { %v2290_v44 = vmul.f32 %v2165_v42, %v6698_v34  ;;  %v2041_v8 = vadd.f32 1.0, %v5002_v47  ;;  %v1795_v43 = vmul.f32 0.7978846, %v1670_v23  ;;  %v1546_v52 = vmul.f32 0.044715, %v1421_v37  ;;  %4674 = vmatprep.mubr.msk.f32.mxu1 %vm5121_vm0, %v5120_v0  ;;  %v4529_v48 = vpop.f32.mrf.mxu1  ;;  %4452 = vmatmul.mubr.msk.f32.gmra.mxu0 %vm156_vm1, %v144_v13 }
 0x1fa   :  { %v1297_v46 = vmul.f32 %v6857_v56, %v6857_v56  ;;  %v978_v3 = vpop.f32.mrf.mxu0  ;;  %4470 = vmatprep.mubr.msk.f32.mxu0 %vm5121_vm0, %v5120_v0  ;;  %3447 = vst.msk [vmem:[%s8011_s5 + $0x98] sm:$0xff] %vm156_vm1, %v2900_v24 }
 0x1fb   :  { %v2166_v51 = vmul.f32 0.5, %v2041_v8  ;;  %5009 = vtanh.f32 %v1795_v43  ;;  %v1671_v31 = vadd.f32 %v1546_v52, %v6834_v61  ;;  %v6874_v34 = vadd.f32 %v6516_v15, %v978_v3  ;;  %v2904_v27 = vpop.f32.mrf.mxu1 }
 0x1fc   :  { %v5004_v53 = vpop.eup %5003  ;;  %v1422_v1 = vmul.f32 %v1297_v46, %v6857_v56  ;;  %4675 = vmatmul.mubr.msk.f32.gmra.mxu1 %vm2362_vm2, %v2290_v44  ;;  %v4309_v41 = vpop.f32.mrf.mxu0  ;;  %v2905_v63 = vadd.f32 %v6437_v19, %v2904_v27 }
 0x1fd   :  { %v2291_v54 = vmul.f32 %v2166_v51, %v6720_v55  ;;  %v2042_v6 = vadd.f32 1.0, %v5004_v53  ;;  %v1796_v59 = vmul.f32 0.7978846, %v1671_v31  ;;  %v1298_v9 = vmul.f32 %v6874_v34, %v6874_v34  ;;  %4677 = vmatprep.mubr.msk.f32.mxu1 %vm5121_vm0, %v5120_v0  ;;  %v4532_v12 = vpop.f32.mrf.mxu1  ;;  %4471 = vmatmul.mubr.msk.f32.vlgmr.msra.gmra.mxu0 %vm2362_vm2, %v2222_v60  ;;  %v6942_v51 = vld [vmem:[%s8010_s4] ss:$0 sm:$0xff] }
 0x1fe   :  { %v1547_v36 = vmul.f32 0.044715, %v1422_v1  ;;  %v983_v49 = vpop.f32.mrf.mxu0  ;;  %3448 = vst.msk [vmem:[%s8011_s5 + $0xa0] sm:$0xff] %vm156_vm1, %v2905_v63 }
 0x1ff   :  { %v2167_v14 = vmul.f32 0.5, %v2042_v6  ;;  %5011 = vtanh.f32 %v1796_v59  ;;  %v1423_v17 = vmul.f32 %v1298_v9, %v6874_v34  ;;  %v6894_v55 = vadd.f32 %v6516_v15, %v983_v49  ;;  %v2909_v58 = vpop.f32.mrf.mxu1 }
 0x200   :  { %v5006_v11 = vpop.eup %5005  ;;  %v1672_v20 = vadd.f32 %v1547_v36, %v6857_v56  ;;  %4678 = vmatmul.mubr.msk.f32.gmra.mxu1 %vm2362_vm2, %v2291_v54  ;;  %v4312_v22 = vpop.f32.mrf.mxu0  ;;  %v2910_v33 = vadd.f32 %v6437_v19, %v2909_v58 }
 0x201   :  { %v2292_v16 = vmul.f32 %v2167_v14, %v6743_v5  ;;  %v2043_v25 = vadd.f32 1.0, %v5006_v11  ;;  %v1548_v4 = vmul.f32 0.044715, %v1423_v17  ;;  %v1299_v62 = vmul.f32 %v6894_v55, %v6894_v55  ;;  %4680 = vmatprep.mubr.msk.f32.mxu1 %vm5121_vm0, %v5120_v0  ;;  %v4535_v21 = vpop.f32.mrf.mxu1 }
 0x202   :  { %v1797_v2 = vmul.f32 0.7978846, %v1672_v20  ;;  %v988_v32 = vpop.f32.mrf.mxu0  ;;  %3449 = vst.msk [vmem:[%s8011_s5 + $0xa8] sm:$0xff] %vm156_vm1, %v2910_v33 }
 0x203   :  { %v2168_v30 = vmul.f32 0.5, %v2043_v25  ;;  %v1673_v28 = vadd.f32 %v1548_v4, %v6874_v34  ;;  %v1424_v10 = vmul.f32 %v1299_v62, %v6894_v55  ;;  %v6911_v5 = vadd.f32 %v6516_v15, %v988_v32  ;;  %v2914_v26 = vpop.f32.mrf.mxu1 }
 0x204   :  { %5013 = vtanh.f32 %v1797_v2  ;;  %4681 = vmatmul.mubr.msk.f32.gmra.mxu1 %vm2362_vm2, %v2292_v16  ;;  %v4315_v29 = vpop.f32.mrf.mxu0  ;;  %v2915_v13 = vadd.f32 %v6437_v19, %v2914_v26 }
 0x205   :  { %v5008_v7 = vpop.eup %5007  ;;  %v2293_v35 = vmul.f32 %v2168_v30, %v6765_v45  ;;  %v1798_v39 = vmul.f32 0.7978846, %v1673_v28  ;;  %v1549_v42 = vmul.f32 0.044715, %v1424_v10  ;;  %v1300_v23 = vmul.f32 %v6911_v5, %v6911_v5  ;;  %4683 = vmatprep.mubr.msk.f32.mxu1 %vm5121_vm0, %v5120_v0  ;;  %v4538_v47 = vpop.f32.mrf.mxu1 }
 0x206   :  { %v2044_v37 = vadd.f32 1.0, %v5008_v7  ;;  %v993_v38 = vpop.f32.mrf.mxu0  ;;  %3450 = vst.msk [vmem:[%s8011_s5 + $0xb0] sm:$0xff] %vm156_vm1, %v2915_v13 }
 0x207   :  { %5015 = vtanh.f32 %v1798_v39  ;;  %v1674_v18 = vadd.f32 %v1549_v42, %v6894_v55  ;;  %v1425_v40 = vmul.f32 %v1300_v23, %v6911_v5  ;;  %v6927_v45 = vadd.f32 %v6516_v15, %v993_v38  ;;  %v2919_v43 = vpop.f32.mrf.mxu1 }
 0x208   :  { %v5010_v44 = vpop.eup %5009  ;;  %v2169_v8 = vmul.f32 0.5, %v2044_v37  ;;  %4684 = vmatmul.mubr.msk.f32.gmra.mxu1 %vm2362_vm2, %v2293_v35  ;;  %v4318_v19 = vpop.f32.mrf.mxu0  ;;  %v2920_v31 = vadd.f32 %v6942_v51, %v2919_v43 }
 0x209   :  { %v2045_v52 = vadd.f32 1.0, %v5010_v44  ;;  %v1799_v46 = vmul.f32 0.7978846, %v1674_v18  ;;  %v1550_v24 = vmul.f32 0.044715, %v1425_v40  ;;  %v1301_v48 = vmul.f32 %v6927_v45, %v6927_v45  ;;  %4686 = vmatprep.mubr.msk.f32.mxu1 %vm5121_vm0, %v5120_v0  ;;  %v4541_v53 = vpop.f32.mrf.mxu1 }
 0x20a   :  { %v2294_v3 = vmul.f32 %v2169_v8, %v6796_v50  ;;  %v998_v60 = vpop.f32.mrf.mxu0  ;;  %3451 = vst.msk [vmem:[%s8011_s5 + $0xb8] sm:$0xff] %vm156_vm1, %v2920_v31 }
 0x20b   :  { %v2170_v1 = vmul.f32 0.5, %v2045_v52  ;;  %5017 = vtanh.f32 %v1799_v46  ;;  %v1675_v27 = vadd.f32 %v1550_v24, %v6911_v5  ;;  %v1426_v41 = vmul.f32 %v1301_v48, %v6927_v45  ;;  %v2924_v6 = vpop.f32.mrf.mxu1 }
 0x20c   :  { %v5012_v54 = vpop.eup %5011  ;;  %v6952_v50 = vadd.f32 %v6516_v15, %v998_v60  ;;  %4687 = vmatmul.mubr.msk.f32.gmra.mxu1 %vm2362_vm2, %v2294_v3  ;;  %v4321_v59 = vpop.f32.mrf.mxu0  ;;  %v2925_v14 = vadd.f32 %v6942_v51, %v2924_v6 }
 0x20d   :  { %v2295_v9 = vmul.f32 %v2170_v1, %v6808_v57  ;;  %v2046_v36 = vadd.f32 1.0, %v5012_v54  ;;  %v1800_v63 = vmul.f32 0.7978846, %v1675_v27  ;;  %v1551_v12 = vmul.f32 0.044715, %v1426_v41  ;;  %4689 = vmatprep.mubr.msk.f32.mxu1 %vm5121_vm0, %v5120_v0  ;;  %v4544_v17 = vpop.f32.mrf.mxu1 }
 0x20e   :  { %v1302_v49 = vmul.f32 %v6952_v50, %v6952_v50  ;;  %v1003_v11 = vpop.f32.mrf.mxu0  ;;  %3452 = vst.msk [vmem:[%s8011_s5 + $0xc0] sm:$0xff] %vm156_vm1, %v2925_v14 }
 0x20f   :  { %v2171_v20 = vmul.f32 0.5, %v2046_v36  ;;  %5019 = vtanh.f32 %v1800_v63  ;;  %v1676_v58 = vadd.f32 %v1551_v12, %v6927_v45  ;;  %v6963_v22 = vadd.f32 %v6516_v15, %v1003_v11  ;;  %v2929_v16 = vpop.f32.mrf.mxu1 }
 0x210   :  { %v1427_v57 = vmul.f32 %v1302_v49, %v6952_v50  ;;  %4690 = vmatmul.mubr.msk.f32.gmra.mxu1 %vm2362_vm2, %v2295_v9  ;;  %v4324_v25 = vpop.f32.mrf.mxu0  ;;  %v2930_v21 = vadd.f32 %v6942_v51, %v2929_v16 }
 0x211   :  { %v5014_v4 = vpop.eup %5013  ;;  %v2296_v62 = vmul.f32 %v2171_v20, %v6834_v61  ;;  %v1801_v2 = vmul.f32 0.7978846, %v1676_v58  ;;  %v1303_v33 = vmul.f32 %v6963_v22, %v6963_v22  ;;  %4692 = vmatprep.mubr.msk.f32.mxu1 %vm5121_vm0, %v5120_v0  ;;  %v4547_v28 = vpop.f32.mrf.mxu1 }
 0x212   :  { %v2047_v32 = vadd.f32 1.0, %v5014_v4  ;;  %v1552_v30 = vmul.f32 0.044715, %v1427_v57  ;;  %v1008_v10 = vpop.f32.mrf.mxu0  ;;  %3453 = vst.msk [vmem:[%s8011_s5 + $0xc8] sm:$0xff] %vm156_vm1, %v2930_v21 }
 0x213   :  { %5021 = vtanh.f32 %v1801_v2  ;;  %v1428_v26 = vmul.f32 %v1303_v33, %v6963_v22  ;;  %v6983_v61 = vadd.f32 %v6516_v15, %v1008_v10  ;;  %v2934_v39 = vpop.f32.mrf.mxu1 }
 0x214   :  { %v5016_v29 = vpop.eup %5015  ;;  %v2172_v7 = vmul.f32 0.5, %v2047_v32  ;;  %v1677_v35 = vadd.f32 %v1552_v30, %v6952_v50  ;;  %4693 = vmatmul.mubr.msk.f32.gmra.mxu1 %vm2362_vm2, %v2296_v62  ;;  %v4327_v42 = vpop.f32.mrf.mxu0  ;;  %v2935_v47 = vadd.f32 %v6942_v51, %v2934_v39 }
 0x215   :  { %v2048_v23 = vadd.f32 1.0, %v5016_v29  ;;  %v1553_v37 = vmul.f32 0.044715, %v1428_v26  ;;  %v1304_v13 = vmul.f32 %v6983_v61, %v6983_v61  ;;  %4695 = vmatprep.mubr.msk.f32.mxu1 %vm5121_vm0, %v5120_v0  ;;  %v4550_v40 = vpop.f32.mrf.mxu1 }
 0x216   :  { %v2297_v38 = vmul.f32 %v2172_v7, %v6857_v56  ;;  %v1802_v18 = vmul.f32 0.7978846, %v1677_v35  ;;  %v1013_v44 = vpop.f32.mrf.mxu0  ;;  %3454 = vst.msk [vmem:[%s8011_s5 + $0xd0] sm:$0xff] %vm156_vm1, %v2935_v47 }
 0x217   :  { %v2173_v8 = vmul.f32 0.5, %v2048_v23  ;;  %v1678_v43 = vadd.f32 %v1553_v37, %v6963_v22  ;;  %v1429_v19 = vmul.f32 %v1304_v13, %v6983_v61  ;;  %v7000_v52 = vadd.f32 %v6516_v15, %v1013_v44  ;;  %v2939_v24 = vpop.f32.mrf.mxu1 }
 0x218   :  { %v5018_v46 = vpop.eup %5017  ;;  %5023 = vtanh.f32 %v1802_v18  ;;  %4696 = vmatmul.mubr.msk.f32.gmra.mxu1 %vm2362_vm2, %v2297_v38  ;;  %v4330_v56 = vpop.f32.mrf.mxu0  ;;  %v2940_v15 = vadd.f32 %v6942_v51, %v2939_v24 }
 0x219   :  { %v2298_v48 = vmul.f32 %v2173_v8, %v6874_v34  ;;  %v2049_v3 = vadd.f32 1.0, %v5018_v46  ;;  %v1803_v31 = vmul.f32 0.7978846, %v1678_v43  ;;  %v1554_v53 = vmul.f32 0.044715, %v1429_v19  ;;  %4698 = vmatprep.mubr.msk.f32.mxu1 %vm5121_vm0, %v5120_v0  ;;  %v4553_v1 = vpop.f32.mrf.mxu1 }
 0x21a   :  { %v1305_v60 = vmul.f32 %v7000_v52, %v7000_v52  ;;  %v1018_v27 = vpop.f32.mrf.mxu0  ;;  %v7013_v34 = vld [vmem:[%s8009_s2] ss:$0 sm:$0xff]  ;;  %3455 = vst.msk [vmem:[%s8011_s5 + $0xd8] sm:$0xff] %vm156_vm1, %v2940_v15 }
 0x21b   :  { %v2174_v41 = vmul.f32 0.5, %v2049_v3  ;;  %5025 = vtanh.f32 %v1803_v31  ;;  %v1679_v54 = vadd.f32 %v1554_v53, %v6983_v61  ;;  %v7016_v6 = vadd.f32 %v7013_v34, %v1018_v27  ;;  %v2944_v36 = vpop.f32.mrf.mxu1 }
 0x21c   :  { %v5020_v59 = vpop.eup %5019  ;;  %v1430_v9 = vmul.f32 %v1305_v60, %v7000_v52  ;;  %4699 = vmatmul.mubr.msk.f32.gmra.mxu1 %vm2362_vm2, %v2298_v48  ;;  %v4333_v63 = vpop.f32.mrf.mxu0  ;;  %v2945_v20 = vadd.f32 %v6942_v51, %v2944_v36 }
 0x21d   :  { %v2299_v12 = vmul.f32 %v2174_v41, %v6894_v55  ;;  %v2050_v49 = vadd.f32 1.0, %v5020_v59  ;;  %v1804_v14 = vmul.f32 0.7978846, %v1679_v54  ;;  %v1306_v17 = vmul.f32 %v7016_v6, %v7016_v6  ;;  %4701 = vmatprep.mubr.msk.f32.mxu1 %vm5121_vm0, %v5120_v0  ;;  %v4556_v58 = vpop.f32.mrf.mxu1 }
 0x21e   :  { %v1555_v11 = vmul.f32 0.044715, %v1430_v9  ;;  %v1023_v57 = vpop.f32.mrf.mxu0  ;;  %3456 = vst.msk [vmem:[%s8011_s5 + $0xe0] sm:$0xff] %vm156_vm1, %v2945_v20 }
 0x21f   :  { %v2175_v16 = vmul.f32 0.5, %v2050_v49  ;;  %5027 = vtanh.f32 %v1804_v14  ;;  %v1431_v25 = vmul.f32 %v1306_v17, %v7016_v6  ;;  %v7032_v4 = vadd.f32 %v7013_v34, %v1023_v57  ;;  %v2949_v2 = vpop.f32.mrf.mxu1 }
 0x220   :  { %v5022_v55 = vpop.eup %5021  ;;  %v1680_v62 = vadd.f32 %v1555_v11, %v7000_v52  ;;  %4702 = vmatmul.mubr.msk.f32.gmra.mxu1 %vm2362_vm2, %v2299_v12  ;;  %v4336_v33 = vpop.f32.mrf.mxu0  ;;  %v2950_v26 = vadd.f32 %v6942_v51, %v2949_v2 }
 0x221   :  { %v2300_v21 = vmul.f32 %v2175_v16, %v6911_v5  ;;  %v2051_v32 = vadd.f32 1.0, %v5022_v55  ;;  %v1556_v30 = vmul.f32 0.044715, %v1431_v25  ;;  %v1307_v28 = vmul.f32 %v7032_v4, %v7032_v4  ;;  %4704 = vmatprep.mubr.msk.f32.mxu1 %vm5121_vm0, %v5120_v0  ;;  %v4559_v29 = vpop.f32.mrf.mxu1 }
 0x222   :  { %v1805_v10 = vmul.f32 0.7978846, %v1680_v62  ;;  %v1028_v7 = vpop.f32.mrf.mxu0  ;;  %3457 = vst.msk [vmem:[%s8011_s5 + $0xe8] sm:$0xff] %vm156_vm1, %v2950_v26 }
 0x223   :  { %v2176_v35 = vmul.f32 0.5, %v2051_v32  ;;  %v1681_v39 = vadd.f32 %v1556_v30, %v7016_v6  ;;  %v1432_v42 = vmul.f32 %v1307_v28, %v7032_v4  ;;  %v7049_v5 = vadd.f32 %v7013_v34, %v1028_v7  ;;  %v2954_v23 = vpop.f32.mrf.mxu1 }
 0x224   :  { %5029 = vtanh.f32 %v1805_v10  ;;  %4705 = vmatmul.mubr.msk.f32.gmra.mxu1 %vm2362_vm2, %v2300_v21  ;;  %v4339_v37 = vpop.f32.mrf.mxu0  ;;  %v2955_v8 = vadd.f32 %v6942_v51, %v2954_v23 }
 0x225   :  { %v5024_v13 = vpop.eup %5023  ;;  %v2301_v47 = vmul.f32 %v2176_v35, %v6927_v45  ;;  %v1806_v38 = vmul.f32 0.7978846, %v1681_v39  ;;  %v1557_v18 = vmul.f32 0.044715, %v1432_v42  ;;  %v1308_v40 = vmul.f32 %v7049_v5, %v7049_v5  ;;  %4707 = vmatprep.mubr.msk.f32.mxu1 %vm5121_vm0, %v5120_v0  ;;  %v4562_v43 = vpop.f32.mrf.mxu1 }
 0x226   :  { %v2052_v44 = vadd.f32 1.0, %v5024_v13  ;;  %v1033_v19 = vpop.f32.mrf.mxu0  ;;  %3458 = vst.msk [vmem:[%s8011_s5 + $0xf0] sm:$0xff] %vm156_vm1, %v2955_v8 }
 0x227   :  { %5031 = vtanh.f32 %v1806_v38  ;;  %v1682_v46 = vadd.f32 %v1557_v18, %v7032_v4  ;;  %v1433_v24 = vmul.f32 %v1308_v40, %v7049_v5  ;;  %v7065_v45 = vadd.f32 %v7013_v34, %v1033_v19  ;;  %v2959_v3 = vpop.f32.mrf.mxu1 }
 0x228   :  { %v5026_v56 = vpop.eup %5025  ;;  %v2177_v48 = vmul.f32 0.5, %v2052_v44  ;;  %4708 = vmatmul.mubr.msk.f32.gmra.mxu1 %vm2362_vm2, %v2301_v47  ;;  %v4342_v31 = vpop.f32.mrf.mxu0  ;;  %v2960_v41 = vadd.f32 %v6942_v51, %v2959_v3 }
 0x229   :  { %v2053_v53 = vadd.f32 1.0, %v5026_v56  ;;  %v1807_v60 = vmul.f32 0.7978846, %v1682_v46  ;;  %v1558_v15 = vmul.f32 0.044715, %v1433_v24  ;;  %v1309_v1 = vmul.f32 %v7065_v45, %v7065_v45  ;;  %4710 = vmatprep.mubr.msk.f32.mxu1 %vm5121_vm0, %v5120_v0  ;;  %v4565_v54 = vpop.f32.mrf.mxu1 }
 0x22a   :  { %v2302_v27 = vmul.f32 %v2177_v48, %v6952_v50  ;;  %v1038_v59 = vpop.f32.mrf.mxu0  ;;  %3459 = vst.msk [vmem:[%s8011_s5 + $0xf8] sm:$0xff] %vm156_vm1, %v2960_v41 }
 0x22b   :  { %v2178_v9 = vmul.f32 0.5, %v2053_v53  ;;  %5033 = vtanh.f32 %v1807_v60  ;;  %v1683_v36 = vadd.f32 %v1558_v15, %v7049_v5  ;;  %v1434_v63 = vmul.f32 %v1309_v1, %v7065_v45  ;;  %v2964_v50 = vpop.f32.mrf.mxu1 }
 0x22c   :  { %v5028_v12 = vpop.eup %5027  ;;  %v7085_v49 = vadd.f32 %v7013_v34, %v1038_v59  ;;  %4711 = vmatmul.mubr.msk.f32.gmra.mxu1 %vm2362_vm2, %v2302_v27  ;;  %v4345_v14 = vpop.f32.mrf.mxu0  ;;  %v2965_v16 = vadd.f32 %v6942_v51, %v2964_v50 }
 0x22d   :  { %v2303_v17 = vmul.f32 %v2178_v9, %v6963_v22  ;;  %v2054_v11 = vadd.f32 1.0, %v5028_v12  ;;  %v1808_v20 = vmul.f32 0.7978846, %v1683_v36  ;;  %v1559_v58 = vmul.f32 0.044715, %v1434_v63  ;;  %4713 = vmatprep.mubr.msk.f32.mxu1 %vm5121_vm0, %v5120_v0  ;;  %v4568_v25 = vpop.f32.mrf.mxu1 }
 0x22e   :  { %v1310_v57 = vmul.f32 %v7085_v49, %v7085_v49  ;;  %v1043_v55 = vpop.f32.mrf.mxu0  ;;  %3460 = vst.msk [vmem:[%s8011_s5 + $0x100] sm:$0xff] %vm156_vm1, %v2965_v16 }
 0x22f   :  { %v2179_v62 = vmul.f32 0.5, %v2054_v11  ;;  %5035 = vtanh.f32 %v1808_v20  ;;  %v1684_v2 = vadd.f32 %v1559_v58, %v7065_v45  ;;  %v7096_v33 = vadd.f32 %v7013_v34, %v1043_v55  ;;  %v2969_v21 = vpop.f32.mrf.mxu1 }
 0x230   :  { %v1435_v22 = vmul.f32 %v1310_v57, %v7085_v49  ;;  %4714 = vmatmul.mubr.msk.f32.gmra.mxu1 %vm2362_vm2, %v2303_v17  ;;  %v4348_v32 = vpop.f32.mrf.mxu0  ;;  %v2970_v29 = vadd.f32 %v6942_v51, %v2969_v21 }
 0x231   :  { %v5030_v30 = vpop.eup %5029  ;;  %v2304_v28 = vmul.f32 %v2179_v62, %v6983_v61  ;;  %v1809_v10 = vmul.f32 0.7978846, %v1684_v2  ;;  %v1311_v26 = vmul.f32 %v7096_v33, %v7096_v33  ;;  %4716 = vmatprep.mubr.msk.f32.mxu1 %vm5121_vm0, %v5120_v0  ;;  %v4571_v39 = vpop.f32.mrf.mxu1 }
 0x232   :  { %v2055_v7 = vadd.f32 1.0, %v5030_v30  ;;  %v1560_v35 = vmul.f32 0.044715, %v1435_v22  ;;  %v1048_v42 = vpop.f32.mrf.mxu0  ;;  %3461 = vst.msk [vmem:[%s8011_s5 + $0x108] sm:$0xff] %vm156_vm1, %v2970_v29 }
 0x233   :  { %5037 = vtanh.f32 %v1809_v10  ;;  %v1436_v23 = vmul.f32 %v1311_v26, %v7096_v33  ;;  %v7116_v61 = vadd.f32 %v7013_v34, %v1048_v42  ;;  %v2974_v38 = vpop.f32.mrf.mxu1 }
 0x234   :  { %v5032_v37 = vpop.eup %5031  ;;  %v2180_v13 = vmul.f32 0.5, %v2055_v7  ;;  %v1685_v47 = vadd.f32 %v1560_v35, %v7085_v49  ;;  %4717 = vmatmul.mubr.msk.f32.gmra.mxu1 %vm2362_vm2, %v2304_v28  ;;  %v4351_v18 = vpop.f32.mrf.mxu0  ;;  %v2975_v43 = vadd.f32 %v6942_v51, %v2974_v38 }
 0x235   :  { %v2056_v40 = vadd.f32 1.0, %v5032_v37  ;;  %v1561_v44 = vmul.f32 0.044715, %v1436_v23  ;;  %v1312_v8 = vmul.f32 %v7116_v61, %v7116_v61  ;;  %4719 = vmatprep.mubr.msk.f32.mxu1 %vm5121_vm0, %v5120_v0  ;;  %v4574_v24 = vpop.f32.mrf.mxu1 }
 0x236   :  { %v2305_v19 = vmul.f32 %v2180_v13, %v7000_v52  ;;  %v1810_v46 = vmul.f32 0.7978846, %v1685_v47  ;;  %v1053_v56 = vpop.f32.mrf.mxu0  ;;  %3462 = vst.msk [vmem:[%s8011_s5 + $0x110] sm:$0xff] %vm156_vm1, %v2975_v43 }
 0x237   :  { %v2181_v48 = vmul.f32 0.5, %v2056_v40  ;;  %v1686_v3 = vadd.f32 %v1561_v44, %v7096_v33  ;;  %v1437_v31 = vmul.f32 %v1312_v8, %v7116_v61  ;;  %v7133_v53 = vadd.f32 %v7013_v34, %v1053_v56  ;;  %v2979_v15 = vpop.f32.mrf.mxu1 }
 0x238   :  { %v5034_v60 = vpop.eup %5033  ;;  %5039 = vtanh.f32 %v1810_v46  ;;  %4720 = vmatmul.mubr.msk.f32.gmra.mxu1 %vm2362_vm2, %v2305_v19  ;;  %v4354_v52 = vpop.f32.mrf.mxu0  ;;  %v2980_v9 = vadd.f32 %v6942_v51, %v2979_v15 }
 0x239   :  { %v2306_v1 = vmul.f32 %v2181_v48, %v7016_v6  ;;  %v2057_v27 = vadd.f32 1.0, %v5034_v60  ;;  %v1811_v41 = vmul.f32 0.7978846, %v1686_v3  ;;  %v1562_v54 = vmul.f32 0.044715, %v1437_v31  ;;  %4722 = vmatprep.mubr.msk.f32.mxu1 %vm5121_vm0, %v5120_v0  ;;  %v4577_v36 = vpop.f32.mrf.mxu1 }
 0x23a   :  { %v1313_v59 = vmul.f32 %v7133_v53, %v7133_v53  ;;  %v1058_v63 = vpop.f32.mrf.mxu0  ;;  %3463 = vst.msk [vmem:[%s8011_s5 + $0x118] sm:$0xff] %vm156_vm1, %v2980_v9 }
 0x23b   :  { %v2182_v12 = vmul.f32 0.5, %v2057_v27  ;;  %5041 = vtanh.f32 %v1811_v41  ;;  %v1687_v50 = vadd.f32 %v1562_v54, %v7116_v61  ;;  %v7144_v14 = vadd.f32 %v7013_v34, %v1058_v63  ;;  %v2984_v11 = vpop.f32.mrf.mxu1 }
 0x23c   :  { %v5036_v6 = vpop.eup %5035  ;;  %v1438_v17 = vmul.f32 %v1313_v59, %v7133_v53  ;;  %4723 = vmatmul.mubr.msk.f32.gmra.mxu1 %vm2362_vm2, %v2306_v1  ;;  %v4357_v20 = vpop.f32.mrf.mxu0  ;;  %v2985_v62 = vadd.f32 %v6942_v51, %v2984_v11 }
 0x23d   :  { %v2307_v58 = vmul.f32 %v2182_v12, %v7032_v4  ;;  %v2058_v57 = vadd.f32 1.0, %v5036_v6  ;;  %v1812_v16 = vmul.f32 0.7978846, %v1687_v50  ;;  %v1314_v25 = vmul.f32 %v7144_v14, %v7144_v14  ;;  %4725 = vmatprep.mubr.msk.f32.mxu1 %vm5121_vm0, %v5120_v0  ;;  %v4580_v2 = vpop.f32.mrf.mxu1 }
 0x23e   :  { %v1563_v55 = vmul.f32 0.044715, %v1438_v17  ;;  %v1063_v22 = vpop.f32.mrf.mxu0  ;;  %3464 = vst.msk [vmem:[%s8011_s5 + $0x120] sm:$0xff] %vm156_vm1, %v2985_v62 }
 0x23f   :  { %v2183_v21 = vmul.f32 0.5, %v2058_v57  ;;  %5043 = vtanh.f32 %v1812_v16  ;;  %v1439_v32 = vmul.f32 %v1314_v25, %v7144_v14  ;;  %v7160_v30 = vadd.f32 %v7013_v34, %v1063_v22  ;;  %v2989_v10 = vpop.f32.mrf.mxu1 }
 0x240   :  { %v5038_v4 = vpop.eup %5037  ;;  %v1688_v28 = vadd.f32 %v1563_v55, %v7133_v53  ;;  %4726 = vmatmul.mubr.msk.f32.gmra.mxu1 %vm2362_vm2, %v2307_v58  ;;  %v4360_v26 = vpop.f32.mrf.mxu0  ;;  %v2990_v23 = vadd.f32 %v6942_v51, %v2989_v10 }
 0x241   :  { %v2308_v29 = vmul.f32 %v2183_v21, %v7049_v5  ;;  %v2059_v7 = vadd.f32 1.0, %v5038_v4  ;;  %v1564_v35 = vmul.f32 0.044715, %v1439_v32  ;;  %v1315_v39 = vmul.f32 %v7160_v30, %v7160_v30  ;;  %4728 = vmatprep.mubr.msk.f32.mxu1 %vm5121_vm0, %v5120_v0  ;;  %v4583_v37 = vpop.f32.mrf.mxu1 }
 0x242   :  { %v1813_v42 = vmul.f32 0.7978846, %v1688_v28  ;;  %v1068_v13 = vpop.f32.mrf.mxu0  ;;  %3465 = vst.msk [vmem:[%s8011_s5 + $0x128] sm:$0xff] %vm156_vm1, %v2990_v23 }
 0x243   :  { %v2184_v47 = vmul.f32 0.5, %v2059_v7  ;;  %v1689_v38 = vadd.f32 %v1564_v35, %v7144_v14  ;;  %v1440_v18 = vmul.f32 %v1315_v39, %v7160_v30  ;;  %v7177_v5 = vadd.f32 %v7013_v34, %v1068_v13  ;;  %v2994_v40 = vpop.f32.mrf.mxu1 }
 0x244   :  { %5045 = vtanh.f32 %v1813_v42  ;;  %4729 = vmatmul.mubr.msk.f32.gmra.mxu1 %vm2362_vm2, %v2308_v29  ;;  %v4363_v44 = vpop.f32.mrf.mxu0  ;;  %v2995_v48 = vadd.f32 %v6942_v51, %v2994_v40 }
 0x245   :  { %v5040_v8 = vpop.eup %5039  ;;  %v2309_v43 = vmul.f32 %v2184_v47, %v7065_v45  ;;  %v1814_v19 = vmul.f32 0.7978846, %v1689_v38  ;;  %v1565_v46 = vmul.f32 0.044715, %v1440_v18  ;;  %v1316_v24 = vmul.f32 %v7177_v5, %v7177_v5  ;;  %4731 = vmatprep.mubr.msk.f32.mxu1 %vm5121_vm0, %v5120_v0  ;;  %v4586_v3 = vpop.f32.mrf.mxu1 }
 0x246   :  { %v2060_v56 = vadd.f32 1.0, %v5040_v8  ;;  %v1073_v31 = vpop.f32.mrf.mxu0  ;;  %3466 = vst.msk [vmem:[%s8011_s5 + $0x130] sm:$0xff] %vm156_vm1, %v2995_v48 }
 0x247   :  { %5047 = vtanh.f32 %v1814_v19  ;;  %v1690_v60 = vadd.f32 %v1565_v46, %v7160_v30  ;;  %v1441_v15 = vmul.f32 %v1316_v24, %v7177_v5  ;;  %v7193_v45 = vadd.f32 %v7013_v34, %v1073_v31  ;;  %v2999_v27 = vpop.f32.mrf.mxu1 }
 0x248   :  { %v5042_v52 = vpop.eup %5041  ;;  %v2185_v1 = vmul.f32 0.5, %v2060_v56  ;;  %4732 = vmatmul.mubr.msk.f32.gmra.mxu1 %vm2362_vm2, %v2309_v43  ;;  %v4366_v41 = vpop.f32.mrf.mxu0  ;;  %v3000_v12 = vadd.f32 %v6942_v51, %v2999_v27 }
 0x249   :  { %v2061_v54 = vadd.f32 1.0, %v5042_v52  ;;  %v1815_v59 = vmul.f32 0.7978846, %v1690_v60  ;;  %v1566_v9 = vmul.f32 0.044715, %v1441_v15  ;;  %v1317_v36 = vmul.f32 %v7193_v45, %v7193_v45  ;;  %4734 = vmatprep.mubr.msk.f32.mxu1 %vm5121_vm0, %v5120_v0  ;;  %v4589_v50 = vpop.f32.mrf.mxu1 }
 0x24a   :  { %v2310_v63 = vmul.f32 %v2185_v1, %v7085_v49  ;;  %v1078_v6 = vpop.f32.mrf.mxu0  ;;  %3467 = vst.msk [vmem:[%s8011_s5 + $0x138] sm:$0xff] %vm156_vm1, %v3000_v12 }
 0x24b   :  { %v2186_v17 = vmul.f32 0.5, %v2061_v54  ;;  %5049 = vtanh.f32 %v1815_v59  ;;  %v1691_v11 = vadd.f32 %v1566_v9, %v7177_v5  ;;  %v1442_v20 = vmul.f32 %v1317_v36, %v7193_v45  ;;  %v3004_v49 = vpop.f32.mrf.mxu1 }
 0x24c   :  { %v5044_v58 = vpop.eup %5043  ;;  %v7213_v57 = vadd.f32 %v7013_v34, %v1078_v6  ;;  %4735 = vmatmul.mubr.msk.f32.gmra.mxu1 %vm2362_vm2, %v2310_v63  ;;  %v4369_v16 = vpop.f32.mrf.mxu0  ;;  %v3005_v21 = vadd.f32 %v6942_v51, %v3004_v49 }
 0x24d   :  { %v2311_v25 = vmul.f32 %v2186_v17, %v7096_v33  ;;  %v2062_v55 = vadd.f32 1.0, %v5044_v58  ;;  %v1816_v62 = vmul.f32 0.7978846, %v1691_v11  ;;  %v1567_v2 = vmul.f32 0.044715, %v1442_v20  ;;  %4737 = vmatprep.mubr.msk.f32.mxu1 %vm5121_vm0, %v5120_v0  ;;  %v4592_v32 = vpop.f32.mrf.mxu1 }
 0x24e   :  { %v1318_v22 = vmul.f32 %v7213_v57, %v7213_v57  ;;  %v1083_v4 = vpop.f32.mrf.mxu0  ;;  %3468 = vst.msk [vmem:[%s8011_s5 + $0x140] sm:$0xff] %vm156_vm1, %v3005_v21 }
 0x24f   :  { %v2187_v28 = vmul.f32 0.5, %v2062_v55  ;;  %5051 = vtanh.f32 %v1816_v62  ;;  %v1692_v10 = vadd.f32 %v1567_v2, %v7193_v45  ;;  %v7224_v26 = vadd.f32 %v7013_v34, %v1083_v4  ;;  %v3009_v29 = vpop.f32.mrf.mxu1 }
 0x250   :  { %v1443_v33 = vmul.f32 %v1318_v22, %v7213_v57  ;;  %4738 = vmatmul.mubr.msk.f32.gmra.mxu1 %vm2362_vm2, %v2311_v25  ;;  %v4372_v7 = vpop.f32.mrf.mxu0  ;;  %v3010_v37 = vadd.f32 %v6942_v51, %v3009_v29 }
 0x251   :  { %v5046_v35 = vpop.eup %5045  ;;  %v2312_v39 = vmul.f32 %v2187_v28, %v7116_v61  ;;  %v1817_v42 = vmul.f32 0.7978846, %v1692_v10  ;;  %v1319_v23 = vmul.f32 %v7224_v26, %v7224_v26  ;;  %4740 = vmatprep.mubr.msk.f32.mxu1 %vm5121_vm0, %v5120_v0  ;;  %v4595_v38 = vpop.f32.mrf.mxu1 }
 0x252   :  { %v2063_v13 = vadd.f32 1.0, %v5046_v35  ;;  %v1568_v47 = vmul.f32 0.044715, %v1443_v33  ;;  %v1088_v18 = vpop.f32.mrf.mxu0  ;;  %3469 = vst.msk [vmem:[%s8011_s5 + $0x148] sm:$0xff] %vm156_vm1, %v3010_v37 }
 0x253   :  { %5053 = vtanh.f32 %v1817_v42  ;;  %v1444_v40 = vmul.f32 %v1319_v23, %v7224_v26  ;;  %v7244_v61 = vadd.f32 %v7013_v34, %v1088_v18  ;;  %v3014_v19 = vpop.f32.mrf.mxu1 }
 0x254   :  { %v5048_v44 = vpop.eup %5047  ;;  %v2188_v8 = vmul.f32 0.5, %v2063_v13  ;;  %v1693_v43 = vadd.f32 %v1568_v47, %v7213_v57  ;;  %4741 = vmatmul.mubr.msk.f32.gmra.mxu1 %vm2362_vm2, %v2312_v39  ;;  %v4375_v46 = vpop.f32.mrf.mxu0  ;;  %v3015_v3 = vadd.f32 %v6942_v51, %v3014_v19 }
 0x255   :  { %v2064_v24 = vadd.f32 1.0, %v5048_v44  ;;  %v1569_v56 = vmul.f32 0.044715, %v1444_v40  ;;  %v1320_v48 = vmul.f32 %v7244_v61, %v7244_v61  ;;  %4743 = vmatprep.mubr.msk.f32.mxu1 %vm5121_vm0, %v5120_v0  ;;  %v4598_v15 = vpop.f32.mrf.mxu1 }
 0x256   :  { %v2313_v31 = vmul.f32 %v2188_v8, %v7133_v53  ;;  %v1818_v60 = vmul.f32 0.7978846, %v1693_v43  ;;  %v1093_v52 = vpop.f32.mrf.mxu0  ;;  %3470 = vst.msk [vmem:[%s8011_s5 + $0x150] sm:$0xff] %vm156_vm1, %v3015_v3 }
 0x257   :  { %v2189_v1 = vmul.f32 0.5, %v2064_v24  ;;  %v1694_v27 = vadd.f32 %v1569_v56, %v7224_v26  ;;  %v1445_v41 = vmul.f32 %v1320_v48, %v7244_v61  ;;  %v7261_v54 = vadd.f32 %v7013_v34, %v1093_v52  ;;  %v3019_v9 = vpop.f32.mrf.mxu1 }
 0x258   :  { %v5050_v59 = vpop.eup %5049  ;;  %5055 = vtanh.f32 %v1818_v60  ;;  %4744 = vmatmul.mubr.msk.f32.gmra.mxu1 %vm2362_vm2, %v2313_v31  ;;  %v4378_v53 = vpop.f32.mrf.mxu0  ;;  %v3020_v17 = vadd.f32 %v6942_v51, %v3019_v9 }
 0x259   :  { %v2314_v36 = vmul.f32 %v2189_v1, %v7144_v14  ;;  %v2065_v63 = vadd.f32 1.0, %v5050_v59  ;;  %v1819_v12 = vmul.f32 0.7978846, %v1694_v27  ;;  %v1570_v50 = vmul.f32 0.044715, %v1445_v41  ;;  %4746 = vmatprep.mubr.msk.f32.mxu1 %vm5121_vm0, %v5120_v0  ;;  %v4601_v11 = vpop.f32.mrf.mxu1 }
 0x25a   :  { %v1321_v6 = vmul.f32 %v7261_v54, %v7261_v54  ;;  %v1098_v20 = vpop.f32.mrf.mxu0  ;;  %3471 = vst.msk [vmem:[%s8011_s5 + $0x158] sm:$0xff] %vm156_vm1, %v3020_v17 }
 0x25b   :  { %v2190_v58 = vmul.f32 0.5, %v2065_v63  ;;  %5057 = vtanh.f32 %v1819_v12  ;;  %v1695_v49 = vadd.f32 %v1570_v50, %v7244_v61  ;;  %v7272_v16 = vadd.f32 %v7013_v34, %v1098_v20  ;;  %v3024_v55 = vpop.f32.mrf.mxu1 }
 0x25c   :  { %v5052_v14 = vpop.eup %5051  ;;  %v1446_v25 = vmul.f32 %v1321_v6, %v7261_v54  ;;  %4747 = vmatmul.mubr.msk.f32.gmra.mxu1 %vm2362_vm2, %v2314_v36  ;;  %v4381_v62 = vpop.f32.mrf.mxu0  ;;  %v3025_v28 = vadd.f32 %v6942_v51, %v3024_v55 }
 0x25d   :  { %v2315_v2 = vmul.f32 %v2190_v58, %v7160_v30  ;;  %v2066_v22 = vadd.f32 1.0, %v5052_v14  ;;  %v1820_v21 = vmul.f32 0.7978846, %v1695_v49  ;;  %v1322_v32 = vmul.f32 %v7272_v16, %v7272_v16  ;;  %4749 = vmatprep.mubr.msk.f32.mxu1 %vm5121_vm0, %v5120_v0  ;;  %v4604_v10 = vpop.f32.mrf.mxu1 }
 0x25e   :  { %v1571_v4 = vmul.f32 0.044715, %v1446_v25  ;;  %v1103_v33 = vpop.f32.mrf.mxu0  ;;  %3472 = vst.msk [vmem:[%s8011_s5 + $0x160] sm:$0xff] %vm156_vm1, %v3025_v28 }
 0x25f   :  { %v2191_v29 = vmul.f32 0.5, %v2066_v22  ;;  %5059 = vtanh.f32 %v1820_v21  ;;  %v1447_v7 = vmul.f32 %v1322_v32, %v7272_v16  ;;  %v7288_v35 = vadd.f32 %v7013_v34, %v1103_v33  ;;  %v3029_v42 = vpop.f32.mrf.mxu1 }
 0x260   :  { %v5054_v30 = vpop.eup %5053  ;;  %v1696_v39 = vadd.f32 %v1571_v4, %v7261_v54  ;;  %4750 = vmatmul.mubr.msk.f32.gmra.mxu1 %vm2362_vm2, %v2315_v2  ;;  %v4384_v23 = vpop.f32.mrf.mxu0  ;;  %v3030_v40 = vadd.f32 %v6942_v51, %v3029_v42 }
 0x261   :  { %v2316_v37 = vmul.f32 %v2191_v29, %v7177_v5  ;;  %v2067_v13 = vadd.f32 1.0, %v5054_v30  ;;  %v1572_v47 = vmul.f32 0.044715, %v1447_v7  ;;  %v1323_v38 = vmul.f32 %v7288_v35, %v7288_v35  ;;  %4752 = vmatprep.mubr.msk.f32.mxu1 %vm5121_vm0, %v5120_v0  ;;  %v4607_v44 = vpop.f32.mrf.mxu1 }
 0x262   :  { %v1821_v18 = vmul.f32 0.7978846, %v1696_v39  ;;  %v1108_v8 = vpop.f32.mrf.mxu0  ;;  %3473 = vst.msk [vmem:[%s8011_s5 + $0x168] sm:$0xff] %vm156_vm1, %v3030_v40 }
 0x263   :  { %v2192_v43 = vmul.f32 0.5, %v2067_v13  ;;  %v1697_v19 = vadd.f32 %v1572_v47, %v7272_v16  ;;  %v1448_v46 = vmul.f32 %v1323_v38, %v7288_v35  ;;  %v7305_v5 = vadd.f32 %v7013_v34, %v1108_v8  ;;  %v3034_v24 = vpop.f32.mrf.mxu1 }
 0x264   :  { %5061 = vtanh.f32 %v1821_v18  ;;  %4753 = vmatmul.mubr.msk.f32.gmra.mxu1 %vm2362_vm2, %v2316_v37  ;;  %v4387_v56 = vpop.f32.mrf.mxu0  ;;  %v3035_v1 = vadd.f32 %v6942_v51, %v3034_v24 }
 0x265   :  { %v5056_v48 = vpop.eup %5055  ;;  %v2317_v3 = vmul.f32 %v2192_v43, %v7193_v45  ;;  %v1822_v31 = vmul.f32 0.7978846, %v1697_v19  ;;  %v1573_v60 = vmul.f32 0.044715, %v1448_v46  ;;  %v1324_v15 = vmul.f32 %v7305_v5, %v7305_v5  ;;  %4755 = vmatprep.mubr.msk.f32.mxu1 %vm5121_vm0, %v5120_v0  ;;  %v4610_v27 = vpop.f32.mrf.mxu1 }
 0x266   :  { %v2068_v52 = vadd.f32 1.0, %v5056_v48  ;;  %v1113_v41 = vpop.f32.mrf.mxu0  ;;  %3474 = vst.msk [vmem:[%s8011_s5 + $0x170] sm:$0xff] %vm156_vm1, %v3035_v1 }
 0x267   :  { %5063 = vtanh.f32 %v1822_v31  ;;  %v1698_v59 = vadd.f32 %v1573_v60, %v7288_v35  ;;  %v1449_v9 = vmul.f32 %v1324_v15, %v7305_v5  ;;  %v7321_v45 = vadd.f32 %v7013_v34, %v1113_v41  ;;  %v3039_v63 = vpop.f32.mrf.mxu1 }
 0x268   :  { %v5058_v53 = vpop.eup %5057  ;;  %v2193_v36 = vmul.f32 0.5, %v2068_v52  ;;  %4756 = vmatmul.mubr.msk.f32.gmra.mxu1 %vm2362_vm2, %v2317_v3  ;;  %v4390_v12 = vpop.f32.mrf.mxu0  ;;  %v3040_v58 = vadd.f32 %v6942_v51, %v3039_v63 }
 0x269   :  { %v2069_v50 = vadd.f32 1.0, %v5058_v53  ;;  %v1823_v6 = vmul.f32 0.7978846, %v1698_v59  ;;  %v1574_v17 = vmul.f32 0.044715, %v1449_v9  ;;  %v1325_v11 = vmul.f32 %v7321_v45, %v7321_v45  ;;  %4758 = vmatprep.mubr.msk.f32.mxu1 %vm5121_vm0, %v5120_v0  ;;  %v4613_v49 = vpop.f32.mrf.mxu1 }
 0x26a   :  { %v2318_v20 = vmul.f32 %v2193_v36, %v7213_v57  ;;  %v1118_v14 = vpop.f32.mrf.mxu0  ;;  %3475 = vst.msk [vmem:[%s8011_s5 + $0x178] sm:$0xff] %vm156_vm1, %v3040_v58 }
 0x26b   :  { %v2194_v25 = vmul.f32 0.5, %v2069_v50  ;;  %5065 = vtanh.f32 %v1823_v6  ;;  %v1699_v55 = vadd.f32 %v1574_v17, %v7305_v5  ;;  %v1450_v62 = vmul.f32 %v1325_v11, %v7321_v45  ;;  %v3044_v57 = vpop.f32.mrf.mxu1 }
 0x26c   :  { %v5060_v2 = vpop.eup %5059  ;;  %v7341_v22 = vadd.f32 %v7013_v34, %v1118_v14  ;;  %4759 = vmatmul.mubr.msk.f32.gmra.mxu1 %vm2362_vm2, %v2318_v20  ;;  %v4393_v21 = vpop.f32.mrf.mxu0  ;;  %v3045_v29 = vadd.f32 %v6942_v51, %v3044_v57  ;;  %v7400_v14 = vld [vmem:[%s8010_s4] ss:$0 sm:$0xff] }
 0x26d   :  { %v2319_v32 = vmul.f32 %v2194_v25, %v7224_v26  ;;  %v2070_v4 = vadd.f32 1.0, %v5060_v2  ;;  %v1824_v28 = vmul.f32 0.7978846, %v1699_v55  ;;  %v1575_v10 = vmul.f32 0.044715, %v1450_v62  ;;  %4761 = vmatprep.mubr.msk.f32.mxu1 %vm5121_vm0, %v5120_v0  ;;  %v4616_v7 = vpop.f32.mrf.mxu1 }
 0x26e   :  { %v1326_v33 = vmul.f32 %v7341_v22, %v7341_v22  ;;  %v1123_v30 = vpop.f32.mrf.mxu0  ;;  %3476 = vst.msk [vmem:[%s8011_s5 + $0x180] sm:$0xff] %vm156_vm1, %v3045_v29 }
 0x26f   :  { %v2195_v39 = vmul.f32 0.5, %v2070_v4  ;;  %5067 = vtanh.f32 %v1824_v28  ;;  %v1700_v42 = vadd.f32 %v1575_v10, %v7321_v45  ;;  %v7352_v23 = vadd.f32 %v7013_v34, %v1123_v30  ;;  %v3049_v37 = vpop.f32.mrf.mxu1 }
 0x270   :  { %v1451_v26 = vmul.f32 %v1326_v33, %v7341_v22  ;;  %4762 = vmatmul.mubr.msk.f32.gmra.mxu1 %vm2362_vm2, %v2319_v32  ;;  %v4396_v13 = vpop.f32.mrf.mxu0  ;;  %v3050_v44 = vadd.f32 %v6942_v51, %v3049_v37 }
 0x271   :  { %v5062_v47 = vpop.eup %5061  ;;  %v2320_v38 = vmul.f32 %v2195_v39, %v7244_v61  ;;  %v1825_v18 = vmul.f32 0.7978846, %v1700_v42  ;;  %v1327_v40 = vmul.f32 %v7352_v23, %v7352_v23  ;;  %4764 = vmatprep.mubr.msk.f32.mxu1 %vm5121_vm0, %v5120_v0  ;;  %v4619_v19 = vpop.f32.mrf.mxu1 }
 0x272   :  { %v2071_v8 = vadd.f32 1.0, %v5062_v47  ;;  %v1576_v43 = vmul.f32 0.044715, %v1451_v26  ;;  %v1128_v46 = vpop.f32.mrf.mxu0  ;;  %3477 = vst.msk [vmem:[%s8011_s5 + $0x188] sm:$0xff] %vm156_vm1, %v3050_v44 }
 0x273   :  { %5069 = vtanh.f32 %v1825_v18  ;;  %v1452_v24 = vmul.f32 %v1327_v40, %v7352_v23  ;;  %v7372_v61 = vadd.f32 %v7013_v34, %v1128_v46  ;;  %v3054_v31 = vpop.f32.mrf.mxu1 }
 0x274   :  { %v5064_v56 = vpop.eup %5063  ;;  %v2196_v48 = vmul.f32 0.5, %v2071_v8  ;;  %v1701_v3 = vadd.f32 %v1576_v43, %v7341_v22  ;;  %4765 = vmatmul.mubr.msk.f32.gmra.mxu1 %vm2362_vm2, %v2320_v38  ;;  %v4399_v60 = vpop.f32.mrf.mxu0  ;;  %v3055_v27 = vadd.f32 %v6942_v51, %v3054_v31 }
 0x275   :  { %v2072_v15 = vadd.f32 1.0, %v5064_v56  ;;  %v1577_v52 = vmul.f32 0.044715, %v1452_v24  ;;  %v1328_v1 = vmul.f32 %v7372_v61, %v7372_v61  ;;  %4767 = vmatprep.mubr.msk.f32.mxu1 %vm5121_vm0, %v5120_v0  ;;  %v4622_v9 = vpop.f32.mrf.mxu1 }
 0x276   :  { %v2321_v41 = vmul.f32 %v2196_v48, %v7261_v54  ;;  %v1826_v59 = vmul.f32 0.7978846, %v1701_v3  ;;  %v1133_v53 = vpop.f32.mrf.mxu0  ;;  %3478 = vst.msk [vmem:[%s8011_s5 + $0x190] sm:$0xff] %vm156_vm1, %v3055_v27 }
 0x277   :  { %v2197_v36 = vmul.f32 0.5, %v2072_v15  ;;  %v1702_v63 = vadd.f32 %v1577_v52, %v7352_v23  ;;  %v1453_v12 = vmul.f32 %v1328_v1, %v7372_v61  ;;  %v7389_v51 = vadd.f32 %v7013_v34, %v1133_v53  ;;  %v3059_v6 = vpop.f32.mrf.mxu1 }
 0x278   :  { %v5066_v50 = vpop.eup %5065  ;;  %5071 = vtanh.f32 %v1826_v59  ;;  %4768 = vmatmul.mubr.msk.f32.gmra.mxu1 %vm2362_vm2, %v2321_v41  ;;  %v4402_v54 = vpop.f32.mrf.mxu0  ;;  %v3060_v25 = vadd.f32 %v7400_v14, %v3059_v6 }
 0x279   :  { %v2322_v17 = vmul.f32 %v2197_v36, %v7272_v16  ;;  %v2073_v11 = vadd.f32 1.0, %v5066_v50  ;;  %v1827_v20 = vmul.f32 0.7978846, %v1702_v63  ;;  %v1578_v58 = vmul.f32 0.044715, %v1453_v12  ;;  %4770 = vmatprep.mubr.msk.f32.mxu1 %vm5121_vm0, %v5120_v0  ;;  %v4625_v55 = vpop.f32.mrf.mxu1 }
 0x27a   :  { %v1329_v49 = vmul.f32 %v7389_v51, %v7389_v51  ;;  %v1138_v62 = vpop.f32.mrf.mxu0  ;;  %3479 = vst.msk [vmem:[%s8011_s5 + $0x198] sm:$0xff] %vm156_vm1, %v3060_v25 }
 0x27b   :  { %v2198_v2 = vmul.f32 0.5, %v2073_v11  ;;  %5073 = vtanh.f32 %v1827_v20  ;;  %v1703_v16 = vadd.f32 %v1578_v58, %v7372_v61  ;;  %v7405_v57 = vadd.f32 %v7013_v34, %v1138_v62  ;;  %v3064_v4 = vpop.f32.mrf.mxu1 }
 0x27c   :  { %v5068_v21 = vpop.eup %5067  ;;  %v1454_v32 = vmul.f32 %v1329_v49, %v7389_v51  ;;  %4771 = vmatmul.mubr.msk.f32.gmra.mxu1 %vm2362_vm2, %v2322_v17  ;;  %v4405_v28 = vpop.f32.mrf.mxu0  ;;  %v3065_v39 = vadd.f32 %v7400_v14, %v3064_v4 }
 0x27d   :  { %v2323_v10 = vmul.f32 %v2198_v2, %v7288_v35  ;;  %v2074_v33 = vadd.f32 1.0, %v5068_v21  ;;  %v1828_v29 = vmul.f32 0.7978846, %v1703_v16  ;;  %v1330_v7 = vmul.f32 %v7405_v57, %v7405_v57  ;;  %4773 = vmatprep.mubr.msk.f32.mxu1 %vm5121_vm0, %v5120_v0  ;;  %v4628_v42 = vpop.f32.mrf.mxu1 }
 0x27e   :  { %v1579_v30 = vmul.f32 0.044715, %v1454_v32  ;;  %v1143_v26 = vpop.f32.mrf.mxu0  ;;  %3480 = vst.msk [vmem:[%s8011_s5 + $0x1a0] sm:$0xff] %vm156_vm1, %v3065_v39 }
 0x27f   :  { %v2199_v37 = vmul.f32 0.5, %v2074_v33  ;;  %5075 = vtanh.f32 %v1828_v29  ;;  %v1455_v13 = vmul.f32 %v1330_v7, %v7405_v57  ;;  %v7421_v47 = vadd.f32 %v7013_v34, %v1143_v26  ;;  %v3069_v18 = vpop.f32.mrf.mxu1 }
 0x280   :  { %v5070_v35 = vpop.eup %5069  ;;  %v1704_v38 = vadd.f32 %v1579_v30, %v7389_v51  ;;  %4774 = vmatmul.mubr.msk.f32.gmra.mxu1 %vm2362_vm2, %v2323_v10  ;;  %v4408_v40 = vpop.f32.mrf.mxu0  ;;  %v3070_v24 = vadd.f32 %v7400_v14, %v3069_v18 }
 0x281   :  { %v2324_v44 = vmul.f32 %v2199_v37, %v7305_v5  ;;  %v2075_v8 = vadd.f32 1.0, %v5070_v35  ;;  %v1580_v43 = vmul.f32 0.044715, %v1455_v13  ;;  %v1331_v19 = vmul.f32 %v7421_v47, %v7421_v47  ;;  %4776 = vmatprep.mubr.msk.f32.mxu1 %vm5121_vm0, %v5120_v0  ;;  %v4631_v56 = vpop.f32.mrf.mxu1 }
 0x282   :  { %v1829_v46 = vmul.f32 0.7978846, %v1704_v38  ;;  %v1148_v48 = vpop.f32.mrf.mxu0  ;;  %3481 = vst.msk [vmem:[%s8011_s5 + $0x1a8] sm:$0xff] %vm156_vm1, %v3070_v24 }
 0x283   :  { %v2200_v3 = vmul.f32 0.5, %v2075_v8  ;;  %v1705_v31 = vadd.f32 %v1580_v43, %v7405_v57  ;;  %v1456_v60 = vmul.f32 %v1331_v19, %v7421_v47  ;;  %v7438_v5 = vadd.f32 %v7013_v34, %v1148_v48  ;;  %v3074_v15 = vpop.f32.mrf.mxu1 }
 0x284   :  { %5077 = vtanh.f32 %v1829_v46  ;;  %4777 = vmatmul.mubr.msk.f32.gmra.mxu1 %vm2362_vm2, %v2324_v44  ;;  %v4411_v52 = vpop.f32.mrf.mxu0  ;;  %v3075_v53 = vadd.f32 %v7400_v14, %v3074_v15 }
 0x285   :  { %v5072_v1 = vpop.eup %5071  ;;  %v2325_v27 = vmul.f32 %v2200_v3, %v7321_v45  ;;  %v1830_v41 = vmul.f32 0.7978846, %v1705_v31  ;;  %v1581_v59 = vmul.f32 0.044715, %v1456_v60  ;;  %v1332_v9 = vmul.f32 %v7438_v5, %v7438_v5  ;;  %4779 = vmatprep.mubr.msk.f32.mxu1 %vm5121_vm0, %v5120_v0  ;;  %v4634_v36 = vpop.f32.mrf.mxu1  ;;  %v7456_v45 = vld [vmem:[%s8009_s2] ss:$0 sm:$0xff] }
 0x286   :  { %v2076_v34 = vadd.f32 1.0, %v5072_v1  ;;  %v1153_v63 = vpop.f32.mrf.mxu0  ;;  %3482 = vst.msk [vmem:[%s8011_s5 + $0x1b0] sm:$0xff] %vm156_vm1, %v3075_v53 }
 0x287   :  { %5079 = vtanh.f32 %v1830_v41  ;;  %v1706_v12 = vadd.f32 %v1581_v59, %v7421_v47  ;;  %v1457_v50 = vmul.f32 %v1332_v9, %v7438_v5  ;;  %v7459_v6 = vadd.f32 %v7456_v45, %v1153_v63  ;;  %v3079_v11 = vpop.f32.mrf.mxu1 }
 0x288   :  { %v5074_v54 = vpop.eup %5073  ;;  %v2201_v17 = vmul.f32 0.5, %v2076_v34  ;;  %4780 = vmatmul.mubr.msk.f32.gmra.mxu1 %vm2362_vm2, %v2325_v27  ;;  %v4414_v20 = vpop.f32.mrf.mxu0  ;;  %v3080_v2 = vadd.f32 %v7400_v14, %v3079_v11 }
 0x289   :  { %v2077_v58 = vadd.f32 1.0, %v5074_v54  ;;  %v1831_v49 = vmul.f32 0.7978846, %v1706_v12  ;;  %v1582_v25 = vmul.f32 0.044715, %v1457_v50  ;;  %v1333_v55 = vmul.f32 %v7459_v6, %v7459_v6  ;;  %4782 = vmatprep.mubr.msk.f32.mxu1 %vm5121_vm0, %v5120_v0  ;;  %v4637_v16 = vpop.f32.mrf.mxu1 }
 0x28a   :  { %v2326_v62 = vmul.f32 %v2201_v17, %v7341_v22  ;;  %v1158_v21 = vpop.f32.mrf.mxu0  ;;  %3483 = vst.msk [vmem:[%s8011_s5 + $0x1b8] sm:$0xff] %vm156_vm1, %v3080_v2 }
 0x28b   :  { %v2202_v32 = vmul.f32 0.5, %v2077_v58  ;;  %5081 = vtanh.f32 %v1831_v49  ;;  %v1707_v4 = vadd.f32 %v1582_v25, %v7438_v5  ;;  %v1458_v28 = vmul.f32 %v1333_v55, %v7459_v6  ;;  %v3084_v22 = vpop.f32.mrf.mxu1 }
 0x28c   :  { %v5076_v10 = vpop.eup %5075  ;;  %v7479_v33 = vadd.f32 %v7456_v45, %v1158_v21  ;;  %4783 = vmatmul.mubr.msk.f32.gmra.mxu1 %vm2362_vm2, %v2326_v62  ;;  %v4417_v29 = vpop.f32.mrf.mxu0  ;;  %v3085_v37 = vadd.f32 %v7400_v14, %v3084_v22 }
 0x28d   :  { %v2327_v7 = vmul.f32 %v2202_v32, %v7352_v23  ;;  %v2078_v30 = vadd.f32 1.0, %v5076_v10  ;;  %v1832_v39 = vmul.f32 0.7978846, %v1707_v4  ;;  %v1583_v42 = vmul.f32 0.044715, %v1458_v28  ;;  %4785 = vmatprep.mubr.msk.f32.mxu1 %vm5121_vm0, %v5120_v0  ;;  %v4640_v13 = vpop.f32.mrf.mxu1 }
 0x28e   :  { %v1334_v26 = vmul.f32 %v7479_v33, %v7479_v33  ;;  %v1163_v35 = vpop.f32.mrf.mxu0  ;;  %3484 = vst.msk [vmem:[%s8011_s5 + $0x1c0] sm:$0xff] %vm156_vm1, %v3085_v37 }
 0x28f   :  { %v2203_v38 = vmul.f32 0.5, %v2078_v30  ;;  %5083 = vtanh.f32 %v1832_v39  ;;  %v1708_v18 = vadd.f32 %v1583_v42, %v7459_v6  ;;  %v7490_v40 = vadd.f32 %v7456_v45, %v1163_v35  ;;  %v3089_v44 = vpop.f32.mrf.mxu1 }
 0x290   :  { %v1459_v23 = vmul.f32 %v1334_v26, %v7479_v33  ;;  %4786 = vmatmul.mubr.msk.f32.gmra.mxu1 %vm2362_vm2, %v2327_v7  ;;  %v4420_v8 = vpop.f32.mrf.mxu0  ;;  %v3090_v56 = vadd.f32 %v7400_v14, %v3089_v44 }
 0x291   :  { %v5078_v43 = vpop.eup %5077  ;;  %v2328_v19 = vmul.f32 %v2203_v38, %v7372_v61  ;;  %v1833_v46 = vmul.f32 0.7978846, %v1708_v18  ;;  %v1335_v24 = vmul.f32 %v7490_v40, %v7490_v40  ;;  %4788 = vmatprep.mubr.msk.f32.mxu1 %vm5121_vm0, %v5120_v0  ;;  %v4643_v31 = vpop.f32.mrf.mxu1 }
 0x292   :  { %v2079_v48 = vadd.f32 1.0, %v5078_v43  ;;  %v1584_v3 = vmul.f32 0.044715, %v1459_v23  ;;  %v1168_v60 = vpop.f32.mrf.mxu0  ;;  %3485 = vst.msk [vmem:[%s8011_s5 + $0x1c8] sm:$0xff] %vm156_vm1, %v3090_v56 }
 0x293   :  { %5085 = vtanh.f32 %v1833_v46  ;;  %v1460_v15 = vmul.f32 %v1335_v24, %v7490_v40  ;;  %v7510_v61 = vadd.f32 %v7456_v45, %v1168_v60  ;;  %v3094_v41 = vpop.f32.mrf.mxu1 }
 0x294   :  { %v5080_v52 = vpop.eup %5079  ;;  %v2204_v1 = vmul.f32 0.5, %v2079_v48  ;;  %v1709_v27 = vadd.f32 %v1584_v3, %v7479_v33  ;;  %4789 = vmatmul.mubr.msk.f32.gmra.mxu1 %vm2362_vm2, %v2328_v19  ;;  %v4423_v59 = vpop.f32.mrf.mxu0  ;;  %v3095_v36 = vadd.f32 %v7400_v14, %v3094_v41 }
 0x295   :  { %v2080_v9 = vadd.f32 1.0, %v5080_v52  ;;  %v1585_v34 = vmul.f32 0.044715, %v1460_v15  ;;  %v1336_v53 = vmul.f32 %v7510_v61, %v7510_v61  ;;  %4791 = vmatprep.mubr.msk.f32.mxu1 %vm5121_vm0, %v5120_v0  ;;  %v4646_v50 = vpop.f32.mrf.mxu1 }
 0x296   :  { %v2329_v63 = vmul.f32 %v2204_v1, %v7389_v51  ;;  %v1834_v12 = vmul.f32 0.7978846, %v1709_v27  ;;  %v1173_v54 = vpop.f32.mrf.mxu0  ;;  %3486 = vst.msk [vmem:[%s8011_s5 + $0x1d0] sm:$0xff] %vm156_vm1, %v3095_v36 }
 0x297   :  { %v2205_v17 = vmul.f32 0.5, %v2080_v9  ;;  %v1710_v11 = vadd.f32 %v1585_v34, %v7490_v40  ;;  %v1461_v20 = vmul.f32 %v1336_v53, %v7510_v61  ;;  %v7527_v58 = vadd.f32 %v7456_v45, %v1173_v54  ;;  %v3099_v25 = vpop.f32.mrf.mxu1 }
 0x298   :  { %v5082_v49 = vpop.eup %5081  ;;  %5087 = vtanh.f32 %v1834_v12  ;;  %4792 = vmatmul.mubr.msk.f32.gmra.mxu1 %vm2362_vm2, %v2329_v63  ;;  %v4426_v51 = vpop.f32.mrf.mxu0  ;;  %v3100_v32 = vadd.f32 %v7400_v14, %v3099_v25 }
 0x299   :  { %v2330_v55 = vmul.f32 %v2205_v17, %v7405_v57  ;;  %v2081_v62 = vadd.f32 1.0, %v5082_v49  ;;  %v1835_v2 = vmul.f32 0.7978846, %v1710_v11  ;;  %v1586_v16 = vmul.f32 0.044715, %v1461_v20  ;;  %4794 = vmatprep.mubr.msk.f32.mxu1 %vm5121_vm0, %v5120_v0  ;;  %v4649_v4 = vpop.f32.mrf.mxu1 }
 0x29a   :  { %v1337_v21 = vmul.f32 %v7527_v58, %v7527_v58  ;;  %v1178_v28 = vpop.f32.mrf.mxu0  ;;  %3487 = vst.msk [vmem:[%s8011_s5 + $0x1d8] sm:$0xff] %vm156_vm1, %v3100_v32 }
 0x29b   :  { %v2206_v10 = vmul.f32 0.5, %v2081_v62  ;;  %5089 = vtanh.f32 %v1835_v2  ;;  %v1711_v22 = vadd.f32 %v1586_v16, %v7510_v61  ;;  %v7538_v29 = vadd.f32 %v7456_v45, %v1178_v28  ;;  %v3104_v30 = vpop.f32.mrf.mxu1 }
 0x29c   :  { %v5084_v57 = vpop.eup %5083  ;;  %v1462_v7 = vmul.f32 %v1337_v21, %v7527_v58  ;;  %4795 = vmatmul.mubr.msk.f32.gmra.mxu1 %vm2362_vm2, %v2330_v55  ;;  %v4429_v39 = vpop.f32.mrf.mxu0  ;;  %v3105_v38 = vadd.f32 %v7400_v14, %v3104_v30 }
 0x29d   :  { %v2331_v42 = vmul.f32 %v2206_v10, %v7421_v47  ;;  %v2082_v26 = vadd.f32 1.0, %v5084_v57  ;;  %v1836_v37 = vmul.f32 0.7978846, %v1711_v22  ;;  %v1338_v13 = vmul.f32 %v7538_v29, %v7538_v29  ;;  %4797 = vmatprep.mubr.msk.f32.mxu1 %vm5121_vm0, %v5120_v0  ;;  %v4652_v18 = vpop.f32.mrf.mxu1 }
 0x29e   :  { %v1587_v35 = vmul.f32 0.044715, %v1462_v7  ;;  %v1183_v23 = vpop.f32.mrf.mxu0  ;;  %3488 = vst.msk [vmem:[%s8011_s5 + $0x1e0] sm:$0xff] %vm156_vm1, %v3105_v38 }
 0x29f   :  { %v2207_v44 = vmul.f32 0.5, %v2082_v26  ;;  %5091 = vtanh.f32 %v1836_v37  ;;  %v1463_v8 = vmul.f32 %v1338_v13, %v7538_v29  ;;  %v7554_v43 = vadd.f32 %v7456_v45, %v1183_v23  ;;  %v3109_v46 = vpop.f32.mrf.mxu1 }
 0x2a0   :  { %v5086_v47 = vpop.eup %5085  ;;  %v1712_v19 = vadd.f32 %v1587_v35, %v7527_v58  ;;  %4798 = vmatmul.mubr.msk.f32.gmra.mxu1 %vm2362_vm2, %v2331_v42  ;;  %v4432_v24 = vpop.f32.mrf.mxu0  ;;  %v3110_v15 = vadd.f32 %v7400_v14, %v3109_v46 }
 0x2a1   :  { %v2332_v56 = vmul.f32 %v2207_v44, %v7438_v5  ;;  %v2083_v48 = vadd.f32 1.0, %v5086_v47  ;;  %v1588_v3 = vmul.f32 0.044715, %v1463_v8  ;;  %v1339_v31 = vmul.f32 %v7554_v43, %v7554_v43  ;;  %4800 = vmatprep.mubr.msk.f32.mxu1 %vm5121_vm0, %v5120_v0  ;;  %v4655_v52 = vpop.f32.mrf.mxu1 }
 0x2a2   :  { %v1837_v60 = vmul.f32 0.7978846, %v1712_v19  ;;  %v1188_v1 = vpop.f32.mrf.mxu0  ;;  %3489 = vst.msk [vmem:[%s8011_s5 + $0x1e8] sm:$0xff] %vm156_vm1, %v3110_v15 }
 0x2a3   :  { %v2208_v27 = vmul.f32 0.5, %v2083_v48  ;;  %v1713_v41 = vadd.f32 %v1588_v3, %v7538_v29  ;;  %v1464_v59 = vmul.f32 %v1339_v31, %v7554_v43  ;;  %v7571_v5 = vadd.f32 %v7456_v45, %v1188_v1  ;;  %v3114_v9 = vpop.f32.mrf.mxu1 }
 0x2a4   :  { %5093 = vtanh.f32 %v1837_v60  ;;  %4801 = vmatmul.mubr.msk.f32.gmra.mxu1 %vm2362_vm2, %v2332_v56  ;;  %v4435_v34 = vpop.f32.mrf.mxu0  ;;  %v3115_v17 = vadd.f32 %v7400_v14, %v3114_v9 }
 0x2a5   :  { %v5088_v53 = vpop.eup %5087  ;;  %v2333_v36 = vmul.f32 %v2208_v27, %v7459_v6  ;;  %v1838_v63 = vmul.f32 0.7978846, %v1713_v41  ;;  %v1589_v12 = vmul.f32 0.044715, %v1464_v59  ;;  %v1340_v50 = vmul.f32 %v7571_v5, %v7571_v5  ;;  %4803 = vmatprep.mubr.msk.f32.mxu1 %vm5121_vm0, %v5120_v0  ;;  %v4658_v11 = vpop.f32.mrf.mxu1 }
 0x2a6   :  { %v2084_v54 = vadd.f32 1.0, %v5088_v53  ;;  %v1193_v20 = vpop.f32.mrf.mxu0  ;;  %3490 = vst.msk [vmem:[%s8011_s5 + $0x1f0] sm:$0xff] %vm156_vm1, %v3115_v17 }
 0x2a7   :  { %5095 = vtanh.f32 %v1838_v63  ;;  %v1714_v49 = vadd.f32 %v1589_v12, %v7554_v43  ;;  %v1465_v25 = vmul.f32 %v1340_v50, %v7571_v5  ;;  %v7587_v6 = vadd.f32 %v7456_v45, %v1193_v20  ;;  %v3119_v62 = vpop.f32.mrf.mxu1 }
 0x2a8   :  { %v5090_v51 = vpop.eup %5089  ;;  %v2209_v55 = vmul.f32 0.5, %v2084_v54  ;;  %4804 = vmatmul.mubr.msk.f32.gmra.mxu1 %vm2362_vm2, %v2333_v36  ;;  %v4438_v2 = vpop.f32.mrf.mxu0  ;;  %v3120_v10 = vadd.f32 %v7400_v14, %v3119_v62 }
 0x2a9   :  { %v2085_v16 = vadd.f32 1.0, %v5090_v51  ;;  %v1839_v21 = vmul.f32 0.7978846, %v1714_v49  ;;  %v1590_v32 = vmul.f32 0.044715, %v1465_v25  ;;  %v1341_v4 = vmul.f32 %v7587_v6, %v7587_v6  ;;  %4806 = vmatprep.mubr.msk.f32.mxu1 %vm5121_vm0, %v5120_v0  ;;  %v4661_v22 = vpop.f32.mrf.mxu1 }
 0x2aa   :  { %v2334_v28 = vmul.f32 %v2209_v55, %v7479_v33  ;;  %v1198_v57 = vpop.f32.mrf.mxu0  ;;  %3491 = vst.msk [vmem:[%s8011_s5 + $0x1f8] sm:$0xff] %vm156_vm1, %v3120_v10 }
 0x2ab   :  { %v2210_v7 = vmul.f32 0.5, %v2085_v16  ;;  %5097 = vtanh.f32 %v1839_v21  ;;  %v1715_v30 = vadd.f32 %v1590_v32, %v7571_v5  ;;  %v1466_v39 = vmul.f32 %v1341_v4, %v7587_v6 }
 0x2ac   :  { %v5092_v42 = vpop.eup %5091  ;;  %v7607_v26 = vadd.f32 %v7456_v45, %v1198_v57  ;;  %v3124_v33 = vpop.f32.mrf.mxu1  ;;  %4807 = vmatmul.mubr.msk.f32.gmra.mxu1 %vm2362_vm2, %v2334_v28 }
 0x2ad   :  { %v4441_v37 = vpop.f32.mrf.mxu0  ;;  %v2335_v13 = vmul.f32 %v2210_v7, %v7490_v40  ;;  %v2086_v35 = vadd.f32 1.0, %v5092_v42  ;;  %v1840_v38 = vmul.f32 0.7978846, %v1715_v30  ;;  %v1591_v18 = vmul.f32 0.044715, %v1466_v39  ;;  %4809 = vmatprep.mubr.msk.f32.mxu1 %vm5121_vm0, %v5120_v0 }
 0x2ae   :  { %v1342_v23 = vmul.f32 %v7607_v26, %v7607_v26  ;;  %v3125_v44 = vadd.f32 %v7400_v14, %v3124_v33  ;;  %v4664_v8 = vpop.f32.mrf.mxu1 }
 0x2af   :  { %v1203_v47 = vpop.f32.mrf.mxu0  ;;  %v2211_v19 = vmul.f32 0.5, %v2086_v35  ;;  %5099 = vtanh.f32 %v1840_v38  ;;  %v1716_v46 = vadd.f32 %v1591_v18, %v7587_v6 }
 0x2b0   :  { %v7618_v24 = vadd.f32 %v7456_v45, %v1203_v47  ;;  %v1467_v40 = vmul.f32 %v1342_v23, %v7607_v26  ;;  %3492 = vst.msk [vmem:[%s8011_s5 + $0x200] sm:$0xff] %vm156_vm1, %v3125_v44  ;;  %v3129_v56 = vpop.f32.mrf.mxu1  ;;  %4810 = vmatmul.mubr.msk.f32.gmra.mxu1 %vm2362_vm2, %v2335_v13 }
 0x2b1   :  { %v4444_v48 = vpop.f32.mrf.mxu0  ;;  %v5094_v3 = vpop.eup %5093  ;;  %v2336_v31 = vmul.f32 %v2211_v19, %v7510_v61  ;;  %v1841_v60 = vmul.f32 0.7978846, %v1716_v46  ;;  %v3130_v52 = vadd.f32 %v7400_v14, %v3129_v56  ;;  %4812 = vmatprep.mubr.msk.f32.mxu1 %vm5121_vm0, %v5120_v0 }
 0x2b2   :  { %v1343_v15 = vmul.f32 %v7618_v24, %v7618_v24  ;;  %v2087_v1 = vadd.f32 1.0, %v5094_v3  ;;  %v1592_v27 = vmul.f32 0.044715, %v1467_v40  ;;  %v4667_v41 = vpop.f32.mrf.mxu1 }
 0x2b3   :  { %v1208_v59 = vpop.f32.mrf.mxu0  ;;  %5101 = vtanh.f32 %v1841_v60  ;;  %3493 = vst.msk [vmem:[%s8011_s5 + $0x208] sm:$0xff] %vm156_vm1, %v3130_v52 }
 0x2b4   :  { %v1468_v9 = vmul.f32 %v1343_v15, %v7618_v24  ;;  %v7638_v61 = vadd.f32 %v7456_v45, %v1208_v59  ;;  %v5096_v34 = vpop.eup %5095  ;;  %v2212_v53 = vmul.f32 0.5, %v2087_v1  ;;  %v1717_v36 = vadd.f32 %v1592_v27, %v7607_v26  ;;  %v3134_v63 = vpop.f32.mrf.mxu1  ;;  %4813 = vmatmul.mubr.msk.f32.gmra.mxu1 %vm2362_vm2, %v2336_v31 }
 0x2b5   :  { %v4447_v12 = vpop.f32.mrf.mxu0  ;;  %v2088_v50 = vadd.f32 1.0, %v5096_v34  ;;  %v3135_v11 = vadd.f32 %v7400_v14, %v3134_v63  ;;  %4815 = vmatprep.mubr.msk.f32.mxu1 %vm5121_vm0, %v5120_v0 }
 0x2b6   :  { %v1593_v54 = vmul.f32 0.044715, %v1468_v9  ;;  %v1344_v17 = vmul.f32 %v7638_v61, %v7638_v61  ;;  %v2337_v20 = vmul.f32 %v2212_v53, %v7527_v58  ;;  %v1842_v49 = vmul.f32 0.7978846, %v1717_v36  ;;  %v4670_v25 = vpop.f32.mrf.mxu1 }
 0x2b7   :  { %v1213_v51 = vpop.f32.mrf.mxu0  ;;  %v2213_v55 = vmul.f32 0.5, %v2088_v50  ;;  %3494 = vst.msk [vmem:[%s8011_s5 + $0x210] sm:$0xff] %vm156_vm1, %v3135_v11 }
 0x2b8   :  { %v1718_v62 = vadd.f32 %v1593_v54, %v7618_v24  ;;  %v1469_v2 = vmul.f32 %v1344_v17, %v7638_v61  ;;  %v7655_v16 = vadd.f32 %v7456_v45, %v1213_v51  ;;  %v5098_v21 = vpop.eup %5097  ;;  %5103 = vtanh.f32 %v1842_v49  ;;  %v3139_v32 = vpop.f32.mrf.mxu1  ;;  %4816 = vmatmul.mubr.msk.f32.gmra.mxu1 %vm2362_vm2, %v2337_v20 }
 0x2b9   :  { %v4450_v58 = vpop.f32.mrf.mxu0  ;;  %v2338_v4 = vmul.f32 %v2213_v55, %v7538_v29  ;;  %v2089_v28 = vadd.f32 1.0, %v5098_v21  ;;  %4818 = vmatprep.mubr.msk.f32.mxu1 %vm5121_vm0, %v5120_v0  ;;  %v3140_v7 = vadd.f32 %v7400_v14, %v3139_v32 }
 0x2ba   :  { %v1843_v10 = vmul.f32 0.7978846, %v1718_v62  ;;  %v1594_v22 = vmul.f32 0.044715, %v1469_v2  ;;  %v1345_v57 = vmul.f32 %v7655_v16, %v7655_v16  ;;  %v4673_v30 = vpop.f32.mrf.mxu1 }
 0x2bb   :  { %v1218_v39 = vpop.f32.mrf.mxu0  ;;  %v2214_v42 = vmul.f32 0.5, %v2089_v28  ;;  %3495 = vst.msk [vmem:[%s8011_s5 + $0x218] sm:$0xff] %vm156_vm1, %v3140_v7 }
 0x2bc   :  { %5105 = vtanh.f32 %v1843_v10  ;;  %v1719_v33 = vadd.f32 %v1594_v22, %v7638_v61  ;;  %v7666_v37 = vadd.f32 %v7456_v45, %v1218_v39  ;;  %v5100_v29 = vpop.eup %5099  ;;  %v1470_v13 = vmul.f32 %v1345_v57, %v7655_v16  ;;  %v3144_v35 = vpop.f32.mrf.mxu1  ;;  %4819 = vmatmul.mubr.msk.f32.gmra.mxu1 %vm2362_vm2, %v2338_v4 }
 0x2bd   :  { %v4453_v38 = vpop.f32.mrf.mxu0  ;;  %v2339_v18 = vmul.f32 %v2214_v42, %v7554_v43  ;;  %v2090_v23 = vadd.f32 1.0, %v5100_v29  ;;  %4821 = vmatprep.mubr.msk.f32.mxu1 %vm5121_vm0, %v5120_v0  ;;  %v3145_v47 = vadd.f32 %v7400_v14, %v3144_v35 }
 0x2be   :  { %v1844_v44 = vmul.f32 0.7978846, %v1719_v33  ;;  %v1346_v45 = vmul.f32 %v7666_v37, %v7666_v37  ;;  %v1595_v8 = vmul.f32 0.044715, %v1470_v13  ;;  %v4676_v19 = vpop.f32.mrf.mxu1 }
 0x2bf   :  { %v2804_v46 = vpop.f32.mrf.mxu0  ;;  %v2215_v40 = vmul.f32 0.5, %v2090_v23  ;;  %3496 = vst.msk [vmem:[%s8011_s5 + $0x220] sm:$0xff] %vm156_vm1, %v3145_v47 }
 0x2c0   :  { %5107 = vtanh.f32 %v1844_v44  ;;  %v1471_v56 = vmul.f32 %v1346_v45, %v7666_v37  ;;  %v2805_v48 = vadd.f32 %v7400_v14, %v2804_v46  ;;  %v5102_v43 = vpop.eup %5101  ;;  %v1720_v3 = vadd.f32 %v1595_v8, %v7655_v16  ;;  %v3149_v31 = vpop.f32.mrf.mxu1  ;;  %4822 = vmatmul.mubr.msk.f32.gmra.mxu1 %vm2362_vm2, %v2339_v18 }
 0x2c1   :  { %v4472_v60 = vpop.f32.mrf.mxu0  ;;  %v2340_v15 = vmul.f32 %v2215_v40, %v7571_v5  ;;  %v2091_v52 = vadd.f32 1.0, %v5102_v43  ;;  %v3150_v27 = vadd.f32 %v7400_v14, %v3149_v31  ;;  %4824 = vmatprep.mubr.msk.f32.mxu1 %vm5121_vm0, %v5120_v0 }
 0x2c2   :  { %v1596_v1 = vmul.f32 0.044715, %v1471_v56  ;;  %3428 = vst.msk [vmem:[%s8011_s5] sm:$0xff] %vm156_vm1, %v2805_v48  ;;  %v1845_v41 = vmul.f32 0.7978846, %v1720_v3  ;;  %v4679_v59 = vpop.f32.mrf.mxu1 }
 0x2c3   :  { %v2216_v9 = vmul.f32 0.5, %v2091_v52  ;;  %3497 = vst.msk [vmem:[%s8011_s5 + $0x228] sm:$0xff] %vm156_vm1, %v3150_v27 }
 0x2c4   :  { %v1721_v34 = vadd.f32 %v1596_v1, %v7666_v37  ;;  %5109 = vtanh.f32 %v1845_v41  ;;  %v3154_v5 = vpop.f32.mrf.mxu1  ;;  %4825 = vmatmul.mubr.msk.f32.gmra.mxu1 %vm2362_vm2, %v2340_v15 }
 0x2c5   :  { %v5104_v53 = vpop.eup %5103  ;;  %v2341_v36 = vmul.f32 %v2216_v9, %v7587_v6  ;;  %v3155_v12 = vadd.f32 %v7400_v14, %v3154_v5  ;;  %4827 = vmatprep.mubr.msk.f32.mxu1 %vm5121_vm0, %v5120_v0 }
 0x2c6   :  { %v1846_v63 = vmul.f32 0.7978846, %v1721_v34  ;;  %v2092_v50 = vadd.f32 1.0, %v5104_v53  ;;  %v4682_v54 = vpop.f32.mrf.mxu1 }
 0x2c7   :  { %3498 = vst.msk [vmem:[%s8011_s5 + $0x230] sm:$0xff] %vm156_vm1, %v3155_v12 }
 0x2c8   :  { %5111 = vtanh.f32 %v1846_v63  ;;  %v2217_v11 = vmul.f32 0.5, %v2092_v50  ;;  %v3159_v20 = vpop.f32.mrf.mxu1  ;;  %4828 = vmatmul.mubr.msk.f32.gmra.mxu1 %vm2362_vm2, %v2341_v36 }
 0x2c9   :  { %v5106_v17 = vpop.eup %5105  ;;  %v3160_v49 = vadd.f32 %v7400_v14, %v3159_v20  ;;  %4830 = vmatprep.mubr.msk.f32.mxu1 %vm5121_vm0, %v5120_v0 }
 0x2ca   :  { %v2093_v6 = vadd.f32 1.0, %v5106_v17  ;;  %v2342_v25 = vmul.f32 %v2217_v11, %v7607_v26  ;;  %v4685_v51 = vpop.f32.mrf.mxu1 }
 0x2cb   :  { %3499 = vst.msk [vmem:[%s8011_s5 + $0x238] sm:$0xff] %vm156_vm1, %v3160_v49 }
 0x2cc   :  { %v2218_v55 = vmul.f32 0.5, %v2093_v6  ;;  %v3164_v2 = vpop.f32.mrf.mxu1  ;;  %4831 = vmatmul.mubr.msk.f32.gmra.mxu1 %vm2362_vm2, %v2342_v25 }
 0x2cd   :  { %v5108_v62 = vpop.eup %5107  ;;  %v3165_v58 = vadd.f32 %v7400_v14, %v3164_v2  ;;  %4833 = vmatprep.mubr.msk.f32.mxu1 %vm5121_vm0, %v5120_v0 }
 0x2ce   :  { %v2343_v21 = vmul.f32 %v2218_v55, %v7618_v24  ;;  %v2094_v32 = vadd.f32 1.0, %v5108_v62  ;;  %v4688_v26 = vpop.f32.mrf.mxu1 }
 0x2cf   :  { %3500 = vst.msk [vmem:[%s8011_s5 + $0x240] sm:$0xff] %vm156_vm1, %v3165_v58 }
 0x2d0   :  { %v2219_v4 = vmul.f32 0.5, %v2094_v32  ;;  %v3169_v28 = vpop.f32.mrf.mxu1  ;;  %4834 = vmatmul.mubr.msk.f32.gmra.mxu1 %vm2362_vm2, %v2343_v21 }
 0x2d1   :  { %v5110_v10 = vpop.eup %5109  ;;  %v3170_v24 = vadd.f32 %v7400_v14, %v3169_v28  ;;  %4836 = vmatprep.mubr.msk.f32.mxu1 %vm5121_vm0, %v5120_v0 }
 0x2d2   :  { %v2344_v22 = vmul.f32 %v2219_v4, %v7638_v61  ;;  %v2095_v57 = vadd.f32 1.0, %v5110_v10  ;;  %v4691_v7 = vpop.f32.mrf.mxu1 }
 0x2d3   :  { %3501 = vst.msk [vmem:[%s8011_s5 + $0x248] sm:$0xff] %vm156_vm1, %v3170_v24 }
 0x2d4   :  { %v2220_v39 = vmul.f32 0.5, %v2095_v57  ;;  %v3174_v42 = vpop.f32.mrf.mxu1  ;;  %4837 = vmatmul.mubr.msk.f32.gmra.mxu1 %vm2362_vm2, %v2344_v22 }
 0x2d5   :  { %v5112_v30 = vpop.eup %5111  ;;  %v3175_v61 = vadd.f32 %v7400_v14, %v3174_v42  ;;  %4839 = vmatprep.mubr.msk.f32.mxu1 %vm5121_vm0, %v5120_v0 }
 0x2d6   :  { %v2096_v33 = vadd.f32 1.0, %v5112_v30  ;;  %v2345_v29 = vmul.f32 %v2220_v39, %v7655_v16  ;;  %v4694_v13 = vpop.f32.mrf.mxu1 }
 0x2d7   :  { %3502 = vst.msk [vmem:[%s8011_s5 + $0x250] sm:$0xff] %vm156_vm1, %v3175_v61 }
 0x2d8   :  { %v2221_v35 = vmul.f32 0.5, %v2096_v33  ;;  %v3179_v38 = vpop.f32.mrf.mxu1  ;;  %4840 = vmatmul.mubr.msk.f32.gmra.mxu1 %vm2362_vm2, %v2345_v29 }
 0x2d9   :  { %v3180_v23 = vadd.f32 %v7400_v14, %v3179_v38  ;;  %4842 = vmatprep.mubr.msk.f32.mxu1 %vm5121_vm0, %v5120_v0 }
 0x2da   :  { %v2346_v18 = vmul.f32 %v2221_v35, %v7666_v37  ;;  %v4697_v44 = vpop.f32.mrf.mxu1 }
 0x2db   :  { %3503 = vst.msk [vmem:[%s8011_s5 + $0x258] sm:$0xff] %vm156_vm1, %v3180_v23 }
 0x2dc   :  { %v3184_v16 = vpop.f32.mrf.mxu1  ;;  %4843 = vmatmul.mubr.msk.f32.gmra.mxu1 %vm2362_vm2, %v2346_v18 }
 0x2dd   :  { %v3185_v45 = vadd.f32 %v7400_v14, %v3184_v16 }
 0x2de   :  { %v4700_v8 = vpop.f32.mrf.mxu1 }
 0x2df   :  { %3504 = vst.msk [vmem:[%s8011_s5 + $0x260] sm:$0xff] %vm156_vm1, %v3185_v45 }
 0x2e0   :  { %v3189_v37 = vpop.f32.mrf.mxu1 }
 0x2e1   :  { %v3190_v0 = vadd.f32 %v7400_v14, %v3189_v37 }
 0x2e2   :  { %v4703_v47 = vpop.f32.mrf.mxu1 }
 0x2e3   :  { %3505 = vst.msk [vmem:[%s8011_s5 + $0x268] sm:$0xff] %vm156_vm1, %v3190_v0 }
 0x2e4   :  { %v3194_v19 = vpop.f32.mrf.mxu1 }
 0x2e5   :  { %v3195_v46 = vadd.f32 %v7400_v14, %v3194_v19 }
 0x2e6   :  { %v4706_v40 = vpop.f32.mrf.mxu1 }
 0x2e7   :  { %3506 = vst.msk [vmem:[%s8011_s5 + $0x270] sm:$0xff] %vm156_vm1, %v3195_v46 }
 0x2e8   :  { %v3199_v56 = vpop.f32.mrf.mxu1 }
 0x2e9   :  { %v3200_v48 = vadd.f32 %v7400_v14, %v3199_v56 }
 0x2ea   :  { %v4709_v43 = vpop.f32.mrf.mxu1 }
 0x2eb   :  { %3507 = vst.msk [vmem:[%s8011_s5 + $0x278] sm:$0xff] %vm156_vm1, %v3200_v48 }
 0x2ec   :  { %v3204_v3 = vpop.f32.mrf.mxu1 }
 0x2ed   :  { %v3205_v31 = vadd.f32 %v7400_v14, %v3204_v3 }
 0x2ee   :  { %v4712_v60 = vpop.f32.mrf.mxu1 }
 0x2ef   :  { %3508 = vst.msk [vmem:[%s8011_s5 + $0x280] sm:$0xff] %vm156_vm1, %v3205_v31 }
 0x2f0   :  { %v3209_v15 = vpop.f32.mrf.mxu1 }
 0x2f1   :  { %v3210_v52 = vadd.f32 %v7400_v14, %v3209_v15 }
 0x2f2   :  { %v4715_v1 = vpop.f32.mrf.mxu1 }
 0x2f3   :  { %3509 = vst.msk [vmem:[%s8011_s5 + $0x288] sm:$0xff] %vm156_vm1, %v3210_v52  ;;  %v7889_v52 = vld [vmem:[%s8010_s4] ss:$0 sm:$0xff] }
 0x2f4   :  { %v3214_v27 = vpop.f32.mrf.mxu1 }
 0x2f5   :  { %v3215_v41 = vadd.f32 %v7400_v14, %v3214_v27 }
 0x2f6   :  { %v4718_v59 = vpop.f32.mrf.mxu1 }
 0x2f7   :  { %3510 = vst.msk [vmem:[%s8011_s5 + $0x290] sm:$0xff] %vm156_vm1, %v3215_v41 }
 0x2f8   :  { %v3219_v9 = vpop.f32.mrf.mxu1 }
 0x2f9   :  { %v3220_v34 = vadd.f32 %v7400_v14, %v3219_v9 }
 0x2fa   :  { %v4721_v5 = vpop.f32.mrf.mxu1 }
 0x2fb   :  { %3511 = vst.msk [vmem:[%s8011_s5 + $0x298] sm:$0xff] %vm156_vm1, %v3220_v34 }
 0x2fc   :  { %v3224_v53 = vpop.f32.mrf.mxu1 }
 0x2fd   :  { %v3225_v36 = vadd.f32 %v7400_v14, %v3224_v53 }
 0x2fe   :  { %v4724_v63 = vpop.f32.mrf.mxu1 }
 0x2ff   :  { %3512 = vst.msk [vmem:[%s8011_s5 + $0x2a0] sm:$0xff] %vm156_vm1, %v3225_v36 }
 0x300   :  { %v3229_v12 = vpop.f32.mrf.mxu1 }
 0x301   :  { %v3230_v50 = vadd.f32 %v7400_v14, %v3229_v12 }
 0x302   :  { %v4727_v54 = vpop.f32.mrf.mxu1 }
 0x303   :  { %3513 = vst.msk [vmem:[%s8011_s5 + $0x2a8] sm:$0xff] %vm156_vm1, %v3230_v50 }
 0x304   :  { %v3234_v17 = vpop.f32.mrf.mxu1 }
 0x305   :  { %v3235_v11 = vadd.f32 %v7400_v14, %v3234_v17 }
 0x306   :  { %v4730_v20 = vpop.f32.mrf.mxu1 }
 0x307   :  { %3514 = vst.msk [vmem:[%s8011_s5 + $0x2b0] sm:$0xff] %vm156_vm1, %v3235_v11 }
 0x308   :  { %v3239_v6 = vpop.f32.mrf.mxu1 }
 0x309   :  { %v3240_v49 = vadd.f32 %v7400_v14, %v3239_v6 }
 0x30a   :  { %v4733_v25 = vpop.f32.mrf.mxu1 }
 0x30b   :  { %3515 = vst.msk [vmem:[%s8011_s5 + $0x2b8] sm:$0xff] %vm156_vm1, %v3240_v49 }
 0x30c   :  { %v3244_v51 = vpop.f32.mrf.mxu1 }
 0x30d   :  { %v3245_v55 = vadd.f32 %v7400_v14, %v3244_v51 }
 0x30e   :  { %v4736_v62 = vpop.f32.mrf.mxu1 }
 0x30f   :  { %3516 = vst.msk [vmem:[%s8011_s5 + $0x2c0] sm:$0xff] %vm156_vm1, %v3245_v55 }
 0x310   :  { %v3249_v2 = vpop.f32.mrf.mxu1 }
 0x311   :  { %v3250_v21 = vadd.f32 %v7400_v14, %v3249_v2 }
 0x312   :  { %v4739_v32 = vpop.f32.mrf.mxu1 }
 0x313   :  { %3517 = vst.msk [vmem:[%s8011_s5 + $0x2c8] sm:$0xff] %vm156_vm1, %v3250_v21 }
 0x314   :  { %v3254_v58 = vpop.f32.mrf.mxu1 }
 0x315   :  { %v3255_v26 = vadd.f32 %v7400_v14, %v3254_v58 }
 0x316   :  { %v4742_v4 = vpop.f32.mrf.mxu1 }
 0x317   :  { %3518 = vst.msk [vmem:[%s8011_s5 + $0x2d0] sm:$0xff] %vm156_vm1, %v3255_v26 }
 0x318   :  { %v3259_v28 = vpop.f32.mrf.mxu1 }
 0x319   :  { %v3260_v10 = vadd.f32 %v7400_v14, %v3259_v28 }
 0x31a   :  { %v4745_v22 = vpop.f32.mrf.mxu1 }
 0x31b   :  { %3519 = vst.msk [vmem:[%s8011_s5 + $0x2d8] sm:$0xff] %vm156_vm1, %v3260_v10 }
 0x31c   :  { %v3264_v24 = vpop.f32.mrf.mxu1 }
 0x31d   :  { %v3265_v57 = vadd.f32 %v7400_v14, %v3264_v24 }
 0x31e   :  { %v4748_v7 = vpop.f32.mrf.mxu1 }
 0x31f   :  { %3520 = vst.msk [vmem:[%s8011_s5 + $0x2e0] sm:$0xff] %vm156_vm1, %v3265_v57 }
 0x320   :  { %v3269_v30 = vpop.f32.mrf.mxu1 }
 0x321   :  { %v3270_v39 = vadd.f32 %v7400_v14, %v3269_v30 }
 0x322   :  { %v4751_v42 = vpop.f32.mrf.mxu1 }
 0x323   :  { %3521 = vst.msk [vmem:[%s8011_s5 + $0x2e8] sm:$0xff] %vm156_vm1, %v3270_v39 }
 0x324   :  { %v3274_v33 = vpop.f32.mrf.mxu1 }
 0x325   :  { %v3275_v61 = vadd.f32 %v7400_v14, %v3274_v33 }
 0x326   :  { %v4754_v29 = vpop.f32.mrf.mxu1 }
 0x327   :  { %3522 = vst.msk [vmem:[%s8011_s5 + $0x2f0] sm:$0xff] %vm156_vm1, %v3275_v61 }
 0x328   :  { %v3279_v13 = vpop.f32.mrf.mxu1 }
 0x329   :  { %v3280_v35 = vadd.f32 %v7400_v14, %v3279_v13 }
 0x32a   :  { %v4757_v38 = vpop.f32.mrf.mxu1 }
 0x32b   :  { %3523 = vst.msk [vmem:[%s8011_s5 + $0x2f8] sm:$0xff] %vm156_vm1, %v3280_v35 }
 0x32c   :  { %v3284_v18 = vpop.f32.mrf.mxu1 }
 0x32d   :  { %v3285_v23 = vadd.f32 %v7400_v14, %v3284_v18 }
 0x32e   :  { %v4760_v44 = vpop.f32.mrf.mxu1 }
 0x32f   :  { %3524 = vst.msk [vmem:[%s8011_s5 + $0x300] sm:$0xff] %vm156_vm1, %v3285_v23 }
 0x330   :  { %v3289_v16 = vpop.f32.mrf.mxu1 }
 0x331   :  { %v3290_v45 = vadd.f32 %v7400_v14, %v3289_v16 }
 0x332   :  { %v4763_v8 = vpop.f32.mrf.mxu1 }
 0x333   :  { %3525 = vst.msk [vmem:[%s8011_s5 + $0x308] sm:$0xff] %vm156_vm1, %v3290_v45 }
 0x334   :  { %v3294_v37 = vpop.f32.mrf.mxu1 }
 0x335   :  { %v3295_v0 = vadd.f32 %v7400_v14, %v3294_v37 }
 0x336   :  { %v4766_v47 = vpop.f32.mrf.mxu1 }
 0x337   :  { %3526 = vst.msk [vmem:[%s8011_s5 + $0x310] sm:$0xff] %vm156_vm1, %v3295_v0 }
 0x338   :  { %v3299_v19 = vpop.f32.mrf.mxu1 }
 0x339   :  { %v3300_v46 = vadd.f32 %v7400_v14, %v3299_v19 }
 0x33a   :  { %v4769_v40 = vpop.f32.mrf.mxu1 }
 0x33b   :  { %3527 = vst.msk [vmem:[%s8011_s5 + $0x318] sm:$0xff] %vm156_vm1, %v3300_v46 }
 0x33c   :  { %v3304_v56 = vpop.f32.mrf.mxu1 }
 0x33d   :  { %v3305_v48 = vadd.f32 %v7400_v14, %v3304_v56 }
 0x33e   :  { %v4772_v43 = vpop.f32.mrf.mxu1 }
 0x33f   :  { %3528 = vst.msk [vmem:[%s8011_s5 + $0x320] sm:$0xff] %vm156_vm1, %v3305_v48 }
 0x340   :  { %v3309_v3 = vpop.f32.mrf.mxu1 }
 0x341   :  { %v3310_v31 = vadd.f32 %v7400_v14, %v3309_v3 }
 0x342   :  { %v4775_v60 = vpop.f32.mrf.mxu1 }
 0x343   :  { %3529 = vst.msk [vmem:[%s8011_s5 + $0x328] sm:$0xff] %vm156_vm1, %v3310_v31 }
 0x344   :  { %v3314_v15 = vpop.f32.mrf.mxu1 }
 0x345   :  { %v3315_v1 = vadd.f32 %v7889_v52, %v3314_v15 }
 0x346   :  { %v4778_v27 = vpop.f32.mrf.mxu1 }
 0x347   :  { %3530 = vst.msk [vmem:[%s8011_s5 + $0x330] sm:$0xff] %vm156_vm1, %v3315_v1 }
 0x348   :  { %v3319_v14 = vpop.f32.mrf.mxu1 }
 0x349   :  { %v3320_v41 = vadd.f32 %v7889_v52, %v3319_v14 }
 0x34a   :  { %v4781_v59 = vpop.f32.mrf.mxu1 }
 0x34b   :  { %3531 = vst.msk [vmem:[%s8011_s5 + $0x338] sm:$0xff] %vm156_vm1, %v3320_v41 }
 0x34c   :  { %v3324_v9 = vpop.f32.mrf.mxu1 }
 0x34d   :  { %v3325_v34 = vadd.f32 %v7889_v52, %v3324_v9 }
 0x34e   :  { %v4784_v5 = vpop.f32.mrf.mxu1 }
 0x34f   :  { %3532 = vst.msk [vmem:[%s8011_s5 + $0x340] sm:$0xff] %vm156_vm1, %v3325_v34 }
 0x350   :  { %v3329_v53 = vpop.f32.mrf.mxu1 }
 0x351   :  { %v3330_v36 = vadd.f32 %v7889_v52, %v3329_v53 }
 0x352   :  { %v4787_v63 = vpop.f32.mrf.mxu1 }
 0x353   :  { %3533 = vst.msk [vmem:[%s8011_s5 + $0x348] sm:$0xff] %vm156_vm1, %v3330_v36 }
 0x354   :  { %v3334_v12 = vpop.f32.mrf.mxu1 }
 0x355   :  { %v3335_v50 = vadd.f32 %v7889_v52, %v3334_v12 }
 0x356   :  { %v4790_v54 = vpop.f32.mrf.mxu1 }
 0x357   :  { %3534 = vst.msk [vmem:[%s8011_s5 + $0x350] sm:$0xff] %vm156_vm1, %v3335_v50 }
 0x358   :  { %v3339_v17 = vpop.f32.mrf.mxu1 }
 0x359   :  { %v3340_v11 = vadd.f32 %v7889_v52, %v3339_v17 }
 0x35a   :  { %v4793_v20 = vpop.f32.mrf.mxu1 }
 0x35b   :  { %3535 = vst.msk [vmem:[%s8011_s5 + $0x358] sm:$0xff] %vm156_vm1, %v3340_v11 }
 0x35c   :  { %v3344_v6 = vpop.f32.mrf.mxu1 }
 0x35d   :  { %v3345_v49 = vadd.f32 %v7889_v52, %v3344_v6 }
 0x35e   :  { %v4796_v25 = vpop.f32.mrf.mxu1 }
 0x35f   :  { %3536 = vst.msk [vmem:[%s8011_s5 + $0x360] sm:$0xff] %vm156_vm1, %v3345_v49 }
 0x360   :  { %v3349_v51 = vpop.f32.mrf.mxu1 }
 0x361   :  { %v3350_v55 = vadd.f32 %v7889_v52, %v3349_v51 }
 0x362   :  { %v4799_v62 = vpop.f32.mrf.mxu1 }
 0x363   :  { %3537 = vst.msk [vmem:[%s8011_s5 + $0x368] sm:$0xff] %vm156_vm1, %v3350_v55 }
 0x364   :  { %v3354_v2 = vpop.f32.mrf.mxu1 }
 0x365   :  { %v3355_v21 = vadd.f32 %v7889_v52, %v3354_v2 }
 0x366   :  { %v4802_v32 = vpop.f32.mrf.mxu1 }
 0x367   :  { %3538 = vst.msk [vmem:[%s8011_s5 + $0x370] sm:$0xff] %vm156_vm1, %v3355_v21 }
 0x368   :  { %v3359_v58 = vpop.f32.mrf.mxu1 }
 0x369   :  { %v3360_v26 = vadd.f32 %v7889_v52, %v3359_v58 }
 0x36a   :  { %v4805_v4 = vpop.f32.mrf.mxu1 }
 0x36b   :  { %3539 = vst.msk [vmem:[%s8011_s5 + $0x378] sm:$0xff] %vm156_vm1, %v3360_v26 }
 0x36c   :  { %v3364_v28 = vpop.f32.mrf.mxu1 }
 0x36d   :  { %v3365_v10 = vadd.f32 %v7889_v52, %v3364_v28 }
 0x36e   :  { %v4808_v22 = vpop.f32.mrf.mxu1 }
 0x36f   :  { %3540 = vst.msk [vmem:[%s8011_s5 + $0x380] sm:$0xff] %vm156_vm1, %v3365_v10 }
 0x370   :  { %v3369_v24 = vpop.f32.mrf.mxu1 }
 0x371   :  { %v3370_v57 = vadd.f32 %v7889_v52, %v3369_v24 }
 0x372   :  { %v4811_v7 = vpop.f32.mrf.mxu1 }
 0x373   :  { %3541 = vst.msk [vmem:[%s8011_s5 + $0x388] sm:$0xff] %vm156_vm1, %v3370_v57 }
 0x374   :  { %v3374_v30 = vpop.f32.mrf.mxu1 }
 0x375   :  { %v3375_v39 = vadd.f32 %v7889_v52, %v3374_v30 }
 0x376   :  { %v4814_v42 = vpop.f32.mrf.mxu1 }
 0x377   :  { %3542 = vst.msk [vmem:[%s8011_s5 + $0x390] sm:$0xff] %vm156_vm1, %v3375_v39 }
 0x378   :  { %v3379_v33 = vpop.f32.mrf.mxu1 }
 0x379   :  { %v3380_v61 = vadd.f32 %v7889_v52, %v3379_v33 }
 0x37a   :  { %v4817_v29 = vpop.f32.mrf.mxu1 }
 0x37b   :  { %3543 = vst.msk [vmem:[%s8011_s5 + $0x398] sm:$0xff] %vm156_vm1, %v3380_v61 }
 0x37c   :  { %v3384_v13 = vpop.f32.mrf.mxu1 }
 0x37d   :  { %v3385_v35 = vadd.f32 %v7889_v52, %v3384_v13 }
 0x37e   :  { %v4820_v38 = vpop.f32.mrf.mxu1 }
 0x37f   :  { %3544 = vst.msk [vmem:[%s8011_s5 + $0x3a0] sm:$0xff] %vm156_vm1, %v3385_v35 }
 0x380   :  { %v3389_v18 = vpop.f32.mrf.mxu1 }
 0x381   :  { %v3390_v23 = vadd.f32 %v7889_v52, %v3389_v18 }
 0x382   :  { %v4823_v44 = vpop.f32.mrf.mxu1 }
 0x383   :  { %3545 = vst.msk [vmem:[%s8011_s5 + $0x3a8] sm:$0xff] %vm156_vm1, %v3390_v23 }
 0x384   :  { %v3394_v16 = vpop.f32.mrf.mxu1 }
 0x385   :  { %v3395_v45 = vadd.f32 %v7889_v52, %v3394_v16 }
 0x386   :  { %v4826_v8 = vpop.f32.mrf.mxu1 }
 0x387   :  { %3546 = vst.msk [vmem:[%s8011_s5 + $0x3b0] sm:$0xff] %vm156_vm1, %v3395_v45 }
 0x388   :  { %v3399_v37 = vpop.f32.mrf.mxu1 }
 0x389   :  { %v3400_v0 = vadd.f32 %v7889_v52, %v3399_v37 }
 0x38a   :  { %v4829_v47 = vpop.f32.mrf.mxu1 }
 0x38b   :  { %3547 = vst.msk [vmem:[%s8011_s5 + $0x3b8] sm:$0xff] %vm156_vm1, %v3400_v0 }
 0x38c   :  { %v3404_v19 = vpop.f32.mrf.mxu1 }
 0x38d   :  { %v3405_v46 = vadd.f32 %v7889_v52, %v3404_v19 }
 0x38e   :  { %v4832_v40 = vpop.f32.mrf.mxu1 }
 0x38f   :  { %3548 = vst.msk [vmem:[%s8011_s5 + $0x3c0] sm:$0xff] %vm156_vm1, %v3405_v46 }
 0x390   :  { %v3409_v56 = vpop.f32.mrf.mxu1 }
 0x391   :  { %v3410_v48 = vadd.f32 %v7889_v52, %v3409_v56 }
 0x392   :  { %v4835_v43 = vpop.f32.mrf.mxu1 }
 0x393   :  { %3549 = vst.msk [vmem:[%s8011_s5 + $0x3c8] sm:$0xff] %vm156_vm1, %v3410_v48 }
 0x394   :  { %v3414_v3 = vpop.f32.mrf.mxu1 }
 0x395   :  { %v3415_v31 = vadd.f32 %v7889_v52, %v3414_v3 }
 0x396   :  { %v4838_v60 = vpop.f32.mrf.mxu1 }
 0x397   :  { %3550 = vst.msk [vmem:[%s8011_s5 + $0x3d0] sm:$0xff] %vm156_vm1, %v3415_v31 }
 0x398   :  { %v3419_v15 = vpop.f32.mrf.mxu1 }
 0x399   :  { %v3420_v1 = vadd.f32 %v7889_v52, %v3419_v15 }
 0x39a   :  { %v4841_v27 = vpop.f32.mrf.mxu1 }
 0x39b   :  { %3551 = vst.msk [vmem:[%s8011_s5 + $0x3d8] sm:$0xff] %vm156_vm1, %v3420_v1 }
 0x39c   :  { %v3424_v14 = vpop.f32.mrf.mxu1 }
 0x39d   :  { %v3425_v41 = vadd.f32 %v7889_v52, %v3424_v14 }
 0x39e   :  { %v4844_v59 = vpop.f32.mrf.mxu1 }
 0x39f   :  { %3552 = vst.msk [vmem:[%s8011_s5 + $0x3e0] sm:$0xff] %vm156_vm1, %v3425_v41 }

</bundles_post_ra>
